<compile_context>
chip_gen: v7x
topology: tpu7x:2x2x1
jax: 0.10.0
libtpu: 0.0.40
codegen_flags: <defaults>
</compile_context>

<pallas_src>
import math
import functools

import jax
import jax.numpy as jnp
from jax import lax
from jax.experimental import pallas as pl
from jax.experimental.pallas import tpu as pltpu

# ----------------------------- "config" ------------------------------------
B = 2            # batch
S = 16           # sequence length
E = 32           # config.embedding.dimension
H = 32           # config.HybridRCNN.hidden_dimension (per direction)
D = 2 * H        # bidirectional hidden (= RNN output feature dim)
A = 32           # config.HybridRCNN.attention_dimension
L = 8            # config.HybridRCNN.num_labels
# num_layers = 1, bidirectional = True, rnn_type = GRU


# ------------------- fused bidirectional-GRU + label-attention kernel -------
def hybrid_kernel(x_ref, mask_ref,
                  wif_ref, whf_ref, bif_ref, bhf_ref,
                  wib_ref, whb_ref, bib_ref, bhb_ref,
                  wa_ref, ba_ref, wv_ref, lab_ref,
                  res_ref,
                  gif_scr, gib_scr, outf_scr, outb_scr, v_scr,
                  *, seq_len, batch, hidden):
    f32 = jnp.float32
    S_, B_, H_ = seq_len, batch, hidden

    # ---- (1) hoisted input projections: one big matmul per direction --------
    x = x_ref[...]                                                 # (S*B, E)
    gif_scr[...] = jnp.dot(x, wif_ref[...],
                           preferred_element_type=f32) + bif_ref[...]
    gib_scr[...] = jnp.dot(x, wib_ref[...],
                           preferred_element_type=f32) + bib_ref[...]

    whf = whf_ref[...]
    bhf = bhf_ref[...]
    whb = whb_ref[...]
    bhb = bhb_ref[...]

    def gru_step(gi, h, whh, bhh):
        # gate order (PyTorch): [reset | update | new] along the 3H axis
        gh = jnp.dot(h, whh, preferred_element_type=f32) + bhh      # (B, 3H)
        r = jax.nn.sigmoid(gi[:, 0:H_] + gh[:, 0:H_])
        z = jax.nn.sigmoid(gi[:, H_:2 * H_] + gh[:, H_:2 * H_])
        n = jnp.tanh(gi[:, 2 * H_:] + r * gh[:, 2 * H_:])
        return (1.0 - z) * n + z * h

    # ---- (2) serial recurrence: only h @ W_hh on the critical path ----------
    def body(t, carry):
        hf, hb = carry
        rowf = t * B_                  # forward time index t
        rowb = (S_ - 1 - t) * B_       # backward time index S-1-t

        mf = mask_ref[pl.ds(rowf, B_), :]                           # (B, 1)
        gif = gif_scr[pl.ds(rowf, B_), :]                           # (B, 3H)
        hf_new = gru_step(gif, hf, whf, bhf)
        hf = mf * hf_new + (1.0 - mf) * hf                          # packed-seq mask
        outf_scr[pl.ds(rowf, B_), :] = mf * hf                      # padded -> 0

        mb = mask_ref[pl.ds(rowb, B_), :]
        gib = gib_scr[pl.ds(rowb, B_), :]
        hb_new = gru_step(gib, hb, whb, bhb)
        hb = mb * hb_new + (1.0 - mb) * hb
        outb_scr[pl.ds(rowb, B_), :] = mb * hb
        return hf, hb

    h0 = jnp.zeros((B_, H_), f32)
    _ = lax.fori_loop(0, S_, body, (h0, h0), unroll=True)

    # ---- (3) label attention (batch-flattened projection, per-batch softmax)
    hf_all = outf_scr[...]                                          # (S*B, H)
    hb_all = outb_scr[...]                                          # (S*B, H)
    h_flat = jnp.concatenate([hf_all, hb_all], axis=-1)             # (S*B, 2H)

    u = jnp.tanh(jnp.dot(h_flat, wa_ref[...],
                         preferred_element_type=f32) + ba_ref[...])  # (S*B, A)
    v_scr[...] = jnp.dot(u, wv_ref[...], preferred_element_type=f32)  # (S*B, L)

    lab = lab_ref[...]                                              # (L, 2H)
    eps2 = 1e-24                                                    # (1e-12)^2

    for b in range(B_):                                             # B is tiny & static
        # batch b occupies rows b, b+B, b+2B, ... (time-major flat layout)
        h_b = jnp.concatenate(
            [outf_scr[pl.ds(b, S_, stride=B_), :],
             outb_scr[pl.ds(b, S_, stride=B_), :]], axis=-1)        # (S, 2H)

        # --- branch 1: LabelSumAttention, softmax over the sequence axis ---
        v_b = v_scr[pl.ds(b, S_, stride=B_), :]                     # (S, L)
        v_b = v_b - jnp.max(v_b, axis=0, keepdims=True)
        ev = jnp.exp(v_b)
        alpha = ev * pl.reciprocal(jnp.sum(ev, axis=0, keepdims=True), approx=True)
        r1 = lax.dot_general(alpha, h_b, (((0,), (0,)), ((), ())),
                             preferred_element_type=f32)            # (L, 2H)
        r1 = r1 * lax.rsqrt(jnp.maximum(
            jnp.sum(r1 * r1, axis=-1, keepdims=True), eps2))

        # --- branch 2: softmax(label_emb @ h^T) @ h -------------------------
        s = lax.dot_general(lab, h_b, (((1,), (1,)), ((), ())),
                            preferred_element_type=f32)             # (L, S)
        s = s - jnp.max(s, axis=-1, keepdims=True)
        es = jnp.exp(s)
        sm = es * pl.reciprocal(jnp.sum(es, axis=-1, keepdims=True), approx=True)
        r2 = jnp.dot(sm, h_b, preferred_element_type=f32)           # (L, 2H)
        r2 = r2 * lax.rsqrt(jnp.maximum(
            jnp.sum(r2 * r2, axis=-1, keepdims=True), eps2))

        res_ref[b] = jnp.concatenate([r1, r2], axis=-1).astype(res_ref.dtype)


# ------------------------------- wrapper ------------------------------------
def hybrid_rnn_forward(embedding, seq_length, params):
    # embedding: (B, S, E), seq_length: (B,) int
    b, s, e = embedding.shape
    h = params["w_hh_f"].shape[0]
    d = 2 * h
    l = params["label_emb"].shape[0]

    # time-major flattened activations: row index = t * B + b
    x_flat = jnp.transpose(embedding, (1, 0, 2)).reshape(s * b, e)
    lens = seq_length.astype(jnp.int32)
    mask = (jnp.arange(s, dtype=jnp.int32)[:, None] < lens[None, :])
    mask_flat = mask.astype(jnp.float32).reshape(s * b, 1)          # (S*B, 1)

    kernel = functools.partial(hybrid_kernel, seq_len=s, batch=b, hidden=h)
    return pl.pallas_call(
        kernel,
        out_shape=jax.ShapeDtypeStruct((b, l, 2 * d), jnp.float32),
        scratch_shapes=[
            pltpu.VMEM((s * b, 3 * h), jnp.float32),   # Gi forward  (precomputed)
            pltpu.VMEM((s * b, 3 * h), jnp.float32),   # Gi backward (precomputed)
            pltpu.VMEM((s * b, h), jnp.float32),       # fwd RNN outputs (time-major flat)
            pltpu.VMEM((s * b, h), jnp.float32),       # bwd RNN outputs
            pltpu.VMEM((s * b, l), jnp.float32),       # attention logits
        ],
    )(x_flat, mask_flat,
      params["w_ih_f"], params["w_hh_f"], params["b_ih_f"], params["b_hh_f"],
      params["w_ih_b"], params["w_hh_b"], params["b_ih_b"], params["b_hh_b"],
      params["w_att"], params["b_att"], params["w_vec"], params["label_emb"])


def init_params(key):
    ks = jax.random.split(key, 12)
    bg = 1.0 / math.sqrt(H)          # torch GRU init bound
    ba_ = 1.0 / math.sqrt(D)         # Linear(D, A) bound
    bv_ = 1.0 / math.sqrt(A)         # Linear(A, L) bound (no bias)
    u = lambda k, shape, bnd: jax.random.uniform(k, shape, jnp.float32, -bnd, bnd)
    return dict(
        # fused gate layout: columns = [reset | update | new]
        w_ih_f=u(ks[0], (E, 3 * H), bg), w_hh_f=u(ks[1], (H, 3 * H), bg),
        b_ih_f=u(ks[2], (1, 3 * H), bg), b_hh_f=u(ks[3], (1, 3 * H), bg),
        w_ih_b=u(ks[4], (E, 3 * H), bg), w_hh_b=u(ks[5], (H, 3 * H), bg),
        b_ih_b=u(ks[6], (1, 3 * H), bg), b_hh_b=u(ks[7], (1, 3 * H), bg),
        w_att=u(ks[8], (D, A), ba_),    b_att=u(ks[9], (1, A), ba_),
        w_vec=u(ks[10], (A, L), bv_),
        label_emb=jax.random.normal(ks[11], (L, D), jnp.float32),
    )


if __name__ == "__main__":
    key = jax.random.PRNGKey(0)
    k_emb, k_par = jax.random.split(key)
    embedding = jax.random.normal(k_emb, (B, S, E), jnp.float32)
    seq_length = jnp.array([S, S - 6], dtype=jnp.int32)   # ragged lengths
    params = init_params(k_par)

    fwd = jax.jit(functools.partial(hybrid_rnn_forward, params=params))
    out = jax.block_until_ready(fwd(embedding, seq_length))

    assert out.shape == (B, L, 2 * D), out.shape
    assert bool(jnp.all(jnp.isfinite(out)))
    print("KERNEL_OK")
</pallas_src>

<mosaic_0001>
module attributes {stable_mosaic.version = 11 : i64} {
  func.func @hybrid_kernel(%arg0: memref<32x32xf32, #tpu.memory_space<vmem>>, %arg1: memref<32x1xf32, #tpu.memory_space<vmem>>, %arg2: memref<32x96xf32, #tpu.memory_space<vmem>>, %arg3: memref<32x96xf32, #tpu.memory_space<vmem>>, %arg4: memref<1x96xf32, #tpu.memory_space<vmem>>, %arg5: memref<1x96xf32, #tpu.memory_space<vmem>>, %arg6: memref<32x96xf32, #tpu.memory_space<vmem>>, %arg7: memref<32x96xf32, #tpu.memory_space<vmem>>, %arg8: memref<1x96xf32, #tpu.memory_space<vmem>>, %arg9: memref<1x96xf32, #tpu.memory_space<vmem>>, %arg10: memref<64x32xf32, #tpu.memory_space<vmem>>, %arg11: memref<1x32xf32, #tpu.memory_space<vmem>>, %arg12: memref<32x8xf32, #tpu.memory_space<vmem>>, %arg13: memref<8x64xf32, #tpu.memory_space<vmem>>, %arg14: memref<2x8x128xf32, #tpu.memory_space<vmem>>, %arg15: memref<32x96xf32, #tpu.memory_space<vmem>>, %arg16: memref<32x96xf32, #tpu.memory_space<vmem>>, %arg17: memref<32x32xf32, #tpu.memory_space<vmem>>, %arg18: memref<32x32xf32, #tpu.memory_space<vmem>>, %arg19: memref<32x8xf32, #tpu.memory_space<vmem>>) attributes {dimension_semantics = [], scalar_prefetch = 0 : i64, scratch_operands = 5 : i64, tpu.core_type = #tpu.core_type<tc>} {
    %c0 = arith.constant 0 : index
    %c0_0 = arith.constant 0 : index
    %0 = vector.load %arg0[%c0, %c0_0] : memref<32x32xf32, #tpu.memory_space<vmem>>, vector<32x32xf32>
    %c0_1 = arith.constant 0 : index
    %c0_2 = arith.constant 0 : index
    %1 = vector.load %arg2[%c0_1, %c0_2] : memref<32x96xf32, #tpu.memory_space<vmem>>, vector<32x96xf32>
    %cst = arith.constant dense<0.000000e+00> : vector<32x96xf32>
    %2 = tpu.matmul %0, %1, %cst {dimension_numbers = #tpu.dot_dimension_numbers<[1], [0], [0], [1], [0, 0, 1, 1], [], []>} : vector<32x32xf32>, vector<32x96xf32>, vector<32x96xf32> -> vector<32x96xf32>
    %c0_3 = arith.constant 0 : index
    %c0_4 = arith.constant 0 : index
    %3 = vector.load %arg4[%c0_3, %c0_4] : memref<1x96xf32, #tpu.memory_space<vmem>>, vector<1x96xf32>
    %4 = vector.broadcast %3 : vector<1x96xf32> to vector<32x96xf32>
    %5 = arith.addf %2, %4 : vector<32x96xf32>
    %c0_5 = arith.constant 0 : index
    %c0_6 = arith.constant 0 : index
    %6 = vector.load %arg15[%c0_5, %c0_6] : memref<32x96xf32, #tpu.memory_space<vmem>>, vector<32x96xf32>
    tpu.vector_store %arg15[%c0_5, %c0_6], %5 {strides = array<i32>} : memref<32x96xf32, #tpu.memory_space<vmem>>, vector<32x96xf32>,
    %c0_7 = arith.constant 0 : index
    %c0_8 = arith.constant 0 : index
    %7 = vector.load %arg6[%c0_7, %c0_8] : memref<32x96xf32, #tpu.memory_space<vmem>>, vector<32x96xf32>
    %cst_9 = arith.constant dense<0.000000e+00> : vector<32x96xf32>
    %8 = tpu.matmul %0, %7, %cst_9 {dimension_numbers = #tpu.dot_dimension_numbers<[1], [0], [0], [1], [0, 0, 1, 1], [], []>} : vector<32x32xf32>, vector<32x96xf32>, vector<32x96xf32> -> vector<32x96xf32>
    %c0_10 = arith.constant 0 : index
    %c0_11 = arith.constant 0 : index
    %9 = vector.load %arg8[%c0_10, %c0_11] : memref<1x96xf32, #tpu.memory_space<vmem>>, vector<1x96xf32>
    %10 = vector.broadcast %9 : vector<1x96xf32> to vector<32x96xf32>
    %11 = arith.addf %8, %10 : vector<32x96xf32>
    %c0_12 = arith.constant 0 : index
    %c0_13 = arith.constant 0 : index
    %12 = vector.load %arg16[%c0_12, %c0_13] : memref<32x96xf32, #tpu.memory_space<vmem>>, vector<32x96xf32>
    tpu.vector_store %arg16[%c0_12, %c0_13], %11 {strides = array<i32>} : memref<32x96xf32, #tpu.memory_space<vmem>>, vector<32x96xf32>,
    %c0_14 = arith.constant 0 : index
    %c0_15 = arith.constant 0 : index
    %13 = vector.load %arg3[%c0_14, %c0_15] : memref<32x96xf32, #tpu.memory_space<vmem>>, vector<32x96xf32>
    %c0_16 = arith.constant 0 : index
    %c0_17 = arith.constant 0 : index
    %14 = vector.load %arg5[%c0_16, %c0_17] : memref<1x96xf32, #tpu.memory_space<vmem>>, vector<1x96xf32>
    %c0_18 = arith.constant 0 : index
    %c0_19 = arith.constant 0 : index
    %15 = vector.load %arg7[%c0_18, %c0_19] : memref<32x96xf32, #tpu.memory_space<vmem>>, vector<32x96xf32>
    %c0_20 = arith.constant 0 : index
    %c0_21 = arith.constant 0 : index
    %16 = vector.load %arg9[%c0_20, %c0_21] : memref<1x96xf32, #tpu.memory_space<vmem>>, vector<1x96xf32>
    %cst_22 = arith.constant 0.000000e+00 : f32
    %17 = vector.broadcast %cst_22 : f32 to vector<2x32xf32>
    %c0_i32 = arith.constant 0 : i32
    %c2_i32 = arith.constant 2 : i32
    %18 = arith.muli %c0_i32, %c2_i32 : i32
    %c15_i32 = arith.constant 15 : i32
    %19 = arith.subi %c15_i32, %c0_i32 : i32
    %c2_i32_23 = arith.constant 2 : i32
    %20 = arith.muli %19, %c2_i32_23 : i32
    %21 = arith.index_cast %18 : i32 to index
    %c0_24 = arith.constant 0 : index
    %22 = vector.load %arg1[%21, %c0_24] : memref<32x1xf32, #tpu.memory_space<vmem>>, vector<2x1xf32>
    %23 = arith.index_cast %18 : i32 to index
    %c0_25 = arith.constant 0 : index
    %24 = vector.load %arg15[%23, %c0_25] : memref<32x96xf32, #tpu.memory_space<vmem>>, vector<2x96xf32>
    %cst_26 = arith.constant dense<0.000000e+00> : vector<2x96xf32>
    %25 = tpu.matmul %17, %13, %cst_26 {dimension_numbers = #tpu.dot_dimension_numbers<[1], [0], [0], [1], [0, 0, 1, 1], [], []>} : vector<2x32xf32>, vector<32x96xf32>, vector<2x96xf32> -> vector<2x96xf32>
    %26 = vector.broadcast %14 : vector<1x96xf32> to vector<2x96xf32>
    %27 = arith.addf %25, %26 : vector<2x96xf32>
    %28 = vector.extract_strided_slice %24 {offsets = [0, 0], sizes = [2, 32], strides = [1, 1]} : vector<2x96xf32> to vector<2x32xf32>
    %29 = vector.extract_strided_slice %27 {offsets = [0, 0], sizes = [2, 32], strides = [1, 1]} : vector<2x96xf32> to vector<2x32xf32>
    %30 = arith.addf %28, %29 : vector<2x32xf32>
    %31 = arith.negf %30 : vector<2x32xf32>
    %32 = math.exp %31 : vector<2x32xf32>
    %cst_27 = arith.constant 1.000000e+00 : f32
    %33 = vector.broadcast %cst_27 : f32 to vector<2x32xf32>
    %34 = arith.addf %33, %32 : vector<2x32xf32>
    %35 = arith.divf %33, %34 : vector<2x32xf32>
    %36 = vector.extract_strided_slice %24 {offsets = [0, 32], sizes = [2, 32], strides = [1, 1]} : vector<2x96xf32> to vector<2x32xf32>
    %37 = vector.extract_strided_slice %27 {offsets = [0, 32], sizes = [2, 32], strides = [1, 1]} : vector<2x96xf32> to vector<2x32xf32>
    %38 = arith.addf %36, %37 : vector<2x32xf32>
    %39 = arith.negf %38 : vector<2x32xf32>
    %40 = math.exp %39 : vector<2x32xf32>
    %cst_28 = arith.constant 1.000000e+00 : f32
    %41 = vector.broadcast %cst_28 : f32 to vector<2x32xf32>
    %42 = arith.addf %41, %40 : vector<2x32xf32>
    %43 = arith.divf %41, %42 : vector<2x32xf32>
    %44 = vector.extract_strided_slice %24 {offsets = [0, 64], sizes = [2, 32], strides = [1, 1]} : vector<2x96xf32> to vector<2x32xf32>
    %45 = vector.extract_strided_slice %27 {offsets = [0, 64], sizes = [2, 32], strides = [1, 1]} : vector<2x96xf32> to vector<2x32xf32>
    %46 = arith.mulf %35, %45 : vector<2x32xf32>
    %47 = arith.addf %44, %46 : vector<2x32xf32>
    %48 = math.tanh %47 : vector<2x32xf32>
    %cst_29 = arith.constant 1.000000e+00 : f32
    %49 = vector.broadcast %cst_29 : f32 to vector<2x32xf32>
    %50 = arith.subf %49, %43 : vector<2x32xf32>
    %51 = arith.mulf %50, %48 : vector<2x32xf32>
    %52 = arith.mulf %43, %17 : vector<2x32xf32>
    %53 = arith.addf %51, %52 : vector<2x32xf32>
    %54 = vector.broadcast %22 : vector<2x1xf32> to vector<2x32xf32>
    %55 = arith.mulf %54, %53 : vector<2x32xf32>
    %cst_30 = arith.constant 1.000000e+00 : f32
    %56 = vector.broadcast %cst_30 : f32 to vector<2x1xf32>
    %57 = arith.subf %56, %22 : vector<2x1xf32>
    %58 = vector.broadcast %57 : vector<2x1xf32> to vector<2x32xf32>
    %59 = arith.mulf %58, %17 : vector<2x32xf32>
    %60 = arith.addf %55, %59 : vector<2x32xf32>
    %61 = vector.broadcast %22 : vector<2x1xf32> to vector<2x32xf32>
    %62 = arith.mulf %61, %60 : vector<2x32xf32>
    %63 = arith.index_cast %18 : i32 to index
    %c0_31 = arith.constant 0 : index
    %64 = vector.load %arg17[%63, %c0_31] : memref<32x32xf32, #tpu.memory_space<vmem>>, vector<2x32xf32>
    tpu.vector_store %arg17[%63, %c0_31], %62 {strides = array<i32>} : memref<32x32xf32, #tpu.memory_space<vmem>>, vector<2x32xf32>,
    %65 = arith.index_cast %20 : i32 to index
    %c0_32 = arith.constant 0 : index
    %66 = vector.load %arg1[%65, %c0_32] : memref<32x1xf32, #tpu.memory_space<vmem>>, vector<2x1xf32>
    %67 = arith.index_cast %20 : i32 to index
    %c0_33 = arith.constant 0 : index
    %68 = vector.load %arg16[%67, %c0_33] : memref<32x96xf32, #tpu.memory_space<vmem>>, vector<2x96xf32>
    %cst_34 = arith.constant dense<0.000000e+00> : vector<2x96xf32>
    %69 = tpu.matmul %17, %15, %cst_34 {dimension_numbers = #tpu.dot_dimension_numbers<[1], [0], [0], [1], [0, 0, 1, 1], [], []>} : vector<2x32xf32>, vector<32x96xf32>, vector<2x96xf32> -> vector<2x96xf32>
    %70 = vector.broadcast %16 : vector<1x96xf32> to vector<2x96xf32>
    %71 = arith.addf %69, %70 : vector<2x96xf32>
    %72 = vector.extract_strided_slice %68 {offsets = [0, 0], sizes = [2, 32], strides = [1, 1]} : vector<2x96xf32> to vector<2x32xf32>
    %73 = vector.extract_strided_slice %71 {offsets = [0, 0], sizes = [2, 32], strides = [1, 1]} : vector<2x96xf32> to vector<2x32xf32>
    %74 = arith.addf %72, %73 : vector<2x32xf32>
    %75 = arith.negf %74 : vector<2x32xf32>
    %76 = math.exp %75 : vector<2x32xf32>
    %cst_35 = arith.constant 1.000000e+00 : f32
    %77 = vector.broadcast %cst_35 : f32 to vector<2x32xf32>
    %78 = arith.addf %77, %76 : vector<2x32xf32>
    %79 = arith.divf %77, %78 : vector<2x32xf32>
    %80 = vector.extract_strided_slice %68 {offsets = [0, 32], sizes = [2, 32], strides = [1, 1]} : vector<2x96xf32> to vector<2x32xf32>
    %81 = vector.extract_strided_slice %71 {offsets = [0, 32], sizes = [2, 32], strides = [1, 1]} : vector<2x96xf32> to vector<2x32xf32>
    %82 = arith.addf %80, %81 : vector<2x32xf32>
    %83 = arith.negf %82 : vector<2x32xf32>
    %84 = math.exp %83 : vector<2x32xf32>
    %cst_36 = arith.constant 1.000000e+00 : f32
    %85 = vector.broadcast %cst_36 : f32 to vector<2x32xf32>
    %86 = arith.addf %85, %84 : vector<2x32xf32>
    %87 = arith.divf %85, %86 : vector<2x32xf32>
    %88 = vector.extract_strided_slice %68 {offsets = [0, 64], sizes = [2, 32], strides = [1, 1]} : vector<2x96xf32> to vector<2x32xf32>
    %89 = vector.extract_strided_slice %71 {offsets = [0, 64], sizes = [2, 32], strides = [1, 1]} : vector<2x96xf32> to vector<2x32xf32>
    %90 = arith.mulf %79, %89 : vector<2x32xf32>
    %91 = arith.addf %88, %90 : vector<2x32xf32>
    %92 = math.tanh %91 : vector<2x32xf32>
    %cst_37 = arith.constant 1.000000e+00 : f32
    %93 = vector.broadcast %cst_37 : f32 to vector<2x32xf32>
    %94 = arith.subf %93, %87 : vector<2x32xf32>
    %95 = arith.mulf %94, %92 : vector<2x32xf32>
    %96 = arith.mulf %87, %17 : vector<2x32xf32>
    %97 = arith.addf %95, %96 : vector<2x32xf32>
    %98 = vector.broadcast %66 : vector<2x1xf32> to vector<2x32xf32>
    %99 = arith.mulf %98, %97 : vector<2x32xf32>
    %cst_38 = arith.constant 1.000000e+00 : f32
    %100 = vector.broadcast %cst_38 : f32 to vector<2x1xf32>
    %101 = arith.subf %100, %66 : vector<2x1xf32>
    %102 = vector.broadcast %101 : vector<2x1xf32> to vector<2x32xf32>
    %103 = arith.mulf %102, %17 : vector<2x32xf32>
    %104 = arith.addf %99, %103 : vector<2x32xf32>
    %105 = vector.broadcast %66 : vector<2x1xf32> to vector<2x32xf32>
    %106 = arith.mulf %105, %104 : vector<2x32xf32>
    %107 = arith.index_cast %20 : i32 to index
    %c0_39 = arith.constant 0 : index
    %108 = vector.load %arg18[%107, %c0_39] : memref<32x32xf32, #tpu.memory_space<vmem>>, vector<2x32xf32>
    tpu.vector_store %arg18[%107, %c0_39], %106 {strides = array<i32>} : memref<32x32xf32, #tpu.memory_space<vmem>>, vector<2x32xf32>,
    %c1_i32 = arith.constant 1 : i32
    %c2_i32_40 = arith.constant 2 : i32
    %109 = arith.muli %c1_i32, %c2_i32_40 : i32
    %c15_i32_41 = arith.constant 15 : i32
    %110 = arith.subi %c15_i32_41, %c1_i32 : i32
    %c2_i32_42 = arith.constant 2 : i32
    %111 = arith.muli %110, %c2_i32_42 : i32
    %112 = arith.index_cast %109 : i32 to index
    %c0_43 = arith.constant 0 : index
    %113 = vector.load %arg1[%112, %c0_43] : memref<32x1xf32, #tpu.memory_space<vmem>>, vector<2x1xf32>
    %114 = arith.index_cast %109 : i32 to index
    %c0_44 = arith.constant 0 : index
    %115 = vector.load %arg15[%114, %c0_44] : memref<32x96xf32, #tpu.memory_space<vmem>>, vector<2x96xf32>
    %cst_45 = arith.constant dense<0.000000e+00> : vector<2x96xf32>
    %116 = tpu.matmul %60, %13, %cst_45 {dimension_numbers = #tpu.dot_dimension_numbers<[1], [0], [0], [1], [0, 0, 1, 1], [], []>} : vector<2x32xf32>, vector<32x96xf32>, vector<2x96xf32> -> vector<2x96xf32>
    %117 = vector.broadcast %14 : vector<1x96xf32> to vector<2x96xf32>
    %118 = arith.addf %116, %117 : vector<2x96xf32>
    %119 = vector.extract_strided_slice %115 {offsets = [0, 0], sizes = [2, 32], strides = [1, 1]} : vector<2x96xf32> to vector<2x32xf32>
    %120 = vector.extract_strided_slice %118 {offsets = [0, 0], sizes = [2, 32], strides = [1, 1]} : vector<2x96xf32> to vector<2x32xf32>
    %121 = arith.addf %119, %120 : vector<2x32xf32>
    %122 = arith.negf %121 : vector<2x32xf32>
    %123 = math.exp %122 : vector<2x32xf32>
    %cst_46 = arith.constant 1.000000e+00 : f32
    %124 = vector.broadcast %cst_46 : f32 to vector<2x32xf32>
    %125 = arith.addf %124, %123 : vector<2x32xf32>
    %126 = arith.divf %124, %125 : vector<2x32xf32>
    %127 = vector.extract_strided_slice %115 {offsets = [0, 32], sizes = [2, 32], strides = [1, 1]} : vector<2x96xf32> to vector<2x32xf32>
    %128 = vector.extract_strided_slice %118 {offsets = [0, 32], sizes = [2, 32], strides = [1, 1]} : vector<2x96xf32> to vector<2x32xf32>
    %129 = arith.addf %127, %128 : vector<2x32xf32>
    %130 = arith.negf %129 : vector<2x32xf32>
    %131 = math.exp %130 : vector<2x32xf32>
    %cst_47 = arith.constant 1.000000e+00 : f32
    %132 = vector.broadcast %cst_47 : f32 to vector<2x32xf32>
    %133 = arith.addf %132, %131 : vector<2x32xf32>
    %134 = arith.divf %132, %133 : vector<2x32xf32>
    %135 = vector.extract_strided_slice %115 {offsets = [0, 64], sizes = [2, 32], strides = [1, 1]} : vector<2x96xf32> to vector<2x32xf32>
    %136 = vector.extract_strided_slice %118 {offsets = [0, 64], sizes = [2, 32], strides = [1, 1]} : vector<2x96xf32> to vector<2x32xf32>
    %137 = arith.mulf %126, %136 : vector<2x32xf32>
    %138 = arith.addf %135, %137 : vector<2x32xf32>
    %139 = math.tanh %138 : vector<2x32xf32>
    %cst_48 = arith.constant 1.000000e+00 : f32
    %140 = vector.broadcast %cst_48 : f32 to vector<2x32xf32>
    %141 = arith.subf %140, %134 : vector<2x32xf32>
    %142 = arith.mulf %141, %139 : vector<2x32xf32>
    %143 = arith.mulf %134, %60 : vector<2x32xf32>
    %144 = arith.addf %142, %143 : vector<2x32xf32>
    %145 = vector.broadcast %113 : vector<2x1xf32> to vector<2x32xf32>
    %146 = arith.mulf %145, %144 : vector<2x32xf32>
    %cst_49 = arith.constant 1.000000e+00 : f32
    %147 = vector.broadcast %cst_49 : f32 to vector<2x1xf32>
    %148 = arith.subf %147, %113 : vector<2x1xf32>
    %149 = vector.broadcast %148 : vector<2x1xf32> to vector<2x32xf32>
    %150 = arith.mulf %149, %60 : vector<2x32xf32>
    %151 = arith.addf %146, %150 : vector<2x32xf32>
    %152 = vector.broadcast %113 : vector<2x1xf32> to vector<2x32xf32>
    %153 = arith.mulf %152, %151 : vector<2x32xf32>
    %154 = arith.index_cast %109 : i32 to index
    %c0_50 = arith.constant 0 : index
    %155 = vector.load %arg17[%154, %c0_50] : memref<32x32xf32, #tpu.memory_space<vmem>>, vector<2x32xf32>
    tpu.vector_store %arg17[%154, %c0_50], %153 {strides = array<i32>} : memref<32x32xf32, #tpu.memory_space<vmem>>, vector<2x32xf32>,
    %156 = arith.index_cast %111 : i32 to index
    %c0_51 = arith.constant 0 : index
    %157 = vector.load %arg1[%156, %c0_51] : memref<32x1xf32, #tpu.memory_space<vmem>>, vector<2x1xf32>
    %158 = arith.index_cast %111 : i32 to index
    %c0_52 = arith.constant 0 : index
    %159 = vector.load %arg16[%158, %c0_52] : memref<32x96xf32, #tpu.memory_space<vmem>>, vector<2x96xf32>
    %cst_53 = arith.constant dense<0.000000e+00> : vector<2x96xf32>
    %160 = tpu.matmul %104, %15, %cst_53 {dimension_numbers = #tpu.dot_dimension_numbers<[1], [0], [0], [1], [0, 0, 1, 1], [], []>} : vector<2x32xf32>, vector<32x96xf32>, vector<2x96xf32> -> vector<2x96xf32>
    %161 = vector.broadcast %16 : vector<1x96xf32> to vector<2x96xf32>
    %162 = arith.addf %160, %161 : vector<2x96xf32>
    %163 = vector.extract_strided_slice %159 {offsets = [0, 0], sizes = [2, 32], strides = [1, 1]} : vector<2x96xf32> to vector<2x32xf32>
    %164 = vector.extract_strided_slice %162 {offsets = [0, 0], sizes = [2, 32], strides = [1, 1]} : vector<2x96xf32> to vector<2x32xf32>
    %165 = arith.addf %163, %164 : vector<2x32xf32>
    %166 = arith.negf %165 : vector<2x32xf32>
    %167 = math.exp %166 : vector<2x32xf32>
    %cst_54 = arith.constant 1.000000e+00 : f32
    %168 = vector.broadcast %cst_54 : f32 to vector<2x32xf32>
    %169 = arith.addf %168, %167 : vector<2x32xf32>
    %170 = arith.divf %168, %169 : vector<2x32xf32>
    %171 = vector.extract_strided_slice %159 {offsets = [0, 32], sizes = [2, 32], strides = [1, 1]} : vector<2x96xf32> to vector<2x32xf32>
    %172 = vector.extract_strided_slice %162 {offsets = [0, 32], sizes = [2, 32], strides = [1, 1]} : vector<2x96xf32> to vector<2x32xf32>
    %173 = arith.addf %171, %172 : vector<2x32xf32>
    %174 = arith.negf %173 : vector<2x32xf32>
    %175 = math.exp %174 : vector<2x32xf32>
    %cst_55 = arith.constant 1.000000e+00 : f32
    %176 = vector.broadcast %cst_55 : f32 to vector<2x32xf32>
    %177 = arith.addf %176, %175 : vector<2x32xf32>
    %178 = arith.divf %176, %177 : vector<2x32xf32>
    %179 = vector.extract_strided_slice %159 {offsets = [0, 64], sizes = [2, 32], strides = [1, 1]} : vector<2x96xf32> to vector<2x32xf32>
    %180 = vector.extract_strided_slice %162 {offsets = [0, 64], sizes = [2, 32], strides = [1, 1]} : vector<2x96xf32> to vector<2x32xf32>
    %181 = arith.mulf %170, %180 : vector<2x32xf32>
    %182 = arith.addf %179, %181 : vector<2x32xf32>
    %183 = math.tanh %182 : vector<2x32xf32>
    %cst_56 = arith.constant 1.000000e+00 : f32
    %184 = vector.broadcast %cst_56 : f32 to vector<2x32xf32>
    %185 = arith.subf %184, %178 : vector<2x32xf32>
    %186 = arith.mulf %185, %183 : vector<2x32xf32>
    %187 = arith.mulf %178, %104 : vector<2x32xf32>
    %188 = arith.addf %186, %187 : vector<2x32xf32>
    %189 = vector.broadcast %157 : vector<2x1xf32> to vector<2x32xf32>
    %190 = arith.mulf %189, %188 : vector<2x32xf32>
    %cst_57 = arith.constant 1.000000e+00 : f32
    %191 = vector.broadcast %cst_57 : f32 to vector<2x1xf32>
    %192 = arith.subf %191, %157 : vector<2x1xf32>
    %193 = vector.broadcast %192 : vector<2x1xf32> to vector<2x32xf32>
    %194 = arith.mulf %193, %104 : vector<2x32xf32>
    %195 = arith.addf %190, %194 : vector<2x32xf32>
    %196 = vector.broadcast %157 : vector<2x1xf32> to vector<2x32xf32>
    %197 = arith.mulf %196, %195 : vector<2x32xf32>
    %198 = arith.index_cast %111 : i32 to index
    %c0_58 = arith.constant 0 : index
    %199 = vector.load %arg18[%198, %c0_58] : memref<32x32xf32, #tpu.memory_space<vmem>>, vector<2x32xf32>
    tpu.vector_store %arg18[%198, %c0_58], %197 {strides = array<i32>} : memref<32x32xf32, #tpu.memory_space<vmem>>, vector<2x32xf32>,
    %c2_i32_59 = arith.constant 2 : i32
    %c2_i32_60 = arith.constant 2 : i32
    %200 = arith.muli %c2_i32_59, %c2_i32_60 : i32
    %c15_i32_61 = arith.constant 15 : i32
    %201 = arith.subi %c15_i32_61, %c2_i32_59 : i32
    %c2_i32_62 = arith.constant 2 : i32
    %202 = arith.muli %201, %c2_i32_62 : i32
    %203 = arith.index_cast %200 : i32 to index
    %c0_63 = arith.constant 0 : index
    %204 = vector.load %arg1[%203, %c0_63] : memref<32x1xf32, #tpu.memory_space<vmem>>, vector<2x1xf32>
    %205 = arith.index_cast %200 : i32 to index
    %c0_64 = arith.constant 0 : index
    %206 = vector.load %arg15[%205, %c0_64] : memref<32x96xf32, #tpu.memory_space<vmem>>, vector<2x96xf32>
    %cst_65 = arith.constant dense<0.000000e+00> : vector<2x96xf32>
    %207 = tpu.matmul %151, %13, %cst_65 {dimension_numbers = #tpu.dot_dimension_numbers<[1], [0], [0], [1], [0, 0, 1, 1], [], []>} : vector<2x32xf32>, vector<32x96xf32>, vector<2x96xf32> -> vector<2x96xf32>
    %208 = vector.broadcast %14 : vector<1x96xf32> to vector<2x96xf32>
    %209 = arith.addf %207, %208 : vector<2x96xf32>
    %210 = vector.extract_strided_slice %206 {offsets = [0, 0], sizes = [2, 32], strides = [1, 1]} : vector<2x96xf32> to vector<2x32xf32>
    %211 = vector.extract_strided_slice %209 {offsets = [0, 0], sizes = [2, 32], strides = [1, 1]} : vector<2x96xf32> to vector<2x32xf32>
    %212 = arith.addf %210, %211 : vector<2x32xf32>
    %213 = arith.negf %212 : vector<2x32xf32>
    %214 = math.exp %213 : vector<2x32xf32>
    %cst_66 = arith.constant 1.000000e+00 : f32
    %215 = vector.broadcast %cst_66 : f32 to vector<2x32xf32>
    %216 = arith.addf %215, %214 : vector<2x32xf32>
    %217 = arith.divf %215, %216 : vector<2x32xf32>
    %218 = vector.extract_strided_slice %206 {offsets = [0, 32], sizes = [2, 32], strides = [1, 1]} : vector<2x96xf32> to vector<2x32xf32>
    %219 = vector.extract_strided_slice %209 {offsets = [0, 32], sizes = [2, 32], strides = [1, 1]} : vector<2x96xf32> to vector<2x32xf32>
    %220 = arith.addf %218, %219 : vector<2x32xf32>
    %221 = arith.negf %220 : vector<2x32xf32>
    %222 = math.exp %221 : vector<2x32xf32>
    %cst_67 = arith.constant 1.000000e+00 : f32
    %223 = vector.broadcast %cst_67 : f32 to vector<2x32xf32>
    %224 = arith.addf %223, %222 : vector<2x32xf32>
    %225 = arith.divf %223, %224 : vector<2x32xf32>
    %226 = vector.extract_strided_slice %206 {offsets = [0, 64], sizes = [2, 32], strides = [1, 1]} : vector<2x96xf32> to vector<2x32xf32>
    %227 = vector.extract_strided_slice %209 {offsets = [0, 64], sizes = [2, 32], strides = [1, 1]} : vector<2x96xf32> to vector<2x32xf32>
    %228 = arith.mulf %217, %227 : vector<2x32xf32>
    %229 = arith.addf %226, %228 : vector<2x32xf32>
    %230 = math.tanh %229 : vector<2x32xf32>
    %cst_68 = arith.constant 1.000000e+00 : f32
    %231 = vector.broadcast %cst_68 : f32 to vector<2x32xf32>
    %232 = arith.subf %231, %225 : vector<2x32xf32>
    %233 = arith.mulf %232, %230 : vector<2x32xf32>
    %234 = arith.mulf %225, %151 : vector<2x32xf32>
    %235 = arith.addf %233, %234 : vector<2x32xf32>
    %236 = vector.broadcast %204 : vector<2x1xf32> to vector<2x32xf32>
    %237 = arith.mulf %236, %235 : vector<2x32xf32>
    %cst_69 = arith.constant 1.000000e+00 : f32
    %238 = vector.broadcast %cst_69 : f32 to vector<2x1xf32>
    %239 = arith.subf %238, %204 : vector<2x1xf32>
    %240 = vector.broadcast %239 : vector<2x1xf32> to vector<2x32xf32>
    %241 = arith.mulf %240, %151 : vector<2x32xf32>
    %242 = arith.addf %237, %241 : vector<2x32xf32>
    %243 = vector.broadcast %204 : vector<2x1xf32> to vector<2x32xf32>
    %244 = arith.mulf %243, %242 : vector<2x32xf32>
    %245 = arith.index_cast %200 : i32 to index
    %c0_70 = arith.constant 0 : index
    %246 = vector.load %arg17[%245, %c0_70] : memref<32x32xf32, #tpu.memory_space<vmem>>, vector<2x32xf32>
    tpu.vector_store %arg17[%245, %c0_70], %244 {strides = array<i32>} : memref<32x32xf32, #tpu.memory_space<vmem>>, vector<2x32xf32>,
    %247 = arith.index_cast %202 : i32 to index
    %c0_71 = arith.constant 0 : index
    %248 = vector.load %arg1[%247, %c0_71] : memref<32x1xf32, #tpu.memory_space<vmem>>, vector<2x1xf32>
    %249 = arith.index_cast %202 : i32 to index
    %c0_72 = arith.constant 0 : index
    %250 = vector.load %arg16[%249, %c0_72] : memref<32x96xf32, #tpu.memory_space<vmem>>, vector<2x96xf32>
    %cst_73 = arith.constant dense<0.000000e+00> : vector<2x96xf32>
    %251 = tpu.matmul %195, %15, %cst_73 {dimension_numbers = #tpu.dot_dimension_numbers<[1], [0], [0], [1], [0, 0, 1, 1], [], []>} : vector<2x32xf32>, vector<32x96xf32>, vector<2x96xf32> -> vector<2x96xf32>
    %252 = vector.broadcast %16 : vector<1x96xf32> to vector<2x96xf32>
    %253 = arith.addf %251, %252 : vector<2x96xf32>
    %254 = vector.extract_strided_slice %250 {offsets = [0, 0], sizes = [2, 32], strides = [1, 1]} : vector<2x96xf32> to vector<2x32xf32>
    %255 = vector.extract_strided_slice %253 {offsets = [0, 0], sizes = [2, 32], strides = [1, 1]} : vector<2x96xf32> to vector<2x32xf32>
    %256 = arith.addf %254, %255 : vector<2x32xf32>
    %257 = arith.negf %256 : vector<2x32xf32>
    %258 = math.exp %257 : vector<2x32xf32>
    %cst_74 = arith.constant 1.000000e+00 : f32
    %259 = vector.broadcast %cst_74 : f32 to vector<2x32xf32>
    %260 = arith.addf %259, %258 : vector<2x32xf32>
    %261 = arith.divf %259, %260 : vector<2x32xf32>
    %262 = vector.extract_strided_slice %250 {offsets = [0, 32], sizes = [2, 32], strides = [1, 1]} : vector<2x96xf32> to vector<2x32xf32>
    %263 = vector.extract_strided_slice %253 {offsets = [0, 32], sizes = [2, 32], strides = [1, 1]} : vector<2x96xf32> to vector<2x32xf32>
    %264 = arith.addf %262, %263 : vector<2x32xf32>
    %265 = arith.negf %264 : vector<2x32xf32>
    %266 = math.exp %265 : vector<2x32xf32>
    %cst_75 = arith.constant 1.000000e+00 : f32
    %267 = vector.broadcast %cst_75 : f32 to vector<2x32xf32>
    %268 = arith.addf %267, %266 : vector<2x32xf32>
    %269 = arith.divf %267, %268 : vector<2x32xf32>
    %270 = vector.extract_strided_slice %250 {offsets = [0, 64], sizes = [2, 32], strides = [1, 1]} : vector<2x96xf32> to vector<2x32xf32>
    %271 = vector.extract_strided_slice %253 {offsets = [0, 64], sizes = [2, 32], strides = [1, 1]} : vector<2x96xf32> to vector<2x32xf32>
    %272 = arith.mulf %261, %271 : vector<2x32xf32>
    %273 = arith.addf %270, %272 : vector<2x32xf32>
    %274 = math.tanh %273 : vector<2x32xf32>
    %cst_76 = arith.constant 1.000000e+00 : f32
    %275 = vector.broadcast %cst_76 : f32 to vector<2x32xf32>
    %276 = arith.subf %275, %269 : vector<2x32xf32>
    %277 = arith.mulf %276, %274 : vector<2x32xf32>
    %278 = arith.mulf %269, %195 : vector<2x32xf32>
    %279 = arith.addf %277, %278 : vector<2x32xf32>
    %280 = vector.broadcast %248 : vector<2x1xf32> to vector<2x32xf32>
    %281 = arith.mulf %280, %279 : vector<2x32xf32>
    %cst_77 = arith.constant 1.000000e+00 : f32
    %282 = vector.broadcast %cst_77 : f32 to vector<2x1xf32>
    %283 = arith.subf %282, %248 : vector<2x1xf32>
    %284 = vector.broadcast %283 : vector<2x1xf32> to vector<2x32xf32>
    %285 = arith.mulf %284, %195 : vector<2x32xf32>
    %286 = arith.addf %281, %285 : vector<2x32xf32>
    %287 = vector.broadcast %248 : vector<2x1xf32> to vector<2x32xf32>
    %288 = arith.mulf %287, %286 : vector<2x32xf32>
    %289 = arith.index_cast %202 : i32 to index
    %c0_78 = arith.constant 0 : index
    %290 = vector.load %arg18[%289, %c0_78] : memref<32x32xf32, #tpu.memory_space<vmem>>, vector<2x32xf32>
    tpu.vector_store %arg18[%289, %c0_78], %288 {strides = array<i32>} : memref<32x32xf32, #tpu.memory_space<vmem>>, vector<2x32xf32>,
    %c3_i32 = arith.constant 3 : i32
    %c2_i32_79 = arith.constant 2 : i32
    %291 = arith.muli %c3_i32, %c2_i32_79 : i32
    %c15_i32_80 = arith.constant 15 : i32
    %292 = arith.subi %c15_i32_80, %c3_i32 : i32
    %c2_i32_81 = arith.constant 2 : i32
    %293 = arith.muli %292, %c2_i32_81 : i32
    %294 = arith.index_cast %291 : i32 to index
    %c0_82 = arith.constant 0 : index
    %295 = vector.load %arg1[%294, %c0_82] : memref<32x1xf32, #tpu.memory_space<vmem>>, vector<2x1xf32>
    %296 = arith.index_cast %291 : i32 to index
    %c0_83 = arith.constant 0 : index
    %297 = vector.load %arg15[%296, %c0_83] : memref<32x96xf32, #tpu.memory_space<vmem>>, vector<2x96xf32>
    %cst_84 = arith.constant dense<0.000000e+00> : vector<2x96xf32>
    %298 = tpu.matmul %242, %13, %cst_84 {dimension_numbers = #tpu.dot_dimension_numbers<[1], [0], [0], [1], [0, 0, 1, 1], [], []>} : vector<2x32xf32>, vector<32x96xf32>, vector<2x96xf32> -> vector<2x96xf32>
    %299 = vector.broadcast %14 : vector<1x96xf32> to vector<2x96xf32>
    %300 = arith.addf %298, %299 : vector<2x96xf32>
    %301 = vector.extract_strided_slice %297 {offsets = [0, 0], sizes = [2, 32], strides = [1, 1]} : vector<2x96xf32> to vector<2x32xf32>
    %302 = vector.extract_strided_slice %300 {offsets = [0, 0], sizes = [2, 32], strides = [1, 1]} : vector<2x96xf32> to vector<2x32xf32>
    %303 = arith.addf %301, %302 : vector<2x32xf32>
    %304 = arith.negf %303 : vector<2x32xf32>
    %305 = math.exp %304 : vector<2x32xf32>
    %cst_85 = arith.constant 1.000000e+00 : f32
    %306 = vector.broadcast %cst_85 : f32 to vector<2x32xf32>
    %307 = arith.addf %306, %305 : vector<2x32xf32>
    %308 = arith.divf %306, %307 : vector<2x32xf32>
    %309 = vector.extract_strided_slice %297 {offsets = [0, 32], sizes = [2, 32], strides = [1, 1]} : vector<2x96xf32> to vector<2x32xf32>
    %310 = vector.extract_strided_slice %300 {offsets = [0, 32], sizes = [2, 32], strides = [1, 1]} : vector<2x96xf32> to vector<2x32xf32>
    %311 = arith.addf %309, %310 : vector<2x32xf32>
    %312 = arith.negf %311 : vector<2x32xf32>
    %313 = math.exp %312 : vector<2x32xf32>
    %cst_86 = arith.constant 1.000000e+00 : f32
    %314 = vector.broadcast %cst_86 : f32 to vector<2x32xf32>
    %315 = arith.addf %314, %313 : vector<2x32xf32>
    %316 = arith.divf %314, %315 : vector<2x32xf32>
    %317 = vector.extract_strided_slice %297 {offsets = [0, 64], sizes = [2, 32], strides = [1, 1]} : vector<2x96xf32> to vector<2x32xf32>
    %318 = vector.extract_strided_slice %300 {offsets = [0, 64], sizes = [2, 32], strides = [1, 1]} : vector<2x96xf32> to vector<2x32xf32>
    %319 = arith.mulf %308, %318 : vector<2x32xf32>
    %320 = arith.addf %317, %319 : vector<2x32xf32>
    %321 = math.tanh %320 : vector<2x32xf32>
    %cst_87 = arith.constant 1.000000e+00 : f32
    %322 = vector.broadcast %cst_87 : f32 to vector<2x32xf32>
    %323 = arith.subf %322, %316 : vector<2x32xf32>
    %324 = arith.mulf %323, %321 : vector<2x32xf32>
    %325 = arith.mulf %316, %242 : vector<2x32xf32>
    %326 = arith.addf %324, %325 : vector<2x32xf32>
    %327 = vector.broadcast %295 : vector<2x1xf32> to vector<2x32xf32>
    %328 = arith.mulf %327, %326 : vector<2x32xf32>
    %cst_88 = arith.constant 1.000000e+00 : f32
    %329 = vector.broadcast %cst_88 : f32 to vector<2x1xf32>
    %330 = arith.subf %329, %295 : vector<2x1xf32>
    %331 = vector.broadcast %330 : vector<2x1xf32> to vector<2x32xf32>
    %332 = arith.mulf %331, %242 : vector<2x32xf32>
    %333 = arith.addf %328, %332 : vector<2x32xf32>
    %334 = vector.broadcast %295 : vector<2x1xf32> to vector<2x32xf32>
    %335 = arith.mulf %334, %333 : vector<2x32xf32>
    %336 = arith.index_cast %291 : i32 to index
    %c0_89 = arith.constant 0 : index
    %337 = vector.load %arg17[%336, %c0_89] : memref<32x32xf32, #tpu.memory_space<vmem>>, vector<2x32xf32>
    tpu.vector_store %arg17[%336, %c0_89], %335 {strides = array<i32>} : memref<32x32xf32, #tpu.memory_space<vmem>>, vector<2x32xf32>,
    %338 = arith.index_cast %293 : i32 to index
    %c0_90 = arith.constant 0 : index
    %339 = vector.load %arg1[%338, %c0_90] : memref<32x1xf32, #tpu.memory_space<vmem>>, vector<2x1xf32>
    %340 = arith.index_cast %293 : i32 to index
    %c0_91 = arith.constant 0 : index
    %341 = vector.load %arg16[%340, %c0_91] : memref<32x96xf32, #tpu.memory_space<vmem>>, vector<2x96xf32>
    %cst_92 = arith.constant dense<0.000000e+00> : vector<2x96xf32>
    %342 = tpu.matmul %286, %15, %cst_92 {dimension_numbers = #tpu.dot_dimension_numbers<[1], [0], [0], [1], [0, 0, 1, 1], [], []>} : vector<2x32xf32>, vector<32x96xf32>, vector<2x96xf32> -> vector<2x96xf32>
    %343 = vector.broadcast %16 : vector<1x96xf32> to vector<2x96xf32>
    %344 = arith.addf %342, %343 : vector<2x96xf32>
    %345 = vector.extract_strided_slice %341 {offsets = [0, 0], sizes = [2, 32], strides = [1, 1]} : vector<2x96xf32> to vector<2x32xf32>
    %346 = vector.extract_strided_slice %344 {offsets = [0, 0], sizes = [2, 32], strides = [1, 1]} : vector<2x96xf32> to vector<2x32xf32>
    %347 = arith.addf %345, %346 : vector<2x32xf32>
    %348 = arith.negf %347 : vector<2x32xf32>
    %349 = math.exp %348 : vector<2x32xf32>
    %cst_93 = arith.constant 1.000000e+00 : f32
    %350 = vector.broadcast %cst_93 : f32 to vector<2x32xf32>
    %351 = arith.addf %350, %349 : vector<2x32xf32>
    %352 = arith.divf %350, %351 : vector<2x32xf32>
    %353 = vector.extract_strided_slice %341 {offsets = [0, 32], sizes = [2, 32], strides = [1, 1]} : vector<2x96xf32> to vector<2x32xf32>
    %354 = vector.extract_strided_slice %344 {offsets = [0, 32], sizes = [2, 32], strides = [1, 1]} : vector<2x96xf32> to vector<2x32xf32>
    %355 = arith.addf %353, %354 : vector<2x32xf32>
    %356 = arith.negf %355 : vector<2x32xf32>
    %357 = math.exp %356 : vector<2x32xf32>
    %cst_94 = arith.constant 1.000000e+00 : f32
    %358 = vector.broadcast %cst_94 : f32 to vector<2x32xf32>
    %359 = arith.addf %358, %357 : vector<2x32xf32>
    %360 = arith.divf %358, %359 : vector<2x32xf32>
    %361 = vector.extract_strided_slice %341 {offsets = [0, 64], sizes = [2, 32], strides = [1, 1]} : vector<2x96xf32> to vector<2x32xf32>
    %362 = vector.extract_strided_slice %344 {offsets = [0, 64], sizes = [2, 32], strides = [1, 1]} : vector<2x96xf32> to vector<2x32xf32>
    %363 = arith.mulf %352, %362 : vector<2x32xf32>
    %364 = arith.addf %361, %363 : vector<2x32xf32>
    %365 = math.tanh %364 : vector<2x32xf32>
    %cst_95 = arith.constant 1.000000e+00 : f32
    %366 = vector.broadcast %cst_95 : f32 to vector<2x32xf32>
    %367 = arith.subf %366, %360 : vector<2x32xf32>
    %368 = arith.mulf %367, %365 : vector<2x32xf32>
    %369 = arith.mulf %360, %286 : vector<2x32xf32>
    %370 = arith.addf %368, %369 : vector<2x32xf32>
    %371 = vector.broadcast %339 : vector<2x1xf32> to vector<2x32xf32>
    %372 = arith.mulf %371, %370 : vector<2x32xf32>
    %cst_96 = arith.constant 1.000000e+00 : f32
    %373 = vector.broadcast %cst_96 : f32 to vector<2x1xf32>
    %374 = arith.subf %373, %339 : vector<2x1xf32>
    %375 = vector.broadcast %374 : vector<2x1xf32> to vector<2x32xf32>
    %376 = arith.mulf %375, %286 : vector<2x32xf32>
    %377 = arith.addf %372, %376 : vector<2x32xf32>
    %378 = vector.broadcast %339 : vector<2x1xf32> to vector<2x32xf32>
    %379 = arith.mulf %378, %377 : vector<2x32xf32>
    %380 = arith.index_cast %293 : i32 to index
    %c0_97 = arith.constant 0 : index
    %381 = vector.load %arg18[%380, %c0_97] : memref<32x32xf32, #tpu.memory_space<vmem>>, vector<2x32xf32>
    tpu.vector_store %arg18[%380, %c0_97], %379 {strides = array<i32>} : memref<32x32xf32, #tpu.memory_space<vmem>>, vector<2x32xf32>,
    %c4_i32 = arith.constant 4 : i32
    %c2_i32_98 = arith.constant 2 : i32
    %382 = arith.muli %c4_i32, %c2_i32_98 : i32
    %c15_i32_99 = arith.constant 15 : i32
    %383 = arith.subi %c15_i32_99, %c4_i32 : i32
    %c2_i32_100 = arith.constant 2 : i32
    %384 = arith.muli %383, %c2_i32_100 : i32
    %385 = arith.index_cast %382 : i32 to index
    %c0_101 = arith.constant 0 : index
    %386 = vector.load %arg1[%385, %c0_101] : memref<32x1xf32, #tpu.memory_space<vmem>>, vector<2x1xf32>
    %387 = arith.index_cast %382 : i32 to index
    %c0_102 = arith.constant 0 : index
    %388 = vector.load %arg15[%387, %c0_102] : memref<32x96xf32, #tpu.memory_space<vmem>>, vector<2x96xf32>
    %cst_103 = arith.constant dense<0.000000e+00> : vector<2x96xf32>
    %389 = tpu.matmul %333, %13, %cst_103 {dimension_numbers = #tpu.dot_dimension_numbers<[1], [0], [0], [1], [0, 0, 1, 1], [], []>} : vector<2x32xf32>, vector<32x96xf32>, vector<2x96xf32> -> vector<2x96xf32>
    %390 = vector.broadcast %14 : vector<1x96xf32> to vector<2x96xf32>
    %391 = arith.addf %389, %390 : vector<2x96xf32>
    %392 = vector.extract_strided_slice %388 {offsets = [0, 0], sizes = [2, 32], strides = [1, 1]} : vector<2x96xf32> to vector<2x32xf32>
    %393 = vector.extract_strided_slice %391 {offsets = [0, 0], sizes = [2, 32], strides = [1, 1]} : vector<2x96xf32> to vector<2x32xf32>
    %394 = arith.addf %392, %393 : vector<2x32xf32>
    %395 = arith.negf %394 : vector<2x32xf32>
    %396 = math.exp %395 : vector<2x32xf32>
    %cst_104 = arith.constant 1.000000e+00 : f32
    %397 = vector.broadcast %cst_104 : f32 to vector<2x32xf32>
    %398 = arith.addf %397, %396 : vector<2x32xf32>
    %399 = arith.divf %397, %398 : vector<2x32xf32>
    %400 = vector.extract_strided_slice %388 {offsets = [0, 32], sizes = [2, 32], strides = [1, 1]} : vector<2x96xf32> to vector<2x32xf32>
    %401 = vector.extract_strided_slice %391 {offsets = [0, 32], sizes = [2, 32], strides = [1, 1]} : vector<2x96xf32> to vector<2x32xf32>
    %402 = arith.addf %400, %401 : vector<2x32xf32>
    %403 = arith.negf %402 : vector<2x32xf32>
    %404 = math.exp %403 : vector<2x32xf32>
    %cst_105 = arith.constant 1.000000e+00 : f32
    %405 = vector.broadcast %cst_105 : f32 to vector<2x32xf32>
    %406 = arith.addf %405, %404 : vector<2x32xf32>
    %407 = arith.divf %405, %406 : vector<2x32xf32>
    %408 = vector.extract_strided_slice %388 {offsets = [0, 64], sizes = [2, 32], strides = [1, 1]} : vector<2x96xf32> to vector<2x32xf32>
    %409 = vector.extract_strided_slice %391 {offsets = [0, 64], sizes = [2, 32], strides = [1, 1]} : vector<2x96xf32> to vector<2x32xf32>
    %410 = arith.mulf %399, %409 : vector<2x32xf32>
    %411 = arith.addf %408, %410 : vector<2x32xf32>
    %412 = math.tanh %411 : vector<2x32xf32>
    %cst_106 = arith.constant 1.000000e+00 : f32
    %413 = vector.broadcast %cst_106 : f32 to vector<2x32xf32>
    %414 = arith.subf %413, %407 : vector<2x32xf32>
    %415 = arith.mulf %414, %412 : vector<2x32xf32>
    %416 = arith.mulf %407, %333 : vector<2x32xf32>
    %417 = arith.addf %415, %416 : vector<2x32xf32>
    %418 = vector.broadcast %386 : vector<2x1xf32> to vector<2x32xf32>
    %419 = arith.mulf %418, %417 : vector<2x32xf32>
    %cst_107 = arith.constant 1.000000e+00 : f32
    %420 = vector.broadcast %cst_107 : f32 to vector<2x1xf32>
    %421 = arith.subf %420, %386 : vector<2x1xf32>
    %422 = vector.broadcast %421 : vector<2x1xf32> to vector<2x32xf32>
    %423 = arith.mulf %422, %333 : vector<2x32xf32>
    %424 = arith.addf %419, %423 : vector<2x32xf32>
    %425 = vector.broadcast %386 : vector<2x1xf32> to vector<2x32xf32>
    %426 = arith.mulf %425, %424 : vector<2x32xf32>
    %427 = arith.index_cast %382 : i32 to index
    %c0_108 = arith.constant 0 : index
    %428 = vector.load %arg17[%427, %c0_108] : memref<32x32xf32, #tpu.memory_space<vmem>>, vector<2x32xf32>
    tpu.vector_store %arg17[%427, %c0_108], %426 {strides = array<i32>} : memref<32x32xf32, #tpu.memory_space<vmem>>, vector<2x32xf32>,
    %429 = arith.index_cast %384 : i32 to index
    %c0_109 = arith.constant 0 : index
    %430 = vector.load %arg1[%429, %c0_109] : memref<32x1xf32, #tpu.memory_space<vmem>>, vector<2x1xf32>
    %431 = arith.index_cast %384 : i32 to index
    %c0_110 = arith.constant 0 : index
    %432 = vector.load %arg16[%431, %c0_110] : memref<32x96xf32, #tpu.memory_space<vmem>>, vector<2x96xf32>
    %cst_111 = arith.constant dense<0.000000e+00> : vector<2x96xf32>
    %433 = tpu.matmul %377, %15, %cst_111 {dimension_numbers = #tpu.dot_dimension_numbers<[1], [0], [0], [1], [0, 0, 1, 1], [], []>} : vector<2x32xf32>, vector<32x96xf32>, vector<2x96xf32> -> vector<2x96xf32>
    %434 = vector.broadcast %16 : vector<1x96xf32> to vector<2x96xf32>
    %435 = arith.addf %433, %434 : vector<2x96xf32>
    %436 = vector.extract_strided_slice %432 {offsets = [0, 0], sizes = [2, 32], strides = [1, 1]} : vector<2x96xf32> to vector<2x32xf32>
    %437 = vector.extract_strided_slice %435 {offsets = [0, 0], sizes = [2, 32], strides = [1, 1]} : vector<2x96xf32> to vector<2x32xf32>
    %438 = arith.addf %436, %437 : vector<2x32xf32>
    %439 = arith.negf %438 : vector<2x32xf32>
    %440 = math.exp %439 : vector<2x32xf32>
    %cst_112 = arith.constant 1.000000e+00 : f32
    %441 = vector.broadcast %cst_112 : f32 to vector<2x32xf32>
    %442 = arith.addf %441, %440 : vector<2x32xf32>
    %443 = arith.divf %441, %442 : vector<2x32xf32>
    %444 = vector.extract_strided_slice %432 {offsets = [0, 32], sizes = [2, 32], strides = [1, 1]} : vector<2x96xf32> to vector<2x32xf32>
    %445 = vector.extract_strided_slice %435 {offsets = [0, 32], sizes = [2, 32], strides = [1, 1]} : vector<2x96xf32> to vector<2x32xf32>
    %446 = arith.addf %444, %445 : vector<2x32xf32>
    %447 = arith.negf %446 : vector<2x32xf32>
    %448 = math.exp %447 : vector<2x32xf32>
    %cst_113 = arith.constant 1.000000e+00 : f32
    %449 = vector.broadcast %cst_113 : f32 to vector<2x32xf32>
    %450 = arith.addf %449, %448 : vector<2x32xf32>
    %451 = arith.divf %449, %450 : vector<2x32xf32>
    %452 = vector.extract_strided_slice %432 {offsets = [0, 64], sizes = [2, 32], strides = [1, 1]} : vector<2x96xf32> to vector<2x32xf32>
    %453 = vector.extract_strided_slice %435 {offsets = [0, 64], sizes = [2, 32], strides = [1, 1]} : vector<2x96xf32> to vector<2x32xf32>
    %454 = arith.mulf %443, %453 : vector<2x32xf32>
    %455 = arith.addf %452, %454 : vector<2x32xf32>
    %456 = math.tanh %455 : vector<2x32xf32>
    %cst_114 = arith.constant 1.000000e+00 : f32
    %457 = vector.broadcast %cst_114 : f32 to vector<2x32xf32>
    %458 = arith.subf %457, %451 : vector<2x32xf32>
    %459 = arith.mulf %458, %456 : vector<2x32xf32>
    %460 = arith.mulf %451, %377 : vector<2x32xf32>
    %461 = arith.addf %459, %460 : vector<2x32xf32>
    %462 = vector.broadcast %430 : vector<2x1xf32> to vector<2x32xf32>
    %463 = arith.mulf %462, %461 : vector<2x32xf32>
    %cst_115 = arith.constant 1.000000e+00 : f32
    %464 = vector.broadcast %cst_115 : f32 to vector<2x1xf32>
    %465 = arith.subf %464, %430 : vector<2x1xf32>
    %466 = vector.broadcast %465 : vector<2x1xf32> to vector<2x32xf32>
    %467 = arith.mulf %466, %377 : vector<2x32xf32>
    %468 = arith.addf %463, %467 : vector<2x32xf32>
    %469 = vector.broadcast %430 : vector<2x1xf32> to vector<2x32xf32>
    %470 = arith.mulf %469, %468 : vector<2x32xf32>
    %471 = arith.index_cast %384 : i32 to index
    %c0_116 = arith.constant 0 : index
    %472 = vector.load %arg18[%471, %c0_116] : memref<32x32xf32, #tpu.memory_space<vmem>>, vector<2x32xf32>
    tpu.vector_store %arg18[%471, %c0_116], %470 {strides = array<i32>} : memref<32x32xf32, #tpu.memory_space<vmem>>, vector<2x32xf32>,
    %c5_i32 = arith.constant 5 : i32
    %c2_i32_117 = arith.constant 2 : i32
    %473 = arith.muli %c5_i32, %c2_i32_117 : i32
    %c15_i32_118 = arith.constant 15 : i32
    %474 = arith.subi %c15_i32_118, %c5_i32 : i32
    %c2_i32_119 = arith.constant 2 : i32
    %475 = arith.muli %474, %c2_i32_119 : i32
    %476 = arith.index_cast %473 : i32 to index
    %c0_120 = arith.constant 0 : index
    %477 = vector.load %arg1[%476, %c0_120] : memref<32x1xf32, #tpu.memory_space<vmem>>, vector<2x1xf32>
    %478 = arith.index_cast %473 : i32 to index
    %c0_121 = arith.constant 0 : index
    %479 = vector.load %arg15[%478, %c0_121] : memref<32x96xf32, #tpu.memory_space<vmem>>, vector<2x96xf32>
    %cst_122 = arith.constant dense<0.000000e+00> : vector<2x96xf32>
    %480 = tpu.matmul %424, %13, %cst_122 {dimension_numbers = #tpu.dot_dimension_numbers<[1], [0], [0], [1], [0, 0, 1, 1], [], []>} : vector<2x32xf32>, vector<32x96xf32>, vector<2x96xf32> -> vector<2x96xf32>
    %481 = vector.broadcast %14 : vector<1x96xf32> to vector<2x96xf32>
    %482 = arith.addf %480, %481 : vector<2x96xf32>
    %483 = vector.extract_strided_slice %479 {offsets = [0, 0], sizes = [2, 32], strides = [1, 1]} : vector<2x96xf32> to vector<2x32xf32>
    %484 = vector.extract_strided_slice %482 {offsets = [0, 0], sizes = [2, 32], strides = [1, 1]} : vector<2x96xf32> to vector<2x32xf32>
    %485 = arith.addf %483, %484 : vector<2x32xf32>
    %486 = arith.negf %485 : vector<2x32xf32>
    %487 = math.exp %486 : vector<2x32xf32>
    %cst_123 = arith.constant 1.000000e+00 : f32
    %488 = vector.broadcast %cst_123 : f32 to vector<2x32xf32>
    %489 = arith.addf %488, %487 : vector<2x32xf32>
    %490 = arith.divf %488, %489 : vector<2x32xf32>
    %491 = vector.extract_strided_slice %479 {offsets = [0, 32], sizes = [2, 32], strides = [1, 1]} : vector<2x96xf32> to vector<2x32xf32>
    %492 = vector.extract_strided_slice %482 {offsets = [0, 32], sizes = [2, 32], strides = [1, 1]} : vector<2x96xf32> to vector<2x32xf32>
    %493 = arith.addf %491, %492 : vector<2x32xf32>
    %494 = arith.negf %493 : vector<2x32xf32>
    %495 = math.exp %494 : vector<2x32xf32>
    %cst_124 = arith.constant 1.000000e+00 : f32
    %496 = vector.broadcast %cst_124 : f32 to vector<2x32xf32>
    %497 = arith.addf %496, %495 : vector<2x32xf32>
    %498 = arith.divf %496, %497 : vector<2x32xf32>
    %499 = vector.extract_strided_slice %479 {offsets = [0, 64], sizes = [2, 32], strides = [1, 1]} : vector<2x96xf32> to vector<2x32xf32>
    %500 = vector.extract_strided_slice %482 {offsets = [0, 64], sizes = [2, 32], strides = [1, 1]} : vector<2x96xf32> to vector<2x32xf32>
    %501 = arith.mulf %490, %500 : vector<2x32xf32>
    %502 = arith.addf %499, %501 : vector<2x32xf32>
    %503 = math.tanh %502 : vector<2x32xf32>
    %cst_125 = arith.constant 1.000000e+00 : f32
    %504 = vector.broadcast %cst_125 : f32 to vector<2x32xf32>
    %505 = arith.subf %504, %498 : vector<2x32xf32>
    %506 = arith.mulf %505, %503 : vector<2x32xf32>
    %507 = arith.mulf %498, %424 : vector<2x32xf32>
    %508 = arith.addf %506, %507 : vector<2x32xf32>
    %509 = vector.broadcast %477 : vector<2x1xf32> to vector<2x32xf32>
    %510 = arith.mulf %509, %508 : vector<2x32xf32>
    %cst_126 = arith.constant 1.000000e+00 : f32
    %511 = vector.broadcast %cst_126 : f32 to vector<2x1xf32>
    %512 = arith.subf %511, %477 : vector<2x1xf32>
    %513 = vector.broadcast %512 : vector<2x1xf32> to vector<2x32xf32>
    %514 = arith.mulf %513, %424 : vector<2x32xf32>
    %515 = arith.addf %510, %514 : vector<2x32xf32>
    %516 = vector.broadcast %477 : vector<2x1xf32> to vector<2x32xf32>
    %517 = arith.mulf %516, %515 : vector<2x32xf32>
    %518 = arith.index_cast %473 : i32 to index
    %c0_127 = arith.constant 0 : index
    %519 = vector.load %arg17[%518, %c0_127] : memref<32x32xf32, #tpu.memory_space<vmem>>, vector<2x32xf32>
    tpu.vector_store %arg17[%518, %c0_127], %517 {strides = array<i32>} : memref<32x32xf32, #tpu.memory_space<vmem>>, vector<2x32xf32>,
    %520 = arith.index_cast %475 : i32 to index
    %c0_128 = arith.constant 0 : index
    %521 = vector.load %arg1[%520, %c0_128] : memref<32x1xf32, #tpu.memory_space<vmem>>, vector<2x1xf32>
    %522 = arith.index_cast %475 : i32 to index
    %c0_129 = arith.constant 0 : index
    %523 = vector.load %arg16[%522, %c0_129] : memref<32x96xf32, #tpu.memory_space<vmem>>, vector<2x96xf32>
    %cst_130 = arith.constant dense<0.000000e+00> : vector<2x96xf32>
    %524 = tpu.matmul %468, %15, %cst_130 {dimension_numbers = #tpu.dot_dimension_numbers<[1], [0], [0], [1], [0, 0, 1, 1], [], []>} : vector<2x32xf32>, vector<32x96xf32>, vector<2x96xf32> -> vector<2x96xf32>
    %525 = vector.broadcast %16 : vector<1x96xf32> to vector<2x96xf32>
    %526 = arith.addf %524, %525 : vector<2x96xf32>
    %527 = vector.extract_strided_slice %523 {offsets = [0, 0], sizes = [2, 32], strides = [1, 1]} : vector<2x96xf32> to vector<2x32xf32>
    %528 = vector.extract_strided_slice %526 {offsets = [0, 0], sizes = [2, 32], strides = [1, 1]} : vector<2x96xf32> to vector<2x32xf32>
    %529 = arith.addf %527, %528 : vector<2x32xf32>
    %530 = arith.negf %529 : vector<2x32xf32>
    %531 = math.exp %530 : vector<2x32xf32>
    %cst_131 = arith.constant 1.000000e+00 : f32
    %532 = vector.broadcast %cst_131 : f32 to vector<2x32xf32>
    %533 = arith.addf %532, %531 : vector<2x32xf32>
    %534 = arith.divf %532, %533 : vector<2x32xf32>
    %535 = vector.extract_strided_slice %523 {offsets = [0, 32], sizes = [2, 32], strides = [1, 1]} : vector<2x96xf32> to vector<2x32xf32>
    %536 = vector.extract_strided_slice %526 {offsets = [0, 32], sizes = [2, 32], strides = [1, 1]} : vector<2x96xf32> to vector<2x32xf32>
    %537 = arith.addf %535, %536 : vector<2x32xf32>
    %538 = arith.negf %537 : vector<2x32xf32>
    %539 = math.exp %538 : vector<2x32xf32>
    %cst_132 = arith.constant 1.000000e+00 : f32
    %540 = vector.broadcast %cst_132 : f32 to vector<2x32xf32>
    %541 = arith.addf %540, %539 : vector<2x32xf32>
    %542 = arith.divf %540, %541 : vector<2x32xf32>
    %543 = vector.extract_strided_slice %523 {offsets = [0, 64], sizes = [2, 32], strides = [1, 1]} : vector<2x96xf32> to vector<2x32xf32>
    %544 = vector.extract_strided_slice %526 {offsets = [0, 64], sizes = [2, 32], strides = [1, 1]} : vector<2x96xf32> to vector<2x32xf32>
    %545 = arith.mulf %534, %544 : vector<2x32xf32>
    %546 = arith.addf %543, %545 : vector<2x32xf32>
    %547 = math.tanh %546 : vector<2x32xf32>
    %cst_133 = arith.constant 1.000000e+00 : f32
    %548 = vector.broadcast %cst_133 : f32 to vector<2x32xf32>
    %549 = arith.subf %548, %542 : vector<2x32xf32>
    %550 = arith.mulf %549, %547 : vector<2x32xf32>
    %551 = arith.mulf %542, %468 : vector<2x32xf32>
    %552 = arith.addf %550, %551 : vector<2x32xf32>
    %553 = vector.broadcast %521 : vector<2x1xf32> to vector<2x32xf32>
    %554 = arith.mulf %553, %552 : vector<2x32xf32>
    %cst_134 = arith.constant 1.000000e+00 : f32
    %555 = vector.broadcast %cst_134 : f32 to vector<2x1xf32>
    %556 = arith.subf %555, %521 : vector<2x1xf32>
    %557 = vector.broadcast %556 : vector<2x1xf32> to vector<2x32xf32>
    %558 = arith.mulf %557, %468 : vector<2x32xf32>
    %559 = arith.addf %554, %558 : vector<2x32xf32>
    %560 = vector.broadcast %521 : vector<2x1xf32> to vector<2x32xf32>
    %561 = arith.mulf %560, %559 : vector<2x32xf32>
    %562 = arith.index_cast %475 : i32 to index
    %c0_135 = arith.constant 0 : index
    %563 = vector.load %arg18[%562, %c0_135] : memref<32x32xf32, #tpu.memory_space<vmem>>, vector<2x32xf32>
    tpu.vector_store %arg18[%562, %c0_135], %561 {strides = array<i32>} : memref<32x32xf32, #tpu.memory_space<vmem>>, vector<2x32xf32>,
    %c6_i32 = arith.constant 6 : i32
    %c2_i32_136 = arith.constant 2 : i32
    %564 = arith.muli %c6_i32, %c2_i32_136 : i32
    %c15_i32_137 = arith.constant 15 : i32
    %565 = arith.subi %c15_i32_137, %c6_i32 : i32
    %c2_i32_138 = arith.constant 2 : i32
    %566 = arith.muli %565, %c2_i32_138 : i32
    %567 = arith.index_cast %564 : i32 to index
    %c0_139 = arith.constant 0 : index
    %568 = vector.load %arg1[%567, %c0_139] : memref<32x1xf32, #tpu.memory_space<vmem>>, vector<2x1xf32>
    %569 = arith.index_cast %564 : i32 to index
    %c0_140 = arith.constant 0 : index
    %570 = vector.load %arg15[%569, %c0_140] : memref<32x96xf32, #tpu.memory_space<vmem>>, vector<2x96xf32>
    %cst_141 = arith.constant dense<0.000000e+00> : vector<2x96xf32>
    %571 = tpu.matmul %515, %13, %cst_141 {dimension_numbers = #tpu.dot_dimension_numbers<[1], [0], [0], [1], [0, 0, 1, 1], [], []>} : vector<2x32xf32>, vector<32x96xf32>, vector<2x96xf32> -> vector<2x96xf32>
    %572 = vector.broadcast %14 : vector<1x96xf32> to vector<2x96xf32>
    %573 = arith.addf %571, %572 : vector<2x96xf32>
    %574 = vector.extract_strided_slice %570 {offsets = [0, 0], sizes = [2, 32], strides = [1, 1]} : vector<2x96xf32> to vector<2x32xf32>
    %575 = vector.extract_strided_slice %573 {offsets = [0, 0], sizes = [2, 32], strides = [1, 1]} : vector<2x96xf32> to vector<2x32xf32>
    %576 = arith.addf %574, %575 : vector<2x32xf32>
    %577 = arith.negf %576 : vector<2x32xf32>
    %578 = math.exp %577 : vector<2x32xf32>
    %cst_142 = arith.constant 1.000000e+00 : f32
    %579 = vector.broadcast %cst_142 : f32 to vector<2x32xf32>
    %580 = arith.addf %579, %578 : vector<2x32xf32>
    %581 = arith.divf %579, %580 : vector<2x32xf32>
    %582 = vector.extract_strided_slice %570 {offsets = [0, 32], sizes = [2, 32], strides = [1, 1]} : vector<2x96xf32> to vector<2x32xf32>
    %583 = vector.extract_strided_slice %573 {offsets = [0, 32], sizes = [2, 32], strides = [1, 1]} : vector<2x96xf32> to vector<2x32xf32>
    %584 = arith.addf %582, %583 : vector<2x32xf32>
    %585 = arith.negf %584 : vector<2x32xf32>
    %586 = math.exp %585 : vector<2x32xf32>
    %cst_143 = arith.constant 1.000000e+00 : f32
    %587 = vector.broadcast %cst_143 : f32 to vector<2x32xf32>
    %588 = arith.addf %587, %586 : vector<2x32xf32>
    %589 = arith.divf %587, %588 : vector<2x32xf32>
    %590 = vector.extract_strided_slice %570 {offsets = [0, 64], sizes = [2, 32], strides = [1, 1]} : vector<2x96xf32> to vector<2x32xf32>
    %591 = vector.extract_strided_slice %573 {offsets = [0, 64], sizes = [2, 32], strides = [1, 1]} : vector<2x96xf32> to vector<2x32xf32>
    %592 = arith.mulf %581, %591 : vector<2x32xf32>
    %593 = arith.addf %590, %592 : vector<2x32xf32>
    %594 = math.tanh %593 : vector<2x32xf32>
    %cst_144 = arith.constant 1.000000e+00 : f32
    %595 = vector.broadcast %cst_144 : f32 to vector<2x32xf32>
    %596 = arith.subf %595, %589 : vector<2x32xf32>
    %597 = arith.mulf %596, %594 : vector<2x32xf32>
    %598 = arith.mulf %589, %515 : vector<2x32xf32>
    %599 = arith.addf %597, %598 : vector<2x32xf32>
    %600 = vector.broadcast %568 : vector<2x1xf32> to vector<2x32xf32>
    %601 = arith.mulf %600, %599 : vector<2x32xf32>
    %cst_145 = arith.constant 1.000000e+00 : f32
    %602 = vector.broadcast %cst_145 : f32 to vector<2x1xf32>
    %603 = arith.subf %602, %568 : vector<2x1xf32>
    %604 = vector.broadcast %603 : vector<2x1xf32> to vector<2x32xf32>
    %605 = arith.mulf %604, %515 : vector<2x32xf32>
    %606 = arith.addf %601, %605 : vector<2x32xf32>
    %607 = vector.broadcast %568 : vector<2x1xf32> to vector<2x32xf32>
    %608 = arith.mulf %607, %606 : vector<2x32xf32>
    %609 = arith.index_cast %564 : i32 to index
    %c0_146 = arith.constant 0 : index
    %610 = vector.load %arg17[%609, %c0_146] : memref<32x32xf32, #tpu.memory_space<vmem>>, vector<2x32xf32>
    tpu.vector_store %arg17[%609, %c0_146], %608 {strides = array<i32>} : memref<32x32xf32, #tpu.memory_space<vmem>>, vector<2x32xf32>,
    %611 = arith.index_cast %566 : i32 to index
    %c0_147 = arith.constant 0 : index
    %612 = vector.load %arg1[%611, %c0_147] : memref<32x1xf32, #tpu.memory_space<vmem>>, vector<2x1xf32>
    %613 = arith.index_cast %566 : i32 to index
    %c0_148 = arith.constant 0 : index
    %614 = vector.load %arg16[%613, %c0_148] : memref<32x96xf32, #tpu.memory_space<vmem>>, vector<2x96xf32>
    %cst_149 = arith.constant dense<0.000000e+00> : vector<2x96xf32>
    %615 = tpu.matmul %559, %15, %cst_149 {dimension_numbers = #tpu.dot_dimension_numbers<[1], [0], [0], [1], [0, 0, 1, 1], [], []>} : vector<2x32xf32>, vector<32x96xf32>, vector<2x96xf32> -> vector<2x96xf32>
    %616 = vector.broadcast %16 : vector<1x96xf32> to vector<2x96xf32>
    %617 = arith.addf %615, %616 : vector<2x96xf32>
    %618 = vector.extract_strided_slice %614 {offsets = [0, 0], sizes = [2, 32], strides = [1, 1]} : vector<2x96xf32> to vector<2x32xf32>
    %619 = vector.extract_strided_slice %617 {offsets = [0, 0], sizes = [2, 32], strides = [1, 1]} : vector<2x96xf32> to vector<2x32xf32>
    %620 = arith.addf %618, %619 : vector<2x32xf32>
    %621 = arith.negf %620 : vector<2x32xf32>
    %622 = math.exp %621 : vector<2x32xf32>
    %cst_150 = arith.constant 1.000000e+00 : f32
    %623 = vector.broadcast %cst_150 : f32 to vector<2x32xf32>
    %624 = arith.addf %623, %622 : vector<2x32xf32>
    %625 = arith.divf %623, %624 : vector<2x32xf32>
    %626 = vector.extract_strided_slice %614 {offsets = [0, 32], sizes = [2, 32], strides = [1, 1]} : vector<2x96xf32> to vector<2x32xf32>
    %627 = vector.extract_strided_slice %617 {offsets = [0, 32], sizes = [2, 32], strides = [1, 1]} : vector<2x96xf32> to vector<2x32xf32>
    %628 = arith.addf %626, %627 : vector<2x32xf32>
    %629 = arith.negf %628 : vector<2x32xf32>
    %630 = math.exp %629 : vector<2x32xf32>
    %cst_151 = arith.constant 1.000000e+00 : f32
    %631 = vector.broadcast %cst_151 : f32 to vector<2x32xf32>
    %632 = arith.addf %631, %630 : vector<2x32xf32>
    %633 = arith.divf %631, %632 : vector<2x32xf32>
    %634 = vector.extract_strided_slice %614 {offsets = [0, 64], sizes = [2, 32], strides = [1, 1]} : vector<2x96xf32> to vector<2x32xf32>
    %635 = vector.extract_strided_slice %617 {offsets = [0, 64], sizes = [2, 32], strides = [1, 1]} : vector<2x96xf32> to vector<2x32xf32>
    %636 = arith.mulf %625, %635 : vector<2x32xf32>
    %637 = arith.addf %634, %636 : vector<2x32xf32>
    %638 = math.tanh %637 : vector<2x32xf32>
    %cst_152 = arith.constant 1.000000e+00 : f32
    %639 = vector.broadcast %cst_152 : f32 to vector<2x32xf32>
    %640 = arith.subf %639, %633 : vector<2x32xf32>
    %641 = arith.mulf %640, %638 : vector<2x32xf32>
    %642 = arith.mulf %633, %559 : vector<2x32xf32>
    %643 = arith.addf %641, %642 : vector<2x32xf32>
    %644 = vector.broadcast %612 : vector<2x1xf32> to vector<2x32xf32>
    %645 = arith.mulf %644, %643 : vector<2x32xf32>
    %cst_153 = arith.constant 1.000000e+00 : f32
    %646 = vector.broadcast %cst_153 : f32 to vector<2x1xf32>
    %647 = arith.subf %646, %612 : vector<2x1xf32>
    %648 = vector.broadcast %647 : vector<2x1xf32> to vector<2x32xf32>
    %649 = arith.mulf %648, %559 : vector<2x32xf32>
    %650 = arith.addf %645, %649 : vector<2x32xf32>
    %651 = vector.broadcast %612 : vector<2x1xf32> to vector<2x32xf32>
    %652 = arith.mulf %651, %650 : vector<2x32xf32>
    %653 = arith.index_cast %566 : i32 to index
    %c0_154 = arith.constant 0 : index
    %654 = vector.load %arg18[%653, %c0_154] : memref<32x32xf32, #tpu.memory_space<vmem>>, vector<2x32xf32>
    tpu.vector_store %arg18[%653, %c0_154], %652 {strides = array<i32>} : memref<32x32xf32, #tpu.memory_space<vmem>>, vector<2x32xf32>,
    %c7_i32 = arith.constant 7 : i32
    %c2_i32_155 = arith.constant 2 : i32
    %655 = arith.muli %c7_i32, %c2_i32_155 : i32
    %c15_i32_156 = arith.constant 15 : i32
    %656 = arith.subi %c15_i32_156, %c7_i32 : i32
    %c2_i32_157 = arith.constant 2 : i32
    %657 = arith.muli %656, %c2_i32_157 : i32
    %658 = arith.index_cast %655 : i32 to index
    %c0_158 = arith.constant 0 : index
    %659 = vector.load %arg1[%658, %c0_158] : memref<32x1xf32, #tpu.memory_space<vmem>>, vector<2x1xf32>
    %660 = arith.index_cast %655 : i32 to index
    %c0_159 = arith.constant 0 : index
    %661 = vector.load %arg15[%660, %c0_159] : memref<32x96xf32, #tpu.memory_space<vmem>>, vector<2x96xf32>
    %cst_160 = arith.constant dense<0.000000e+00> : vector<2x96xf32>
    %662 = tpu.matmul %606, %13, %cst_160 {dimension_numbers = #tpu.dot_dimension_numbers<[1], [0], [0], [1], [0, 0, 1, 1], [], []>} : vector<2x32xf32>, vector<32x96xf32>, vector<2x96xf32> -> vector<2x96xf32>
    %663 = vector.broadcast %14 : vector<1x96xf32> to vector<2x96xf32>
    %664 = arith.addf %662, %663 : vector<2x96xf32>
    %665 = vector.extract_strided_slice %661 {offsets = [0, 0], sizes = [2, 32], strides = [1, 1]} : vector<2x96xf32> to vector<2x32xf32>
    %666 = vector.extract_strided_slice %664 {offsets = [0, 0], sizes = [2, 32], strides = [1, 1]} : vector<2x96xf32> to vector<2x32xf32>
    %667 = arith.addf %665, %666 : vector<2x32xf32>
    %668 = arith.negf %667 : vector<2x32xf32>
    %669 = math.exp %668 : vector<2x32xf32>
    %cst_161 = arith.constant 1.000000e+00 : f32
    %670 = vector.broadcast %cst_161 : f32 to vector<2x32xf32>
    %671 = arith.addf %670, %669 : vector<2x32xf32>
    %672 = arith.divf %670, %671 : vector<2x32xf32>
    %673 = vector.extract_strided_slice %661 {offsets = [0, 32], sizes = [2, 32], strides = [1, 1]} : vector<2x96xf32> to vector<2x32xf32>
    %674 = vector.extract_strided_slice %664 {offsets = [0, 32], sizes = [2, 32], strides = [1, 1]} : vector<2x96xf32> to vector<2x32xf32>
    %675 = arith.addf %673, %674 : vector<2x32xf32>
    %676 = arith.negf %675 : vector<2x32xf32>
    %677 = math.exp %676 : vector<2x32xf32>
    %cst_162 = arith.constant 1.000000e+00 : f32
    %678 = vector.broadcast %cst_162 : f32 to vector<2x32xf32>
    %679 = arith.addf %678, %677 : vector<2x32xf32>
    %680 = arith.divf %678, %679 : vector<2x32xf32>
    %681 = vector.extract_strided_slice %661 {offsets = [0, 64], sizes = [2, 32], strides = [1, 1]} : vector<2x96xf32> to vector<2x32xf32>
    %682 = vector.extract_strided_slice %664 {offsets = [0, 64], sizes = [2, 32], strides = [1, 1]} : vector<2x96xf32> to vector<2x32xf32>
    %683 = arith.mulf %672, %682 : vector<2x32xf32>
    %684 = arith.addf %681, %683 : vector<2x32xf32>
    %685 = math.tanh %684 : vector<2x32xf32>
    %cst_163 = arith.constant 1.000000e+00 : f32
    %686 = vector.broadcast %cst_163 : f32 to vector<2x32xf32>
    %687 = arith.subf %686, %680 : vector<2x32xf32>
    %688 = arith.mulf %687, %685 : vector<2x32xf32>
    %689 = arith.mulf %680, %606 : vector<2x32xf32>
    %690 = arith.addf %688, %689 : vector<2x32xf32>
    %691 = vector.broadcast %659 : vector<2x1xf32> to vector<2x32xf32>
    %692 = arith.mulf %691, %690 : vector<2x32xf32>
    %cst_164 = arith.constant 1.000000e+00 : f32
    %693 = vector.broadcast %cst_164 : f32 to vector<2x1xf32>
    %694 = arith.subf %693, %659 : vector<2x1xf32>
    %695 = vector.broadcast %694 : vector<2x1xf32> to vector<2x32xf32>
    %696 = arith.mulf %695, %606 : vector<2x32xf32>
    %697 = arith.addf %692, %696 : vector<2x32xf32>
    %698 = vector.broadcast %659 : vector<2x1xf32> to vector<2x32xf32>
    %699 = arith.mulf %698, %697 : vector<2x32xf32>
    %700 = arith.index_cast %655 : i32 to index
    %c0_165 = arith.constant 0 : index
    %701 = vector.load %arg17[%700, %c0_165] : memref<32x32xf32, #tpu.memory_space<vmem>>, vector<2x32xf32>
    tpu.vector_store %arg17[%700, %c0_165], %699 {strides = array<i32>} : memref<32x32xf32, #tpu.memory_space<vmem>>, vector<2x32xf32>,
    %702 = arith.index_cast %657 : i32 to index
    %c0_166 = arith.constant 0 : index
    %703 = vector.load %arg1[%702, %c0_166] : memref<32x1xf32, #tpu.memory_space<vmem>>, vector<2x1xf32>
    %704 = arith.index_cast %657 : i32 to index
    %c0_167 = arith.constant 0 : index
    %705 = vector.load %arg16[%704, %c0_167] : memref<32x96xf32, #tpu.memory_space<vmem>>, vector<2x96xf32>
    %cst_168 = arith.constant dense<0.000000e+00> : vector<2x96xf32>
    %706 = tpu.matmul %650, %15, %cst_168 {dimension_numbers = #tpu.dot_dimension_numbers<[1], [0], [0], [1], [0, 0, 1, 1], [], []>} : vector<2x32xf32>, vector<32x96xf32>, vector<2x96xf32> -> vector<2x96xf32>
    %707 = vector.broadcast %16 : vector<1x96xf32> to vector<2x96xf32>
    %708 = arith.addf %706, %707 : vector<2x96xf32>
    %709 = vector.extract_strided_slice %705 {offsets = [0, 0], sizes = [2, 32], strides = [1, 1]} : vector<2x96xf32> to vector<2x32xf32>
    %710 = vector.extract_strided_slice %708 {offsets = [0, 0], sizes = [2, 32], strides = [1, 1]} : vector<2x96xf32> to vector<2x32xf32>
    %711 = arith.addf %709, %710 : vector<2x32xf32>
    %712 = arith.negf %711 : vector<2x32xf32>
    %713 = math.exp %712 : vector<2x32xf32>
    %cst_169 = arith.constant 1.000000e+00 : f32
    %714 = vector.broadcast %cst_169 : f32 to vector<2x32xf32>
    %715 = arith.addf %714, %713 : vector<2x32xf32>
    %716 = arith.divf %714, %715 : vector<2x32xf32>
    %717 = vector.extract_strided_slice %705 {offsets = [0, 32], sizes = [2, 32], strides = [1, 1]} : vector<2x96xf32> to vector<2x32xf32>
    %718 = vector.extract_strided_slice %708 {offsets = [0, 32], sizes = [2, 32], strides = [1, 1]} : vector<2x96xf32> to vector<2x32xf32>
    %719 = arith.addf %717, %718 : vector<2x32xf32>
    %720 = arith.negf %719 : vector<2x32xf32>
    %721 = math.exp %720 : vector<2x32xf32>
    %cst_170 = arith.constant 1.000000e+00 : f32
    %722 = vector.broadcast %cst_170 : f32 to vector<2x32xf32>
    %723 = arith.addf %722, %721 : vector<2x32xf32>
    %724 = arith.divf %722, %723 : vector<2x32xf32>
    %725 = vector.extract_strided_slice %705 {offsets = [0, 64], sizes = [2, 32], strides = [1, 1]} : vector<2x96xf32> to vector<2x32xf32>
    %726 = vector.extract_strided_slice %708 {offsets = [0, 64], sizes = [2, 32], strides = [1, 1]} : vector<2x96xf32> to vector<2x32xf32>
    %727 = arith.mulf %716, %726 : vector<2x32xf32>
    %728 = arith.addf %725, %727 : vector<2x32xf32>
    %729 = math.tanh %728 : vector<2x32xf32>
    %cst_171 = arith.constant 1.000000e+00 : f32
    %730 = vector.broadcast %cst_171 : f32 to vector<2x32xf32>
    %731 = arith.subf %730, %724 : vector<2x32xf32>
    %732 = arith.mulf %731, %729 : vector<2x32xf32>
    %733 = arith.mulf %724, %650 : vector<2x32xf32>
    %734 = arith.addf %732, %733 : vector<2x32xf32>
    %735 = vector.broadcast %703 : vector<2x1xf32> to vector<2x32xf32>
    %736 = arith.mulf %735, %734 : vector<2x32xf32>
    %cst_172 = arith.constant 1.000000e+00 : f32
    %737 = vector.broadcast %cst_172 : f32 to vector<2x1xf32>
    %738 = arith.subf %737, %703 : vector<2x1xf32>
    %739 = vector.broadcast %738 : vector<2x1xf32> to vector<2x32xf32>
    %740 = arith.mulf %739, %650 : vector<2x32xf32>
    %741 = arith.addf %736, %740 : vector<2x32xf32>
    %742 = vector.broadcast %703 : vector<2x1xf32> to vector<2x32xf32>
    %743 = arith.mulf %742, %741 : vector<2x32xf32>
    %744 = arith.index_cast %657 : i32 to index
    %c0_173 = arith.constant 0 : index
    %745 = vector.load %arg18[%744, %c0_173] : memref<32x32xf32, #tpu.memory_space<vmem>>, vector<2x32xf32>
    tpu.vector_store %arg18[%744, %c0_173], %743 {strides = array<i32>} : memref<32x32xf32, #tpu.memory_space<vmem>>, vector<2x32xf32>,
    %c8_i32 = arith.constant 8 : i32
    %c2_i32_174 = arith.constant 2 : i32
    %746 = arith.muli %c8_i32, %c2_i32_174 : i32
    %c15_i32_175 = arith.constant 15 : i32
    %747 = arith.subi %c15_i32_175, %c8_i32 : i32
    %c2_i32_176 = arith.constant 2 : i32
    %748 = arith.muli %747, %c2_i32_176 : i32
    %749 = arith.index_cast %746 : i32 to index
    %c0_177 = arith.constant 0 : index
    %750 = vector.load %arg1[%749, %c0_177] : memref<32x1xf32, #tpu.memory_space<vmem>>, vector<2x1xf32>
    %751 = arith.index_cast %746 : i32 to index
    %c0_178 = arith.constant 0 : index
    %752 = vector.load %arg15[%751, %c0_178] : memref<32x96xf32, #tpu.memory_space<vmem>>, vector<2x96xf32>
    %cst_179 = arith.constant dense<0.000000e+00> : vector<2x96xf32>
    %753 = tpu.matmul %697, %13, %cst_179 {dimension_numbers = #tpu.dot_dimension_numbers<[1], [0], [0], [1], [0, 0, 1, 1], [], []>} : vector<2x32xf32>, vector<32x96xf32>, vector<2x96xf32> -> vector<2x96xf32>
    %754 = vector.broadcast %14 : vector<1x96xf32> to vector<2x96xf32>
    %755 = arith.addf %753, %754 : vector<2x96xf32>
    %756 = vector.extract_strided_slice %752 {offsets = [0, 0], sizes = [2, 32], strides = [1, 1]} : vector<2x96xf32> to vector<2x32xf32>
    %757 = vector.extract_strided_slice %755 {offsets = [0, 0], sizes = [2, 32], strides = [1, 1]} : vector<2x96xf32> to vector<2x32xf32>
    %758 = arith.addf %756, %757 : vector<2x32xf32>
    %759 = arith.negf %758 : vector<2x32xf32>
    %760 = math.exp %759 : vector<2x32xf32>
    %cst_180 = arith.constant 1.000000e+00 : f32
    %761 = vector.broadcast %cst_180 : f32 to vector<2x32xf32>
    %762 = arith.addf %761, %760 : vector<2x32xf32>
    %763 = arith.divf %761, %762 : vector<2x32xf32>
    %764 = vector.extract_strided_slice %752 {offsets = [0, 32], sizes = [2, 32], strides = [1, 1]} : vector<2x96xf32> to vector<2x32xf32>
    %765 = vector.extract_strided_slice %755 {offsets = [0, 32], sizes = [2, 32], strides = [1, 1]} : vector<2x96xf32> to vector<2x32xf32>
    %766 = arith.addf %764, %765 : vector<2x32xf32>
    %767 = arith.negf %766 : vector<2x32xf32>
    %768 = math.exp %767 : vector<2x32xf32>
    %cst_181 = arith.constant 1.000000e+00 : f32
    %769 = vector.broadcast %cst_181 : f32 to vector<2x32xf32>
    %770 = arith.addf %769, %768 : vector<2x32xf32>
    %771 = arith.divf %769, %770 : vector<2x32xf32>
    %772 = vector.extract_strided_slice %752 {offsets = [0, 64], sizes = [2, 32], strides = [1, 1]} : vector<2x96xf32> to vector<2x32xf32>
    %773 = vector.extract_strided_slice %755 {offsets = [0, 64], sizes = [2, 32], strides = [1, 1]} : vector<2x96xf32> to vector<2x32xf32>
    %774 = arith.mulf %763, %773 : vector<2x32xf32>
    %775 = arith.addf %772, %774 : vector<2x32xf32>
    %776 = math.tanh %775 : vector<2x32xf32>
    %cst_182 = arith.constant 1.000000e+00 : f32
    %777 = vector.broadcast %cst_182 : f32 to vector<2x32xf32>
    %778 = arith.subf %777, %771 : vector<2x32xf32>
    %779 = arith.mulf %778, %776 : vector<2x32xf32>
    %780 = arith.mulf %771, %697 : vector<2x32xf32>
    %781 = arith.addf %779, %780 : vector<2x32xf32>
    %782 = vector.broadcast %750 : vector<2x1xf32> to vector<2x32xf32>
    %783 = arith.mulf %782, %781 : vector<2x32xf32>
    %cst_183 = arith.constant 1.000000e+00 : f32
    %784 = vector.broadcast %cst_183 : f32 to vector<2x1xf32>
    %785 = arith.subf %784, %750 : vector<2x1xf32>
    %786 = vector.broadcast %785 : vector<2x1xf32> to vector<2x32xf32>
    %787 = arith.mulf %786, %697 : vector<2x32xf32>
    %788 = arith.addf %783, %787 : vector<2x32xf32>
    %789 = vector.broadcast %750 : vector<2x1xf32> to vector<2x32xf32>
    %790 = arith.mulf %789, %788 : vector<2x32xf32>
    %791 = arith.index_cast %746 : i32 to index
    %c0_184 = arith.constant 0 : index
    %792 = vector.load %arg17[%791, %c0_184] : memref<32x32xf32, #tpu.memory_space<vmem>>, vector<2x32xf32>
    tpu.vector_store %arg17[%791, %c0_184], %790 {strides = array<i32>} : memref<32x32xf32, #tpu.memory_space<vmem>>, vector<2x32xf32>,
    %793 = arith.index_cast %748 : i32 to index
    %c0_185 = arith.constant 0 : index
    %794 = vector.load %arg1[%793, %c0_185] : memref<32x1xf32, #tpu.memory_space<vmem>>, vector<2x1xf32>
    %795 = arith.index_cast %748 : i32 to index
    %c0_186 = arith.constant 0 : index
    %796 = vector.load %arg16[%795, %c0_186] : memref<32x96xf32, #tpu.memory_space<vmem>>, vector<2x96xf32>
    %cst_187 = arith.constant dense<0.000000e+00> : vector<2x96xf32>
    %797 = tpu.matmul %741, %15, %cst_187 {dimension_numbers = #tpu.dot_dimension_numbers<[1], [0], [0], [1], [0, 0, 1, 1], [], []>} : vector<2x32xf32>, vector<32x96xf32>, vector<2x96xf32> -> vector<2x96xf32>
    %798 = vector.broadcast %16 : vector<1x96xf32> to vector<2x96xf32>
    %799 = arith.addf %797, %798 : vector<2x96xf32>
    %800 = vector.extract_strided_slice %796 {offsets = [0, 0], sizes = [2, 32], strides = [1, 1]} : vector<2x96xf32> to vector<2x32xf32>
    %801 = vector.extract_strided_slice %799 {offsets = [0, 0], sizes = [2, 32], strides = [1, 1]} : vector<2x96xf32> to vector<2x32xf32>
    %802 = arith.addf %800, %801 : vector<2x32xf32>
    %803 = arith.negf %802 : vector<2x32xf32>
    %804 = math.exp %803 : vector<2x32xf32>
    %cst_188 = arith.constant 1.000000e+00 : f32
    %805 = vector.broadcast %cst_188 : f32 to vector<2x32xf32>
    %806 = arith.addf %805, %804 : vector<2x32xf32>
    %807 = arith.divf %805, %806 : vector<2x32xf32>
    %808 = vector.extract_strided_slice %796 {offsets = [0, 32], sizes = [2, 32], strides = [1, 1]} : vector<2x96xf32> to vector<2x32xf32>
    %809 = vector.extract_strided_slice %799 {offsets = [0, 32], sizes = [2, 32], strides = [1, 1]} : vector<2x96xf32> to vector<2x32xf32>
    %810 = arith.addf %808, %809 : vector<2x32xf32>
    %811 = arith.negf %810 : vector<2x32xf32>
    %812 = math.exp %811 : vector<2x32xf32>
    %cst_189 = arith.constant 1.000000e+00 : f32
    %813 = vector.broadcast %cst_189 : f32 to vector<2x32xf32>
    %814 = arith.addf %813, %812 : vector<2x32xf32>
    %815 = arith.divf %813, %814 : vector<2x32xf32>
    %816 = vector.extract_strided_slice %796 {offsets = [0, 64], sizes = [2, 32], strides = [1, 1]} : vector<2x96xf32> to vector<2x32xf32>
    %817 = vector.extract_strided_slice %799 {offsets = [0, 64], sizes = [2, 32], strides = [1, 1]} : vector<2x96xf32> to vector<2x32xf32>
    %818 = arith.mulf %807, %817 : vector<2x32xf32>
    %819 = arith.addf %816, %818 : vector<2x32xf32>
    %820 = math.tanh %819 : vector<2x32xf32>
    %cst_190 = arith.constant 1.000000e+00 : f32
    %821 = vector.broadcast %cst_190 : f32 to vector<2x32xf32>
    %822 = arith.subf %821, %815 : vector<2x32xf32>
    %823 = arith.mulf %822, %820 : vector<2x32xf32>
    %824 = arith.mulf %815, %741 : vector<2x32xf32>
    %825 = arith.addf %823, %824 : vector<2x32xf32>
    %826 = vector.broadcast %794 : vector<2x1xf32> to vector<2x32xf32>
    %827 = arith.mulf %826, %825 : vector<2x32xf32>
    %cst_191 = arith.constant 1.000000e+00 : f32
    %828 = vector.broadcast %cst_191 : f32 to vector<2x1xf32>
    %829 = arith.subf %828, %794 : vector<2x1xf32>
    %830 = vector.broadcast %829 : vector<2x1xf32> to vector<2x32xf32>
    %831 = arith.mulf %830, %741 : vector<2x32xf32>
    %832 = arith.addf %827, %831 : vector<2x32xf32>
    %833 = vector.broadcast %794 : vector<2x1xf32> to vector<2x32xf32>
    %834 = arith.mulf %833, %832 : vector<2x32xf32>
    %835 = arith.index_cast %748 : i32 to index
    %c0_192 = arith.constant 0 : index
    %836 = vector.load %arg18[%835, %c0_192] : memref<32x32xf32, #tpu.memory_space<vmem>>, vector<2x32xf32>
    tpu.vector_store %arg18[%835, %c0_192], %834 {strides = array<i32>} : memref<32x32xf32, #tpu.memory_space<vmem>>, vector<2x32xf32>,
    %c9_i32 = arith.constant 9 : i32
    %c2_i32_193 = arith.constant 2 : i32
    %837 = arith.muli %c9_i32, %c2_i32_193 : i32
    %c15_i32_194 = arith.constant 15 : i32
    %838 = arith.subi %c15_i32_194, %c9_i32 : i32
    %c2_i32_195 = arith.constant 2 : i32
    %839 = arith.muli %838, %c2_i32_195 : i32
    %840 = arith.index_cast %837 : i32 to index
    %c0_196 = arith.constant 0 : index
    %841 = vector.load %arg1[%840, %c0_196] : memref<32x1xf32, #tpu.memory_space<vmem>>, vector<2x1xf32>
    %842 = arith.index_cast %837 : i32 to index
    %c0_197 = arith.constant 0 : index
    %843 = vector.load %arg15[%842, %c0_197] : memref<32x96xf32, #tpu.memory_space<vmem>>, vector<2x96xf32>
    %cst_198 = arith.constant dense<0.000000e+00> : vector<2x96xf32>
    %844 = tpu.matmul %788, %13, %cst_198 {dimension_numbers = #tpu.dot_dimension_numbers<[1], [0], [0], [1], [0, 0, 1, 1], [], []>} : vector<2x32xf32>, vector<32x96xf32>, vector<2x96xf32> -> vector<2x96xf32>
    %845 = vector.broadcast %14 : vector<1x96xf32> to vector<2x96xf32>
    %846 = arith.addf %844, %845 : vector<2x96xf32>
    %847 = vector.extract_strided_slice %843 {offsets = [0, 0], sizes = [2, 32], strides = [1, 1]} : vector<2x96xf32> to vector<2x32xf32>
    %848 = vector.extract_strided_slice %846 {offsets = [0, 0], sizes = [2, 32], strides = [1, 1]} : vector<2x96xf32> to vector<2x32xf32>
    %849 = arith.addf %847, %848 : vector<2x32xf32>
    %850 = arith.negf %849 : vector<2x32xf32>
    %851 = math.exp %850 : vector<2x32xf32>
    %cst_199 = arith.constant 1.000000e+00 : f32
    %852 = vector.broadcast %cst_199 : f32 to vector<2x32xf32>
    %853 = arith.addf %852, %851 : vector<2x32xf32>
    %854 = arith.divf %852, %853 : vector<2x32xf32>
    %855 = vector.extract_strided_slice %843 {offsets = [0, 32], sizes = [2, 32], strides = [1, 1]} : vector<2x96xf32> to vector<2x32xf32>
    %856 = vector.extract_strided_slice %846 {offsets = [0, 32], sizes = [2, 32], strides = [1, 1]} : vector<2x96xf32> to vector<2x32xf32>
    %857 = arith.addf %855, %856 : vector<2x32xf32>
    %858 = arith.negf %857 : vector<2x32xf32>
    %859 = math.exp %858 : vector<2x32xf32>
    %cst_200 = arith.constant 1.000000e+00 : f32
    %860 = vector.broadcast %cst_200 : f32 to vector<2x32xf32>
    %861 = arith.addf %860, %859 : vector<2x32xf32>
    %862 = arith.divf %860, %861 : vector<2x32xf32>
    %863 = vector.extract_strided_slice %843 {offsets = [0, 64], sizes = [2, 32], strides = [1, 1]} : vector<2x96xf32> to vector<2x32xf32>
    %864 = vector.extract_strided_slice %846 {offsets = [0, 64], sizes = [2, 32], strides = [1, 1]} : vector<2x96xf32> to vector<2x32xf32>
    %865 = arith.mulf %854, %864 : vector<2x32xf32>
    %866 = arith.addf %863, %865 : vector<2x32xf32>
    %867 = math.tanh %866 : vector<2x32xf32>
    %cst_201 = arith.constant 1.000000e+00 : f32
    %868 = vector.broadcast %cst_201 : f32 to vector<2x32xf32>
    %869 = arith.subf %868, %862 : vector<2x32xf32>
    %870 = arith.mulf %869, %867 : vector<2x32xf32>
    %871 = arith.mulf %862, %788 : vector<2x32xf32>
    %872 = arith.addf %870, %871 : vector<2x32xf32>
    %873 = vector.broadcast %841 : vector<2x1xf32> to vector<2x32xf32>
    %874 = arith.mulf %873, %872 : vector<2x32xf32>
    %cst_202 = arith.constant 1.000000e+00 : f32
    %875 = vector.broadcast %cst_202 : f32 to vector<2x1xf32>
    %876 = arith.subf %875, %841 : vector<2x1xf32>
    %877 = vector.broadcast %876 : vector<2x1xf32> to vector<2x32xf32>
    %878 = arith.mulf %877, %788 : vector<2x32xf32>
    %879 = arith.addf %874, %878 : vector<2x32xf32>
    %880 = vector.broadcast %841 : vector<2x1xf32> to vector<2x32xf32>
    %881 = arith.mulf %880, %879 : vector<2x32xf32>
    %882 = arith.index_cast %837 : i32 to index
    %c0_203 = arith.constant 0 : index
    %883 = vector.load %arg17[%882, %c0_203] : memref<32x32xf32, #tpu.memory_space<vmem>>, vector<2x32xf32>
    tpu.vector_store %arg17[%882, %c0_203], %881 {strides = array<i32>} : memref<32x32xf32, #tpu.memory_space<vmem>>, vector<2x32xf32>,
    %884 = arith.index_cast %839 : i32 to index
    %c0_204 = arith.constant 0 : index
    %885 = vector.load %arg1[%884, %c0_204] : memref<32x1xf32, #tpu.memory_space<vmem>>, vector<2x1xf32>
    %886 = arith.index_cast %839 : i32 to index
    %c0_205 = arith.constant 0 : index
    %887 = vector.load %arg16[%886, %c0_205] : memref<32x96xf32, #tpu.memory_space<vmem>>, vector<2x96xf32>
    %cst_206 = arith.constant dense<0.000000e+00> : vector<2x96xf32>
    %888 = tpu.matmul %832, %15, %cst_206 {dimension_numbers = #tpu.dot_dimension_numbers<[1], [0], [0], [1], [0, 0, 1, 1], [], []>} : vector<2x32xf32>, vector<32x96xf32>, vector<2x96xf32> -> vector<2x96xf32>
    %889 = vector.broadcast %16 : vector<1x96xf32> to vector<2x96xf32>
    %890 = arith.addf %888, %889 : vector<2x96xf32>
    %891 = vector.extract_strided_slice %887 {offsets = [0, 0], sizes = [2, 32], strides = [1, 1]} : vector<2x96xf32> to vector<2x32xf32>
    %892 = vector.extract_strided_slice %890 {offsets = [0, 0], sizes = [2, 32], strides = [1, 1]} : vector<2x96xf32> to vector<2x32xf32>
    %893 = arith.addf %891, %892 : vector<2x32xf32>
    %894 = arith.negf %893 : vector<2x32xf32>
    %895 = math.exp %894 : vector<2x32xf32>
    %cst_207 = arith.constant 1.000000e+00 : f32
    %896 = vector.broadcast %cst_207 : f32 to vector<2x32xf32>
    %897 = arith.addf %896, %895 : vector<2x32xf32>
    %898 = arith.divf %896, %897 : vector<2x32xf32>
    %899 = vector.extract_strided_slice %887 {offsets = [0, 32], sizes = [2, 32], strides = [1, 1]} : vector<2x96xf32> to vector<2x32xf32>
    %900 = vector.extract_strided_slice %890 {offsets = [0, 32], sizes = [2, 32], strides = [1, 1]} : vector<2x96xf32> to vector<2x32xf32>
    %901 = arith.addf %899, %900 : vector<2x32xf32>
    %902 = arith.negf %901 : vector<2x32xf32>
    %903 = math.exp %902 : vector<2x32xf32>
    %cst_208 = arith.constant 1.000000e+00 : f32
    %904 = vector.broadcast %cst_208 : f32 to vector<2x32xf32>
    %905 = arith.addf %904, %903 : vector<2x32xf32>
    %906 = arith.divf %904, %905 : vector<2x32xf32>
    %907 = vector.extract_strided_slice %887 {offsets = [0, 64], sizes = [2, 32], strides = [1, 1]} : vector<2x96xf32> to vector<2x32xf32>
    %908 = vector.extract_strided_slice %890 {offsets = [0, 64], sizes = [2, 32], strides = [1, 1]} : vector<2x96xf32> to vector<2x32xf32>
    %909 = arith.mulf %898, %908 : vector<2x32xf32>
    %910 = arith.addf %907, %909 : vector<2x32xf32>
    %911 = math.tanh %910 : vector<2x32xf32>
    %cst_209 = arith.constant 1.000000e+00 : f32
    %912 = vector.broadcast %cst_209 : f32 to vector<2x32xf32>
    %913 = arith.subf %912, %906 : vector<2x32xf32>
    %914 = arith.mulf %913, %911 : vector<2x32xf32>
    %915 = arith.mulf %906, %832 : vector<2x32xf32>
    %916 = arith.addf %914, %915 : vector<2x32xf32>
    %917 = vector.broadcast %885 : vector<2x1xf32> to vector<2x32xf32>
    %918 = arith.mulf %917, %916 : vector<2x32xf32>
    %cst_210 = arith.constant 1.000000e+00 : f32
    %919 = vector.broadcast %cst_210 : f32 to vector<2x1xf32>
    %920 = arith.subf %919, %885 : vector<2x1xf32>
    %921 = vector.broadcast %920 : vector<2x1xf32> to vector<2x32xf32>
    %922 = arith.mulf %921, %832 : vector<2x32xf32>
    %923 = arith.addf %918, %922 : vector<2x32xf32>
    %924 = vector.broadcast %885 : vector<2x1xf32> to vector<2x32xf32>
    %925 = arith.mulf %924, %923 : vector<2x32xf32>
    %926 = arith.index_cast %839 : i32 to index
    %c0_211 = arith.constant 0 : index
    %927 = vector.load %arg18[%926, %c0_211] : memref<32x32xf32, #tpu.memory_space<vmem>>, vector<2x32xf32>
    tpu.vector_store %arg18[%926, %c0_211], %925 {strides = array<i32>} : memref<32x32xf32, #tpu.memory_space<vmem>>, vector<2x32xf32>,
    %c10_i32 = arith.constant 10 : i32
    %c2_i32_212 = arith.constant 2 : i32
    %928 = arith.muli %c10_i32, %c2_i32_212 : i32
    %c15_i32_213 = arith.constant 15 : i32
    %929 = arith.subi %c15_i32_213, %c10_i32 : i32
    %c2_i32_214 = arith.constant 2 : i32
    %930 = arith.muli %929, %c2_i32_214 : i32
    %931 = arith.index_cast %928 : i32 to index
    %c0_215 = arith.constant 0 : index
    %932 = vector.load %arg1[%931, %c0_215] : memref<32x1xf32, #tpu.memory_space<vmem>>, vector<2x1xf32>
    %933 = arith.index_cast %928 : i32 to index
    %c0_216 = arith.constant 0 : index
    %934 = vector.load %arg15[%933, %c0_216] : memref<32x96xf32, #tpu.memory_space<vmem>>, vector<2x96xf32>
    %cst_217 = arith.constant dense<0.000000e+00> : vector<2x96xf32>
    %935 = tpu.matmul %879, %13, %cst_217 {dimension_numbers = #tpu.dot_dimension_numbers<[1], [0], [0], [1], [0, 0, 1, 1], [], []>} : vector<2x32xf32>, vector<32x96xf32>, vector<2x96xf32> -> vector<2x96xf32>
    %936 = vector.broadcast %14 : vector<1x96xf32> to vector<2x96xf32>
    %937 = arith.addf %935, %936 : vector<2x96xf32>
    %938 = vector.extract_strided_slice %934 {offsets = [0, 0], sizes = [2, 32], strides = [1, 1]} : vector<2x96xf32> to vector<2x32xf32>
    %939 = vector.extract_strided_slice %937 {offsets = [0, 0], sizes = [2, 32], strides = [1, 1]} : vector<2x96xf32> to vector<2x32xf32>
    %940 = arith.addf %938, %939 : vector<2x32xf32>
    %941 = arith.negf %940 : vector<2x32xf32>
    %942 = math.exp %941 : vector<2x32xf32>
    %cst_218 = arith.constant 1.000000e+00 : f32
    %943 = vector.broadcast %cst_218 : f32 to vector<2x32xf32>
    %944 = arith.addf %943, %942 : vector<2x32xf32>
    %945 = arith.divf %943, %944 : vector<2x32xf32>
    %946 = vector.extract_strided_slice %934 {offsets = [0, 32], sizes = [2, 32], strides = [1, 1]} : vector<2x96xf32> to vector<2x32xf32>
    %947 = vector.extract_strided_slice %937 {offsets = [0, 32], sizes = [2, 32], strides = [1, 1]} : vector<2x96xf32> to vector<2x32xf32>
    %948 = arith.addf %946, %947 : vector<2x32xf32>
    %949 = arith.negf %948 : vector<2x32xf32>
    %950 = math.exp %949 : vector<2x32xf32>
    %cst_219 = arith.constant 1.000000e+00 : f32
    %951 = vector.broadcast %cst_219 : f32 to vector<2x32xf32>
    %952 = arith.addf %951, %950 : vector<2x32xf32>
    %953 = arith.divf %951, %952 : vector<2x32xf32>
    %954 = vector.extract_strided_slice %934 {offsets = [0, 64], sizes = [2, 32], strides = [1, 1]} : vector<2x96xf32> to vector<2x32xf32>
    %955 = vector.extract_strided_slice %937 {offsets = [0, 64], sizes = [2, 32], strides = [1, 1]} : vector<2x96xf32> to vector<2x32xf32>
    %956 = arith.mulf %945, %955 : vector<2x32xf32>
    %957 = arith.addf %954, %956 : vector<2x32xf32>
    %958 = math.tanh %957 : vector<2x32xf32>
    %cst_220 = arith.constant 1.000000e+00 : f32
    %959 = vector.broadcast %cst_220 : f32 to vector<2x32xf32>
    %960 = arith.subf %959, %953 : vector<2x32xf32>
    %961 = arith.mulf %960, %958 : vector<2x32xf32>
    %962 = arith.mulf %953, %879 : vector<2x32xf32>
    %963 = arith.addf %961, %962 : vector<2x32xf32>
    %964 = vector.broadcast %932 : vector<2x1xf32> to vector<2x32xf32>
    %965 = arith.mulf %964, %963 : vector<2x32xf32>
    %cst_221 = arith.constant 1.000000e+00 : f32
    %966 = vector.broadcast %cst_221 : f32 to vector<2x1xf32>
    %967 = arith.subf %966, %932 : vector<2x1xf32>
    %968 = vector.broadcast %967 : vector<2x1xf32> to vector<2x32xf32>
    %969 = arith.mulf %968, %879 : vector<2x32xf32>
    %970 = arith.addf %965, %969 : vector<2x32xf32>
    %971 = vector.broadcast %932 : vector<2x1xf32> to vector<2x32xf32>
    %972 = arith.mulf %971, %970 : vector<2x32xf32>
    %973 = arith.index_cast %928 : i32 to index
    %c0_222 = arith.constant 0 : index
    %974 = vector.load %arg17[%973, %c0_222] : memref<32x32xf32, #tpu.memory_space<vmem>>, vector<2x32xf32>
    tpu.vector_store %arg17[%973, %c0_222], %972 {strides = array<i32>} : memref<32x32xf32, #tpu.memory_space<vmem>>, vector<2x32xf32>,
    %975 = arith.index_cast %930 : i32 to index
    %c0_223 = arith.constant 0 : index
    %976 = vector.load %arg1[%975, %c0_223] : memref<32x1xf32, #tpu.memory_space<vmem>>, vector<2x1xf32>
    %977 = arith.index_cast %930 : i32 to index
    %c0_224 = arith.constant 0 : index
    %978 = vector.load %arg16[%977, %c0_224] : memref<32x96xf32, #tpu.memory_space<vmem>>, vector<2x96xf32>
    %cst_225 = arith.constant dense<0.000000e+00> : vector<2x96xf32>
    %979 = tpu.matmul %923, %15, %cst_225 {dimension_numbers = #tpu.dot_dimension_numbers<[1], [0], [0], [1], [0, 0, 1, 1], [], []>} : vector<2x32xf32>, vector<32x96xf32>, vector<2x96xf32> -> vector<2x96xf32>
    %980 = vector.broadcast %16 : vector<1x96xf32> to vector<2x96xf32>
    %981 = arith.addf %979, %980 : vector<2x96xf32>
    %982 = vector.extract_strided_slice %978 {offsets = [0, 0], sizes = [2, 32], strides = [1, 1]} : vector<2x96xf32> to vector<2x32xf32>
    %983 = vector.extract_strided_slice %981 {offsets = [0, 0], sizes = [2, 32], strides = [1, 1]} : vector<2x96xf32> to vector<2x32xf32>
    %984 = arith.addf %982, %983 : vector<2x32xf32>
    %985 = arith.negf %984 : vector<2x32xf32>
    %986 = math.exp %985 : vector<2x32xf32>
    %cst_226 = arith.constant 1.000000e+00 : f32
    %987 = vector.broadcast %cst_226 : f32 to vector<2x32xf32>
    %988 = arith.addf %987, %986 : vector<2x32xf32>
    %989 = arith.divf %987, %988 : vector<2x32xf32>
    %990 = vector.extract_strided_slice %978 {offsets = [0, 32], sizes = [2, 32], strides = [1, 1]} : vector<2x96xf32> to vector<2x32xf32>
    %991 = vector.extract_strided_slice %981 {offsets = [0, 32], sizes = [2, 32], strides = [1, 1]} : vector<2x96xf32> to vector<2x32xf32>
    %992 = arith.addf %990, %991 : vector<2x32xf32>
    %993 = arith.negf %992 : vector<2x32xf32>
    %994 = math.exp %993 : vector<2x32xf32>
    %cst_227 = arith.constant 1.000000e+00 : f32
    %995 = vector.broadcast %cst_227 : f32 to vector<2x32xf32>
    %996 = arith.addf %995, %994 : vector<2x32xf32>
    %997 = arith.divf %995, %996 : vector<2x32xf32>
    %998 = vector.extract_strided_slice %978 {offsets = [0, 64], sizes = [2, 32], strides = [1, 1]} : vector<2x96xf32> to vector<2x32xf32>
    %999 = vector.extract_strided_slice %981 {offsets = [0, 64], sizes = [2, 32], strides = [1, 1]} : vector<2x96xf32> to vector<2x32xf32>
    %1000 = arith.mulf %989, %999 : vector<2x32xf32>
    %1001 = arith.addf %998, %1000 : vector<2x32xf32>
    %1002 = math.tanh %1001 : vector<2x32xf32>
    %cst_228 = arith.constant 1.000000e+00 : f32
    %1003 = vector.broadcast %cst_228 : f32 to vector<2x32xf32>
    %1004 = arith.subf %1003, %997 : vector<2x32xf32>
    %1005 = arith.mulf %1004, %1002 : vector<2x32xf32>
    %1006 = arith.mulf %997, %923 : vector<2x32xf32>
    %1007 = arith.addf %1005, %1006 : vector<2x32xf32>
    %1008 = vector.broadcast %976 : vector<2x1xf32> to vector<2x32xf32>
    %1009 = arith.mulf %1008, %1007 : vector<2x32xf32>
    %cst_229 = arith.constant 1.000000e+00 : f32
    %1010 = vector.broadcast %cst_229 : f32 to vector<2x1xf32>
    %1011 = arith.subf %1010, %976 : vector<2x1xf32>
    %1012 = vector.broadcast %1011 : vector<2x1xf32> to vector<2x32xf32>
    %1013 = arith.mulf %1012, %923 : vector<2x32xf32>
    %1014 = arith.addf %1009, %1013 : vector<2x32xf32>
    %1015 = vector.broadcast %976 : vector<2x1xf32> to vector<2x32xf32>
    %1016 = arith.mulf %1015, %1014 : vector<2x32xf32>
    %1017 = arith.index_cast %930 : i32 to index
    %c0_230 = arith.constant 0 : index
    %1018 = vector.load %arg18[%1017, %c0_230] : memref<32x32xf32, #tpu.memory_space<vmem>>, vector<2x32xf32>
    tpu.vector_store %arg18[%1017, %c0_230], %1016 {strides = array<i32>} : memref<32x32xf32, #tpu.memory_space<vmem>>, vector<2x32xf32>,
    %c11_i32 = arith.constant 11 : i32
    %c2_i32_231 = arith.constant 2 : i32
    %1019 = arith.muli %c11_i32, %c2_i32_231 : i32
    %c15_i32_232 = arith.constant 15 : i32
    %1020 = arith.subi %c15_i32_232, %c11_i32 : i32
    %c2_i32_233 = arith.constant 2 : i32
    %1021 = arith.muli %1020, %c2_i32_233 : i32
    %1022 = arith.index_cast %1019 : i32 to index
    %c0_234 = arith.constant 0 : index
    %1023 = vector.load %arg1[%1022, %c0_234] : memref<32x1xf32, #tpu.memory_space<vmem>>, vector<2x1xf32>
    %1024 = arith.index_cast %1019 : i32 to index
    %c0_235 = arith.constant 0 : index
    %1025 = vector.load %arg15[%1024, %c0_235] : memref<32x96xf32, #tpu.memory_space<vmem>>, vector<2x96xf32>
    %cst_236 = arith.constant dense<0.000000e+00> : vector<2x96xf32>
    %1026 = tpu.matmul %970, %13, %cst_236 {dimension_numbers = #tpu.dot_dimension_numbers<[1], [0], [0], [1], [0, 0, 1, 1], [], []>} : vector<2x32xf32>, vector<32x96xf32>, vector<2x96xf32> -> vector<2x96xf32>
    %1027 = vector.broadcast %14 : vector<1x96xf32> to vector<2x96xf32>
    %1028 = arith.addf %1026, %1027 : vector<2x96xf32>
    %1029 = vector.extract_strided_slice %1025 {offsets = [0, 0], sizes = [2, 32], strides = [1, 1]} : vector<2x96xf32> to vector<2x32xf32>
    %1030 = vector.extract_strided_slice %1028 {offsets = [0, 0], sizes = [2, 32], strides = [1, 1]} : vector<2x96xf32> to vector<2x32xf32>
    %1031 = arith.addf %1029, %1030 : vector<2x32xf32>
    %1032 = arith.negf %1031 : vector<2x32xf32>
    %1033 = math.exp %1032 : vector<2x32xf32>
    %cst_237 = arith.constant 1.000000e+00 : f32
    %1034 = vector.broadcast %cst_237 : f32 to vector<2x32xf32>
    %1035 = arith.addf %1034, %1033 : vector<2x32xf32>
    %1036 = arith.divf %1034, %1035 : vector<2x32xf32>
    %1037 = vector.extract_strided_slice %1025 {offsets = [0, 32], sizes = [2, 32], strides = [1, 1]} : vector<2x96xf32> to vector<2x32xf32>
    %1038 = vector.extract_strided_slice %1028 {offsets = [0, 32], sizes = [2, 32], strides = [1, 1]} : vector<2x96xf32> to vector<2x32xf32>
    %1039 = arith.addf %1037, %1038 : vector<2x32xf32>
    %1040 = arith.negf %1039 : vector<2x32xf32>
    %1041 = math.exp %1040 : vector<2x32xf32>
    %cst_238 = arith.constant 1.000000e+00 : f32
    %1042 = vector.broadcast %cst_238 : f32 to vector<2x32xf32>
    %1043 = arith.addf %1042, %1041 : vector<2x32xf32>
    %1044 = arith.divf %1042, %1043 : vector<2x32xf32>
    %1045 = vector.extract_strided_slice %1025 {offsets = [0, 64], sizes = [2, 32], strides = [1, 1]} : vector<2x96xf32> to vector<2x32xf32>
    %1046 = vector.extract_strided_slice %1028 {offsets = [0, 64], sizes = [2, 32], strides = [1, 1]} : vector<2x96xf32> to vector<2x32xf32>
    %1047 = arith.mulf %1036, %1046 : vector<2x32xf32>
    %1048 = arith.addf %1045, %1047 : vector<2x32xf32>
    %1049 = math.tanh %1048 : vector<2x32xf32>
    %cst_239 = arith.constant 1.000000e+00 : f32
    %1050 = vector.broadcast %cst_239 : f32 to vector<2x32xf32>
    %1051 = arith.subf %1050, %1044 : vector<2x32xf32>
    %1052 = arith.mulf %1051, %1049 : vector<2x32xf32>
    %1053 = arith.mulf %1044, %970 : vector<2x32xf32>
    %1054 = arith.addf %1052, %1053 : vector<2x32xf32>
    %1055 = vector.broadcast %1023 : vector<2x1xf32> to vector<2x32xf32>
    %1056 = arith.mulf %1055, %1054 : vector<2x32xf32>
    %cst_240 = arith.constant 1.000000e+00 : f32
    %1057 = vector.broadcast %cst_240 : f32 to vector<2x1xf32>
    %1058 = arith.subf %1057, %1023 : vector<2x1xf32>
    %1059 = vector.broadcast %1058 : vector<2x1xf32> to vector<2x32xf32>
    %1060 = arith.mulf %1059, %970 : vector<2x32xf32>
    %1061 = arith.addf %1056, %1060 : vector<2x32xf32>
    %1062 = vector.broadcast %1023 : vector<2x1xf32> to vector<2x32xf32>
    %1063 = arith.mulf %1062, %1061 : vector<2x32xf32>
    %1064 = arith.index_cast %1019 : i32 to index
    %c0_241 = arith.constant 0 : index
    %1065 = vector.load %arg17[%1064, %c0_241] : memref<32x32xf32, #tpu.memory_space<vmem>>, vector<2x32xf32>
    tpu.vector_store %arg17[%1064, %c0_241], %1063 {strides = array<i32>} : memref<32x32xf32, #tpu.memory_space<vmem>>, vector<2x32xf32>,
    %1066 = arith.index_cast %1021 : i32 to index
    %c0_242 = arith.constant 0 : index
    %1067 = vector.load %arg1[%1066, %c0_242] : memref<32x1xf32, #tpu.memory_space<vmem>>, vector<2x1xf32>
    %1068 = arith.index_cast %1021 : i32 to index
    %c0_243 = arith.constant 0 : index
    %1069 = vector.load %arg16[%1068, %c0_243] : memref<32x96xf32, #tpu.memory_space<vmem>>, vector<2x96xf32>
    %cst_244 = arith.constant dense<0.000000e+00> : vector<2x96xf32>
    %1070 = tpu.matmul %1014, %15, %cst_244 {dimension_numbers = #tpu.dot_dimension_numbers<[1], [0], [0], [1], [0, 0, 1, 1], [], []>} : vector<2x32xf32>, vector<32x96xf32>, vector<2x96xf32> -> vector<2x96xf32>
    %1071 = vector.broadcast %16 : vector<1x96xf32> to vector<2x96xf32>
    %1072 = arith.addf %1070, %1071 : vector<2x96xf32>
    %1073 = vector.extract_strided_slice %1069 {offsets = [0, 0], sizes = [2, 32], strides = [1, 1]} : vector<2x96xf32> to vector<2x32xf32>
    %1074 = vector.extract_strided_slice %1072 {offsets = [0, 0], sizes = [2, 32], strides = [1, 1]} : vector<2x96xf32> to vector<2x32xf32>
    %1075 = arith.addf %1073, %1074 : vector<2x32xf32>
    %1076 = arith.negf %1075 : vector<2x32xf32>
    %1077 = math.exp %1076 : vector<2x32xf32>
    %cst_245 = arith.constant 1.000000e+00 : f32
    %1078 = vector.broadcast %cst_245 : f32 to vector<2x32xf32>
    %1079 = arith.addf %1078, %1077 : vector<2x32xf32>
    %1080 = arith.divf %1078, %1079 : vector<2x32xf32>
    %1081 = vector.extract_strided_slice %1069 {offsets = [0, 32], sizes = [2, 32], strides = [1, 1]} : vector<2x96xf32> to vector<2x32xf32>
    %1082 = vector.extract_strided_slice %1072 {offsets = [0, 32], sizes = [2, 32], strides = [1, 1]} : vector<2x96xf32> to vector<2x32xf32>
    %1083 = arith.addf %1081, %1082 : vector<2x32xf32>
    %1084 = arith.negf %1083 : vector<2x32xf32>
    %1085 = math.exp %1084 : vector<2x32xf32>
    %cst_246 = arith.constant 1.000000e+00 : f32
    %1086 = vector.broadcast %cst_246 : f32 to vector<2x32xf32>
    %1087 = arith.addf %1086, %1085 : vector<2x32xf32>
    %1088 = arith.divf %1086, %1087 : vector<2x32xf32>
    %1089 = vector.extract_strided_slice %1069 {offsets = [0, 64], sizes = [2, 32], strides = [1, 1]} : vector<2x96xf32> to vector<2x32xf32>
    %1090 = vector.extract_strided_slice %1072 {offsets = [0, 64], sizes = [2, 32], strides = [1, 1]} : vector<2x96xf32> to vector<2x32xf32>
    %1091 = arith.mulf %1080, %1090 : vector<2x32xf32>
    %1092 = arith.addf %1089, %1091 : vector<2x32xf32>
    %1093 = math.tanh %1092 : vector<2x32xf32>
    %cst_247 = arith.constant 1.000000e+00 : f32
    %1094 = vector.broadcast %cst_247 : f32 to vector<2x32xf32>
    %1095 = arith.subf %1094, %1088 : vector<2x32xf32>
    %1096 = arith.mulf %1095, %1093 : vector<2x32xf32>
    %1097 = arith.mulf %1088, %1014 : vector<2x32xf32>
    %1098 = arith.addf %1096, %1097 : vector<2x32xf32>
    %1099 = vector.broadcast %1067 : vector<2x1xf32> to vector<2x32xf32>
    %1100 = arith.mulf %1099, %1098 : vector<2x32xf32>
    %cst_248 = arith.constant 1.000000e+00 : f32
    %1101 = vector.broadcast %cst_248 : f32 to vector<2x1xf32>
    %1102 = arith.subf %1101, %1067 : vector<2x1xf32>
    %1103 = vector.broadcast %1102 : vector<2x1xf32> to vector<2x32xf32>
    %1104 = arith.mulf %1103, %1014 : vector<2x32xf32>
    %1105 = arith.addf %1100, %1104 : vector<2x32xf32>
    %1106 = vector.broadcast %1067 : vector<2x1xf32> to vector<2x32xf32>
    %1107 = arith.mulf %1106, %1105 : vector<2x32xf32>
    %1108 = arith.index_cast %1021 : i32 to index
    %c0_249 = arith.constant 0 : index
    %1109 = vector.load %arg18[%1108, %c0_249] : memref<32x32xf32, #tpu.memory_space<vmem>>, vector<2x32xf32>
    tpu.vector_store %arg18[%1108, %c0_249], %1107 {strides = array<i32>} : memref<32x32xf32, #tpu.memory_space<vmem>>, vector<2x32xf32>,
    %c12_i32 = arith.constant 12 : i32
    %c2_i32_250 = arith.constant 2 : i32
    %1110 = arith.muli %c12_i32, %c2_i32_250 : i32
    %c15_i32_251 = arith.constant 15 : i32
    %1111 = arith.subi %c15_i32_251, %c12_i32 : i32
    %c2_i32_252 = arith.constant 2 : i32
    %1112 = arith.muli %1111, %c2_i32_252 : i32
    %1113 = arith.index_cast %1110 : i32 to index
    %c0_253 = arith.constant 0 : index
    %1114 = vector.load %arg1[%1113, %c0_253] : memref<32x1xf32, #tpu.memory_space<vmem>>, vector<2x1xf32>
    %1115 = arith.index_cast %1110 : i32 to index
    %c0_254 = arith.constant 0 : index
    %1116 = vector.load %arg15[%1115, %c0_254] : memref<32x96xf32, #tpu.memory_space<vmem>>, vector<2x96xf32>
    %cst_255 = arith.constant dense<0.000000e+00> : vector<2x96xf32>
    %1117 = tpu.matmul %1061, %13, %cst_255 {dimension_numbers = #tpu.dot_dimension_numbers<[1], [0], [0], [1], [0, 0, 1, 1], [], []>} : vector<2x32xf32>, vector<32x96xf32>, vector<2x96xf32> -> vector<2x96xf32>
    %1118 = vector.broadcast %14 : vector<1x96xf32> to vector<2x96xf32>
    %1119 = arith.addf %1117, %1118 : vector<2x96xf32>
    %1120 = vector.extract_strided_slice %1116 {offsets = [0, 0], sizes = [2, 32], strides = [1, 1]} : vector<2x96xf32> to vector<2x32xf32>
    %1121 = vector.extract_strided_slice %1119 {offsets = [0, 0], sizes = [2, 32], strides = [1, 1]} : vector<2x96xf32> to vector<2x32xf32>
    %1122 = arith.addf %1120, %1121 : vector<2x32xf32>
    %1123 = arith.negf %1122 : vector<2x32xf32>
    %1124 = math.exp %1123 : vector<2x32xf32>
    %cst_256 = arith.constant 1.000000e+00 : f32
    %1125 = vector.broadcast %cst_256 : f32 to vector<2x32xf32>
    %1126 = arith.addf %1125, %1124 : vector<2x32xf32>
    %1127 = arith.divf %1125, %1126 : vector<2x32xf32>
    %1128 = vector.extract_strided_slice %1116 {offsets = [0, 32], sizes = [2, 32], strides = [1, 1]} : vector<2x96xf32> to vector<2x32xf32>
    %1129 = vector.extract_strided_slice %1119 {offsets = [0, 32], sizes = [2, 32], strides = [1, 1]} : vector<2x96xf32> to vector<2x32xf32>
    %1130 = arith.addf %1128, %1129 : vector<2x32xf32>
    %1131 = arith.negf %1130 : vector<2x32xf32>
    %1132 = math.exp %1131 : vector<2x32xf32>
    %cst_257 = arith.constant 1.000000e+00 : f32
    %1133 = vector.broadcast %cst_257 : f32 to vector<2x32xf32>
    %1134 = arith.addf %1133, %1132 : vector<2x32xf32>
    %1135 = arith.divf %1133, %1134 : vector<2x32xf32>
    %1136 = vector.extract_strided_slice %1116 {offsets = [0, 64], sizes = [2, 32], strides = [1, 1]} : vector<2x96xf32> to vector<2x32xf32>
    %1137 = vector.extract_strided_slice %1119 {offsets = [0, 64], sizes = [2, 32], strides = [1, 1]} : vector<2x96xf32> to vector<2x32xf32>
    %1138 = arith.mulf %1127, %1137 : vector<2x32xf32>
    %1139 = arith.addf %1136, %1138 : vector<2x32xf32>
    %1140 = math.tanh %1139 : vector<2x32xf32>
    %cst_258 = arith.constant 1.000000e+00 : f32
    %1141 = vector.broadcast %cst_258 : f32 to vector<2x32xf32>
    %1142 = arith.subf %1141, %1135 : vector<2x32xf32>
    %1143 = arith.mulf %1142, %1140 : vector<2x32xf32>
    %1144 = arith.mulf %1135, %1061 : vector<2x32xf32>
    %1145 = arith.addf %1143, %1144 : vector<2x32xf32>
    %1146 = vector.broadcast %1114 : vector<2x1xf32> to vector<2x32xf32>
    %1147 = arith.mulf %1146, %1145 : vector<2x32xf32>
    %cst_259 = arith.constant 1.000000e+00 : f32
    %1148 = vector.broadcast %cst_259 : f32 to vector<2x1xf32>
    %1149 = arith.subf %1148, %1114 : vector<2x1xf32>
    %1150 = vector.broadcast %1149 : vector<2x1xf32> to vector<2x32xf32>
    %1151 = arith.mulf %1150, %1061 : vector<2x32xf32>
    %1152 = arith.addf %1147, %1151 : vector<2x32xf32>
    %1153 = vector.broadcast %1114 : vector<2x1xf32> to vector<2x32xf32>
    %1154 = arith.mulf %1153, %1152 : vector<2x32xf32>
    %1155 = arith.index_cast %1110 : i32 to index
    %c0_260 = arith.constant 0 : index
    %1156 = vector.load %arg17[%1155, %c0_260] : memref<32x32xf32, #tpu.memory_space<vmem>>, vector<2x32xf32>
    tpu.vector_store %arg17[%1155, %c0_260], %1154 {strides = array<i32>} : memref<32x32xf32, #tpu.memory_space<vmem>>, vector<2x32xf32>,
    %1157 = arith.index_cast %1112 : i32 to index
    %c0_261 = arith.constant 0 : index
    %1158 = vector.load %arg1[%1157, %c0_261] : memref<32x1xf32, #tpu.memory_space<vmem>>, vector<2x1xf32>
    %1159 = arith.index_cast %1112 : i32 to index
    %c0_262 = arith.constant 0 : index
    %1160 = vector.load %arg16[%1159, %c0_262] : memref<32x96xf32, #tpu.memory_space<vmem>>, vector<2x96xf32>
    %cst_263 = arith.constant dense<0.000000e+00> : vector<2x96xf32>
    %1161 = tpu.matmul %1105, %15, %cst_263 {dimension_numbers = #tpu.dot_dimension_numbers<[1], [0], [0], [1], [0, 0, 1, 1], [], []>} : vector<2x32xf32>, vector<32x96xf32>, vector<2x96xf32> -> vector<2x96xf32>
    %1162 = vector.broadcast %16 : vector<1x96xf32> to vector<2x96xf32>
    %1163 = arith.addf %1161, %1162 : vector<2x96xf32>
    %1164 = vector.extract_strided_slice %1160 {offsets = [0, 0], sizes = [2, 32], strides = [1, 1]} : vector<2x96xf32> to vector<2x32xf32>
    %1165 = vector.extract_strided_slice %1163 {offsets = [0, 0], sizes = [2, 32], strides = [1, 1]} : vector<2x96xf32> to vector<2x32xf32>
    %1166 = arith.addf %1164, %1165 : vector<2x32xf32>
    %1167 = arith.negf %1166 : vector<2x32xf32>
    %1168 = math.exp %1167 : vector<2x32xf32>
    %cst_264 = arith.constant 1.000000e+00 : f32
    %1169 = vector.broadcast %cst_264 : f32 to vector<2x32xf32>
    %1170 = arith.addf %1169, %1168 : vector<2x32xf32>
    %1171 = arith.divf %1169, %1170 : vector<2x32xf32>
    %1172 = vector.extract_strided_slice %1160 {offsets = [0, 32], sizes = [2, 32], strides = [1, 1]} : vector<2x96xf32> to vector<2x32xf32>
    %1173 = vector.extract_strided_slice %1163 {offsets = [0, 32], sizes = [2, 32], strides = [1, 1]} : vector<2x96xf32> to vector<2x32xf32>
    %1174 = arith.addf %1172, %1173 : vector<2x32xf32>
    %1175 = arith.negf %1174 : vector<2x32xf32>
    %1176 = math.exp %1175 : vector<2x32xf32>
    %cst_265 = arith.constant 1.000000e+00 : f32
    %1177 = vector.broadcast %cst_265 : f32 to vector<2x32xf32>
    %1178 = arith.addf %1177, %1176 : vector<2x32xf32>
    %1179 = arith.divf %1177, %1178 : vector<2x32xf32>
    %1180 = vector.extract_strided_slice %1160 {offsets = [0, 64], sizes = [2, 32], strides = [1, 1]} : vector<2x96xf32> to vector<2x32xf32>
    %1181 = vector.extract_strided_slice %1163 {offsets = [0, 64], sizes = [2, 32], strides = [1, 1]} : vector<2x96xf32> to vector<2x32xf32>
    %1182 = arith.mulf %1171, %1181 : vector<2x32xf32>
    %1183 = arith.addf %1180, %1182 : vector<2x32xf32>
    %1184 = math.tanh %1183 : vector<2x32xf32>
    %cst_266 = arith.constant 1.000000e+00 : f32
    %1185 = vector.broadcast %cst_266 : f32 to vector<2x32xf32>
    %1186 = arith.subf %1185, %1179 : vector<2x32xf32>
    %1187 = arith.mulf %1186, %1184 : vector<2x32xf32>
    %1188 = arith.mulf %1179, %1105 : vector<2x32xf32>
    %1189 = arith.addf %1187, %1188 : vector<2x32xf32>
    %1190 = vector.broadcast %1158 : vector<2x1xf32> to vector<2x32xf32>
    %1191 = arith.mulf %1190, %1189 : vector<2x32xf32>
    %cst_267 = arith.constant 1.000000e+00 : f32
    %1192 = vector.broadcast %cst_267 : f32 to vector<2x1xf32>
    %1193 = arith.subf %1192, %1158 : vector<2x1xf32>
    %1194 = vector.broadcast %1193 : vector<2x1xf32> to vector<2x32xf32>
    %1195 = arith.mulf %1194, %1105 : vector<2x32xf32>
    %1196 = arith.addf %1191, %1195 : vector<2x32xf32>
    %1197 = vector.broadcast %1158 : vector<2x1xf32> to vector<2x32xf32>
    %1198 = arith.mulf %1197, %1196 : vector<2x32xf32>
    %1199 = arith.index_cast %1112 : i32 to index
    %c0_268 = arith.constant 0 : index
    %1200 = vector.load %arg18[%1199, %c0_268] : memref<32x32xf32, #tpu.memory_space<vmem>>, vector<2x32xf32>
    tpu.vector_store %arg18[%1199, %c0_268], %1198 {strides = array<i32>} : memref<32x32xf32, #tpu.memory_space<vmem>>, vector<2x32xf32>,
    %c13_i32 = arith.constant 13 : i32
    %c2_i32_269 = arith.constant 2 : i32
    %1201 = arith.muli %c13_i32, %c2_i32_269 : i32
    %c15_i32_270 = arith.constant 15 : i32
    %1202 = arith.subi %c15_i32_270, %c13_i32 : i32
    %c2_i32_271 = arith.constant 2 : i32
    %1203 = arith.muli %1202, %c2_i32_271 : i32
    %1204 = arith.index_cast %1201 : i32 to index
    %c0_272 = arith.constant 0 : index
    %1205 = vector.load %arg1[%1204, %c0_272] : memref<32x1xf32, #tpu.memory_space<vmem>>, vector<2x1xf32>
    %1206 = arith.index_cast %1201 : i32 to index
    %c0_273 = arith.constant 0 : index
    %1207 = vector.load %arg15[%1206, %c0_273] : memref<32x96xf32, #tpu.memory_space<vmem>>, vector<2x96xf32>
    %cst_274 = arith.constant dense<0.000000e+00> : vector<2x96xf32>
    %1208 = tpu.matmul %1152, %13, %cst_274 {dimension_numbers = #tpu.dot_dimension_numbers<[1], [0], [0], [1], [0, 0, 1, 1], [], []>} : vector<2x32xf32>, vector<32x96xf32>, vector<2x96xf32> -> vector<2x96xf32>
    %1209 = vector.broadcast %14 : vector<1x96xf32> to vector<2x96xf32>
    %1210 = arith.addf %1208, %1209 : vector<2x96xf32>
    %1211 = vector.extract_strided_slice %1207 {offsets = [0, 0], sizes = [2, 32], strides = [1, 1]} : vector<2x96xf32> to vector<2x32xf32>
    %1212 = vector.extract_strided_slice %1210 {offsets = [0, 0], sizes = [2, 32], strides = [1, 1]} : vector<2x96xf32> to vector<2x32xf32>
    %1213 = arith.addf %1211, %1212 : vector<2x32xf32>
    %1214 = arith.negf %1213 : vector<2x32xf32>
    %1215 = math.exp %1214 : vector<2x32xf32>
    %cst_275 = arith.constant 1.000000e+00 : f32
    %1216 = vector.broadcast %cst_275 : f32 to vector<2x32xf32>
    %1217 = arith.addf %1216, %1215 : vector<2x32xf32>
    %1218 = arith.divf %1216, %1217 : vector<2x32xf32>
    %1219 = vector.extract_strided_slice %1207 {offsets = [0, 32], sizes = [2, 32], strides = [1, 1]} : vector<2x96xf32> to vector<2x32xf32>
    %1220 = vector.extract_strided_slice %1210 {offsets = [0, 32], sizes = [2, 32], strides = [1, 1]} : vector<2x96xf32> to vector<2x32xf32>
    %1221 = arith.addf %1219, %1220 : vector<2x32xf32>
    %1222 = arith.negf %1221 : vector<2x32xf32>
    %1223 = math.exp %1222 : vector<2x32xf32>
    %cst_276 = arith.constant 1.000000e+00 : f32
    %1224 = vector.broadcast %cst_276 : f32 to vector<2x32xf32>
    %1225 = arith.addf %1224, %1223 : vector<2x32xf32>
    %1226 = arith.divf %1224, %1225 : vector<2x32xf32>
    %1227 = vector.extract_strided_slice %1207 {offsets = [0, 64], sizes = [2, 32], strides = [1, 1]} : vector<2x96xf32> to vector<2x32xf32>
    %1228 = vector.extract_strided_slice %1210 {offsets = [0, 64], sizes = [2, 32], strides = [1, 1]} : vector<2x96xf32> to vector<2x32xf32>
    %1229 = arith.mulf %1218, %1228 : vector<2x32xf32>
    %1230 = arith.addf %1227, %1229 : vector<2x32xf32>
    %1231 = math.tanh %1230 : vector<2x32xf32>
    %cst_277 = arith.constant 1.000000e+00 : f32
    %1232 = vector.broadcast %cst_277 : f32 to vector<2x32xf32>
    %1233 = arith.subf %1232, %1226 : vector<2x32xf32>
    %1234 = arith.mulf %1233, %1231 : vector<2x32xf32>
    %1235 = arith.mulf %1226, %1152 : vector<2x32xf32>
    %1236 = arith.addf %1234, %1235 : vector<2x32xf32>
    %1237 = vector.broadcast %1205 : vector<2x1xf32> to vector<2x32xf32>
    %1238 = arith.mulf %1237, %1236 : vector<2x32xf32>
    %cst_278 = arith.constant 1.000000e+00 : f32
    %1239 = vector.broadcast %cst_278 : f32 to vector<2x1xf32>
    %1240 = arith.subf %1239, %1205 : vector<2x1xf32>
    %1241 = vector.broadcast %1240 : vector<2x1xf32> to vector<2x32xf32>
    %1242 = arith.mulf %1241, %1152 : vector<2x32xf32>
    %1243 = arith.addf %1238, %1242 : vector<2x32xf32>
    %1244 = vector.broadcast %1205 : vector<2x1xf32> to vector<2x32xf32>
    %1245 = arith.mulf %1244, %1243 : vector<2x32xf32>
    %1246 = arith.index_cast %1201 : i32 to index
    %c0_279 = arith.constant 0 : index
    %1247 = vector.load %arg17[%1246, %c0_279] : memref<32x32xf32, #tpu.memory_space<vmem>>, vector<2x32xf32>
    tpu.vector_store %arg17[%1246, %c0_279], %1245 {strides = array<i32>} : memref<32x32xf32, #tpu.memory_space<vmem>>, vector<2x32xf32>,
    %1248 = arith.index_cast %1203 : i32 to index
    %c0_280 = arith.constant 0 : index
    %1249 = vector.load %arg1[%1248, %c0_280] : memref<32x1xf32, #tpu.memory_space<vmem>>, vector<2x1xf32>
    %1250 = arith.index_cast %1203 : i32 to index
    %c0_281 = arith.constant 0 : index
    %1251 = vector.load %arg16[%1250, %c0_281] : memref<32x96xf32, #tpu.memory_space<vmem>>, vector<2x96xf32>
    %cst_282 = arith.constant dense<0.000000e+00> : vector<2x96xf32>
    %1252 = tpu.matmul %1196, %15, %cst_282 {dimension_numbers = #tpu.dot_dimension_numbers<[1], [0], [0], [1], [0, 0, 1, 1], [], []>} : vector<2x32xf32>, vector<32x96xf32>, vector<2x96xf32> -> vector<2x96xf32>
    %1253 = vector.broadcast %16 : vector<1x96xf32> to vector<2x96xf32>
    %1254 = arith.addf %1252, %1253 : vector<2x96xf32>
    %1255 = vector.extract_strided_slice %1251 {offsets = [0, 0], sizes = [2, 32], strides = [1, 1]} : vector<2x96xf32> to vector<2x32xf32>
    %1256 = vector.extract_strided_slice %1254 {offsets = [0, 0], sizes = [2, 32], strides = [1, 1]} : vector<2x96xf32> to vector<2x32xf32>
    %1257 = arith.addf %1255, %1256 : vector<2x32xf32>
    %1258 = arith.negf %1257 : vector<2x32xf32>
    %1259 = math.exp %1258 : vector<2x32xf32>
    %cst_283 = arith.constant 1.000000e+00 : f32
    %1260 = vector.broadcast %cst_283 : f32 to vector<2x32xf32>
    %1261 = arith.addf %1260, %1259 : vector<2x32xf32>
    %1262 = arith.divf %1260, %1261 : vector<2x32xf32>
    %1263 = vector.extract_strided_slice %1251 {offsets = [0, 32], sizes = [2, 32], strides = [1, 1]} : vector<2x96xf32> to vector<2x32xf32>
    %1264 = vector.extract_strided_slice %1254 {offsets = [0, 32], sizes = [2, 32], strides = [1, 1]} : vector<2x96xf32> to vector<2x32xf32>
    %1265 = arith.addf %1263, %1264 : vector<2x32xf32>
    %1266 = arith.negf %1265 : vector<2x32xf32>
    %1267 = math.exp %1266 : vector<2x32xf32>
    %cst_284 = arith.constant 1.000000e+00 : f32
    %1268 = vector.broadcast %cst_284 : f32 to vector<2x32xf32>
    %1269 = arith.addf %1268, %1267 : vector<2x32xf32>
    %1270 = arith.divf %1268, %1269 : vector<2x32xf32>
    %1271 = vector.extract_strided_slice %1251 {offsets = [0, 64], sizes = [2, 32], strides = [1, 1]} : vector<2x96xf32> to vector<2x32xf32>
    %1272 = vector.extract_strided_slice %1254 {offsets = [0, 64], sizes = [2, 32], strides = [1, 1]} : vector<2x96xf32> to vector<2x32xf32>
    %1273 = arith.mulf %1262, %1272 : vector<2x32xf32>
    %1274 = arith.addf %1271, %1273 : vector<2x32xf32>
    %1275 = math.tanh %1274 : vector<2x32xf32>
    %cst_285 = arith.constant 1.000000e+00 : f32
    %1276 = vector.broadcast %cst_285 : f32 to vector<2x32xf32>
    %1277 = arith.subf %1276, %1270 : vector<2x32xf32>
    %1278 = arith.mulf %1277, %1275 : vector<2x32xf32>
    %1279 = arith.mulf %1270, %1196 : vector<2x32xf32>
    %1280 = arith.addf %1278, %1279 : vector<2x32xf32>
    %1281 = vector.broadcast %1249 : vector<2x1xf32> to vector<2x32xf32>
    %1282 = arith.mulf %1281, %1280 : vector<2x32xf32>
    %cst_286 = arith.constant 1.000000e+00 : f32
    %1283 = vector.broadcast %cst_286 : f32 to vector<2x1xf32>
    %1284 = arith.subf %1283, %1249 : vector<2x1xf32>
    %1285 = vector.broadcast %1284 : vector<2x1xf32> to vector<2x32xf32>
    %1286 = arith.mulf %1285, %1196 : vector<2x32xf32>
    %1287 = arith.addf %1282, %1286 : vector<2x32xf32>
    %1288 = vector.broadcast %1249 : vector<2x1xf32> to vector<2x32xf32>
    %1289 = arith.mulf %1288, %1287 : vector<2x32xf32>
    %1290 = arith.index_cast %1203 : i32 to index
    %c0_287 = arith.constant 0 : index
    %1291 = vector.load %arg18[%1290, %c0_287] : memref<32x32xf32, #tpu.memory_space<vmem>>, vector<2x32xf32>
    tpu.vector_store %arg18[%1290, %c0_287], %1289 {strides = array<i32>} : memref<32x32xf32, #tpu.memory_space<vmem>>, vector<2x32xf32>,
    %c14_i32 = arith.constant 14 : i32
    %c2_i32_288 = arith.constant 2 : i32
    %1292 = arith.muli %c14_i32, %c2_i32_288 : i32
    %c15_i32_289 = arith.constant 15 : i32
    %1293 = arith.subi %c15_i32_289, %c14_i32 : i32
    %c2_i32_290 = arith.constant 2 : i32
    %1294 = arith.muli %1293, %c2_i32_290 : i32
    %1295 = arith.index_cast %1292 : i32 to index
    %c0_291 = arith.constant 0 : index
    %1296 = vector.load %arg1[%1295, %c0_291] : memref<32x1xf32, #tpu.memory_space<vmem>>, vector<2x1xf32>
    %1297 = arith.index_cast %1292 : i32 to index
    %c0_292 = arith.constant 0 : index
    %1298 = vector.load %arg15[%1297, %c0_292] : memref<32x96xf32, #tpu.memory_space<vmem>>, vector<2x96xf32>
    %cst_293 = arith.constant dense<0.000000e+00> : vector<2x96xf32>
    %1299 = tpu.matmul %1243, %13, %cst_293 {dimension_numbers = #tpu.dot_dimension_numbers<[1], [0], [0], [1], [0, 0, 1, 1], [], []>} : vector<2x32xf32>, vector<32x96xf32>, vector<2x96xf32> -> vector<2x96xf32>
    %1300 = vector.broadcast %14 : vector<1x96xf32> to vector<2x96xf32>
    %1301 = arith.addf %1299, %1300 : vector<2x96xf32>
    %1302 = vector.extract_strided_slice %1298 {offsets = [0, 0], sizes = [2, 32], strides = [1, 1]} : vector<2x96xf32> to vector<2x32xf32>
    %1303 = vector.extract_strided_slice %1301 {offsets = [0, 0], sizes = [2, 32], strides = [1, 1]} : vector<2x96xf32> to vector<2x32xf32>
    %1304 = arith.addf %1302, %1303 : vector<2x32xf32>
    %1305 = arith.negf %1304 : vector<2x32xf32>
    %1306 = math.exp %1305 : vector<2x32xf32>
    %cst_294 = arith.constant 1.000000e+00 : f32
    %1307 = vector.broadcast %cst_294 : f32 to vector<2x32xf32>
    %1308 = arith.addf %1307, %1306 : vector<2x32xf32>
    %1309 = arith.divf %1307, %1308 : vector<2x32xf32>
    %1310 = vector.extract_strided_slice %1298 {offsets = [0, 32], sizes = [2, 32], strides = [1, 1]} : vector<2x96xf32> to vector<2x32xf32>
    %1311 = vector.extract_strided_slice %1301 {offsets = [0, 32], sizes = [2, 32], strides = [1, 1]} : vector<2x96xf32> to vector<2x32xf32>
    %1312 = arith.addf %1310, %1311 : vector<2x32xf32>
    %1313 = arith.negf %1312 : vector<2x32xf32>
    %1314 = math.exp %1313 : vector<2x32xf32>
    %cst_295 = arith.constant 1.000000e+00 : f32
    %1315 = vector.broadcast %cst_295 : f32 to vector<2x32xf32>
    %1316 = arith.addf %1315, %1314 : vector<2x32xf32>
    %1317 = arith.divf %1315, %1316 : vector<2x32xf32>
    %1318 = vector.extract_strided_slice %1298 {offsets = [0, 64], sizes = [2, 32], strides = [1, 1]} : vector<2x96xf32> to vector<2x32xf32>
    %1319 = vector.extract_strided_slice %1301 {offsets = [0, 64], sizes = [2, 32], strides = [1, 1]} : vector<2x96xf32> to vector<2x32xf32>
    %1320 = arith.mulf %1309, %1319 : vector<2x32xf32>
    %1321 = arith.addf %1318, %1320 : vector<2x32xf32>
    %1322 = math.tanh %1321 : vector<2x32xf32>
    %cst_296 = arith.constant 1.000000e+00 : f32
    %1323 = vector.broadcast %cst_296 : f32 to vector<2x32xf32>
    %1324 = arith.subf %1323, %1317 : vector<2x32xf32>
    %1325 = arith.mulf %1324, %1322 : vector<2x32xf32>
    %1326 = arith.mulf %1317, %1243 : vector<2x32xf32>
    %1327 = arith.addf %1325, %1326 : vector<2x32xf32>
    %1328 = vector.broadcast %1296 : vector<2x1xf32> to vector<2x32xf32>
    %1329 = arith.mulf %1328, %1327 : vector<2x32xf32>
    %cst_297 = arith.constant 1.000000e+00 : f32
    %1330 = vector.broadcast %cst_297 : f32 to vector<2x1xf32>
    %1331 = arith.subf %1330, %1296 : vector<2x1xf32>
    %1332 = vector.broadcast %1331 : vector<2x1xf32> to vector<2x32xf32>
    %1333 = arith.mulf %1332, %1243 : vector<2x32xf32>
    %1334 = arith.addf %1329, %1333 : vector<2x32xf32>
    %1335 = vector.broadcast %1296 : vector<2x1xf32> to vector<2x32xf32>
    %1336 = arith.mulf %1335, %1334 : vector<2x32xf32>
    %1337 = arith.index_cast %1292 : i32 to index
    %c0_298 = arith.constant 0 : index
    %1338 = vector.load %arg17[%1337, %c0_298] : memref<32x32xf32, #tpu.memory_space<vmem>>, vector<2x32xf32>
    tpu.vector_store %arg17[%1337, %c0_298], %1336 {strides = array<i32>} : memref<32x32xf32, #tpu.memory_space<vmem>>, vector<2x32xf32>,
    %1339 = arith.index_cast %1294 : i32 to index
    %c0_299 = arith.constant 0 : index
    %1340 = vector.load %arg1[%1339, %c0_299] : memref<32x1xf32, #tpu.memory_space<vmem>>, vector<2x1xf32>
    %1341 = arith.index_cast %1294 : i32 to index
    %c0_300 = arith.constant 0 : index
    %1342 = vector.load %arg16[%1341, %c0_300] : memref<32x96xf32, #tpu.memory_space<vmem>>, vector<2x96xf32>
    %cst_301 = arith.constant dense<0.000000e+00> : vector<2x96xf32>
    %1343 = tpu.matmul %1287, %15, %cst_301 {dimension_numbers = #tpu.dot_dimension_numbers<[1], [0], [0], [1], [0, 0, 1, 1], [], []>} : vector<2x32xf32>, vector<32x96xf32>, vector<2x96xf32> -> vector<2x96xf32>
    %1344 = vector.broadcast %16 : vector<1x96xf32> to vector<2x96xf32>
    %1345 = arith.addf %1343, %1344 : vector<2x96xf32>
    %1346 = vector.extract_strided_slice %1342 {offsets = [0, 0], sizes = [2, 32], strides = [1, 1]} : vector<2x96xf32> to vector<2x32xf32>
    %1347 = vector.extract_strided_slice %1345 {offsets = [0, 0], sizes = [2, 32], strides = [1, 1]} : vector<2x96xf32> to vector<2x32xf32>
    %1348 = arith.addf %1346, %1347 : vector<2x32xf32>
    %1349 = arith.negf %1348 : vector<2x32xf32>
    %1350 = math.exp %1349 : vector<2x32xf32>
    %cst_302 = arith.constant 1.000000e+00 : f32
    %1351 = vector.broadcast %cst_302 : f32 to vector<2x32xf32>
    %1352 = arith.addf %1351, %1350 : vector<2x32xf32>
    %1353 = arith.divf %1351, %1352 : vector<2x32xf32>
    %1354 = vector.extract_strided_slice %1342 {offsets = [0, 32], sizes = [2, 32], strides = [1, 1]} : vector<2x96xf32> to vector<2x32xf32>
    %1355 = vector.extract_strided_slice %1345 {offsets = [0, 32], sizes = [2, 32], strides = [1, 1]} : vector<2x96xf32> to vector<2x32xf32>
    %1356 = arith.addf %1354, %1355 : vector<2x32xf32>
    %1357 = arith.negf %1356 : vector<2x32xf32>
    %1358 = math.exp %1357 : vector<2x32xf32>
    %cst_303 = arith.constant 1.000000e+00 : f32
    %1359 = vector.broadcast %cst_303 : f32 to vector<2x32xf32>
    %1360 = arith.addf %1359, %1358 : vector<2x32xf32>
    %1361 = arith.divf %1359, %1360 : vector<2x32xf32>
    %1362 = vector.extract_strided_slice %1342 {offsets = [0, 64], sizes = [2, 32], strides = [1, 1]} : vector<2x96xf32> to vector<2x32xf32>
    %1363 = vector.extract_strided_slice %1345 {offsets = [0, 64], sizes = [2, 32], strides = [1, 1]} : vector<2x96xf32> to vector<2x32xf32>
    %1364 = arith.mulf %1353, %1363 : vector<2x32xf32>
    %1365 = arith.addf %1362, %1364 : vector<2x32xf32>
    %1366 = math.tanh %1365 : vector<2x32xf32>
    %cst_304 = arith.constant 1.000000e+00 : f32
    %1367 = vector.broadcast %cst_304 : f32 to vector<2x32xf32>
    %1368 = arith.subf %1367, %1361 : vector<2x32xf32>
    %1369 = arith.mulf %1368, %1366 : vector<2x32xf32>
    %1370 = arith.mulf %1361, %1287 : vector<2x32xf32>
    %1371 = arith.addf %1369, %1370 : vector<2x32xf32>
    %1372 = vector.broadcast %1340 : vector<2x1xf32> to vector<2x32xf32>
    %1373 = arith.mulf %1372, %1371 : vector<2x32xf32>
    %cst_305 = arith.constant 1.000000e+00 : f32
    %1374 = vector.broadcast %cst_305 : f32 to vector<2x1xf32>
    %1375 = arith.subf %1374, %1340 : vector<2x1xf32>
    %1376 = vector.broadcast %1375 : vector<2x1xf32> to vector<2x32xf32>
    %1377 = arith.mulf %1376, %1287 : vector<2x32xf32>
    %1378 = arith.addf %1373, %1377 : vector<2x32xf32>
    %1379 = vector.broadcast %1340 : vector<2x1xf32> to vector<2x32xf32>
    %1380 = arith.mulf %1379, %1378 : vector<2x32xf32>
    %1381 = arith.index_cast %1294 : i32 to index
    %c0_306 = arith.constant 0 : index
    %1382 = vector.load %arg18[%1381, %c0_306] : memref<32x32xf32, #tpu.memory_space<vmem>>, vector<2x32xf32>
    tpu.vector_store %arg18[%1381, %c0_306], %1380 {strides = array<i32>} : memref<32x32xf32, #tpu.memory_space<vmem>>, vector<2x32xf32>,
    %c15_i32_307 = arith.constant 15 : i32
    %c2_i32_308 = arith.constant 2 : i32
    %1383 = arith.muli %c15_i32_307, %c2_i32_308 : i32
    %c15_i32_309 = arith.constant 15 : i32
    %1384 = arith.subi %c15_i32_309, %c15_i32_307 : i32
    %c2_i32_310 = arith.constant 2 : i32
    %1385 = arith.muli %1384, %c2_i32_310 : i32
    %1386 = arith.index_cast %1383 : i32 to index
    %c0_311 = arith.constant 0 : index
    %1387 = vector.load %arg1[%1386, %c0_311] : memref<32x1xf32, #tpu.memory_space<vmem>>, vector<2x1xf32>
    %1388 = arith.index_cast %1383 : i32 to index
    %c0_312 = arith.constant 0 : index
    %1389 = vector.load %arg15[%1388, %c0_312] : memref<32x96xf32, #tpu.memory_space<vmem>>, vector<2x96xf32>
    %cst_313 = arith.constant dense<0.000000e+00> : vector<2x96xf32>
    %1390 = tpu.matmul %1334, %13, %cst_313 {dimension_numbers = #tpu.dot_dimension_numbers<[1], [0], [0], [1], [0, 0, 1, 1], [], []>} : vector<2x32xf32>, vector<32x96xf32>, vector<2x96xf32> -> vector<2x96xf32>
    %1391 = vector.broadcast %14 : vector<1x96xf32> to vector<2x96xf32>
    %1392 = arith.addf %1390, %1391 : vector<2x96xf32>
    %1393 = vector.extract_strided_slice %1389 {offsets = [0, 0], sizes = [2, 32], strides = [1, 1]} : vector<2x96xf32> to vector<2x32xf32>
    %1394 = vector.extract_strided_slice %1392 {offsets = [0, 0], sizes = [2, 32], strides = [1, 1]} : vector<2x96xf32> to vector<2x32xf32>
    %1395 = arith.addf %1393, %1394 : vector<2x32xf32>
    %1396 = arith.negf %1395 : vector<2x32xf32>
    %1397 = math.exp %1396 : vector<2x32xf32>
    %cst_314 = arith.constant 1.000000e+00 : f32
    %1398 = vector.broadcast %cst_314 : f32 to vector<2x32xf32>
    %1399 = arith.addf %1398, %1397 : vector<2x32xf32>
    %1400 = arith.divf %1398, %1399 : vector<2x32xf32>
    %1401 = vector.extract_strided_slice %1389 {offsets = [0, 32], sizes = [2, 32], strides = [1, 1]} : vector<2x96xf32> to vector<2x32xf32>
    %1402 = vector.extract_strided_slice %1392 {offsets = [0, 32], sizes = [2, 32], strides = [1, 1]} : vector<2x96xf32> to vector<2x32xf32>
    %1403 = arith.addf %1401, %1402 : vector<2x32xf32>
    %1404 = arith.negf %1403 : vector<2x32xf32>
    %1405 = math.exp %1404 : vector<2x32xf32>
    %cst_315 = arith.constant 1.000000e+00 : f32
    %1406 = vector.broadcast %cst_315 : f32 to vector<2x32xf32>
    %1407 = arith.addf %1406, %1405 : vector<2x32xf32>
    %1408 = arith.divf %1406, %1407 : vector<2x32xf32>
    %1409 = vector.extract_strided_slice %1389 {offsets = [0, 64], sizes = [2, 32], strides = [1, 1]} : vector<2x96xf32> to vector<2x32xf32>
    %1410 = vector.extract_strided_slice %1392 {offsets = [0, 64], sizes = [2, 32], strides = [1, 1]} : vector<2x96xf32> to vector<2x32xf32>
    %1411 = arith.mulf %1400, %1410 : vector<2x32xf32>
    %1412 = arith.addf %1409, %1411 : vector<2x32xf32>
    %1413 = math.tanh %1412 : vector<2x32xf32>
    %cst_316 = arith.constant 1.000000e+00 : f32
    %1414 = vector.broadcast %cst_316 : f32 to vector<2x32xf32>
    %1415 = arith.subf %1414, %1408 : vector<2x32xf32>
    %1416 = arith.mulf %1415, %1413 : vector<2x32xf32>
    %1417 = arith.mulf %1408, %1334 : vector<2x32xf32>
    %1418 = arith.addf %1416, %1417 : vector<2x32xf32>
    %1419 = vector.broadcast %1387 : vector<2x1xf32> to vector<2x32xf32>
    %1420 = arith.mulf %1419, %1418 : vector<2x32xf32>
    %cst_317 = arith.constant 1.000000e+00 : f32
    %1421 = vector.broadcast %cst_317 : f32 to vector<2x1xf32>
    %1422 = arith.subf %1421, %1387 : vector<2x1xf32>
    %1423 = vector.broadcast %1422 : vector<2x1xf32> to vector<2x32xf32>
    %1424 = arith.mulf %1423, %1334 : vector<2x32xf32>
    %1425 = arith.addf %1420, %1424 : vector<2x32xf32>
    %1426 = vector.broadcast %1387 : vector<2x1xf32> to vector<2x32xf32>
    %1427 = arith.mulf %1426, %1425 : vector<2x32xf32>
    %1428 = arith.index_cast %1383 : i32 to index
    %c0_318 = arith.constant 0 : index
    %1429 = vector.load %arg17[%1428, %c0_318] : memref<32x32xf32, #tpu.memory_space<vmem>>, vector<2x32xf32>
    tpu.vector_store %arg17[%1428, %c0_318], %1427 {strides = array<i32>} : memref<32x32xf32, #tpu.memory_space<vmem>>, vector<2x32xf32>,
    %1430 = arith.index_cast %1385 : i32 to index
    %c0_319 = arith.constant 0 : index
    %1431 = vector.load %arg1[%1430, %c0_319] : memref<32x1xf32, #tpu.memory_space<vmem>>, vector<2x1xf32>
    %1432 = arith.index_cast %1385 : i32 to index
    %c0_320 = arith.constant 0 : index
    %1433 = vector.load %arg16[%1432, %c0_320] : memref<32x96xf32, #tpu.memory_space<vmem>>, vector<2x96xf32>
    %cst_321 = arith.constant dense<0.000000e+00> : vector<2x96xf32>
    %1434 = tpu.matmul %1378, %15, %cst_321 {dimension_numbers = #tpu.dot_dimension_numbers<[1], [0], [0], [1], [0, 0, 1, 1], [], []>} : vector<2x32xf32>, vector<32x96xf32>, vector<2x96xf32> -> vector<2x96xf32>
    %1435 = vector.broadcast %16 : vector<1x96xf32> to vector<2x96xf32>
    %1436 = arith.addf %1434, %1435 : vector<2x96xf32>
    %1437 = vector.extract_strided_slice %1433 {offsets = [0, 0], sizes = [2, 32], strides = [1, 1]} : vector<2x96xf32> to vector<2x32xf32>
    %1438 = vector.extract_strided_slice %1436 {offsets = [0, 0], sizes = [2, 32], strides = [1, 1]} : vector<2x96xf32> to vector<2x32xf32>
    %1439 = arith.addf %1437, %1438 : vector<2x32xf32>
    %1440 = arith.negf %1439 : vector<2x32xf32>
    %1441 = math.exp %1440 : vector<2x32xf32>
    %cst_322 = arith.constant 1.000000e+00 : f32
    %1442 = vector.broadcast %cst_322 : f32 to vector<2x32xf32>
    %1443 = arith.addf %1442, %1441 : vector<2x32xf32>
    %1444 = arith.divf %1442, %1443 : vector<2x32xf32>
    %1445 = vector.extract_strided_slice %1433 {offsets = [0, 32], sizes = [2, 32], strides = [1, 1]} : vector<2x96xf32> to vector<2x32xf32>
    %1446 = vector.extract_strided_slice %1436 {offsets = [0, 32], sizes = [2, 32], strides = [1, 1]} : vector<2x96xf32> to vector<2x32xf32>
    %1447 = arith.addf %1445, %1446 : vector<2x32xf32>
    %1448 = arith.negf %1447 : vector<2x32xf32>
    %1449 = math.exp %1448 : vector<2x32xf32>
    %cst_323 = arith.constant 1.000000e+00 : f32
    %1450 = vector.broadcast %cst_323 : f32 to vector<2x32xf32>
    %1451 = arith.addf %1450, %1449 : vector<2x32xf32>
    %1452 = arith.divf %1450, %1451 : vector<2x32xf32>
    %1453 = vector.extract_strided_slice %1433 {offsets = [0, 64], sizes = [2, 32], strides = [1, 1]} : vector<2x96xf32> to vector<2x32xf32>
    %1454 = vector.extract_strided_slice %1436 {offsets = [0, 64], sizes = [2, 32], strides = [1, 1]} : vector<2x96xf32> to vector<2x32xf32>
    %1455 = arith.mulf %1444, %1454 : vector<2x32xf32>
    %1456 = arith.addf %1453, %1455 : vector<2x32xf32>
    %1457 = math.tanh %1456 : vector<2x32xf32>
    %cst_324 = arith.constant 1.000000e+00 : f32
    %1458 = vector.broadcast %cst_324 : f32 to vector<2x32xf32>
    %1459 = arith.subf %1458, %1452 : vector<2x32xf32>
    %1460 = arith.mulf %1459, %1457 : vector<2x32xf32>
    %1461 = arith.mulf %1452, %1378 : vector<2x32xf32>
    %1462 = arith.addf %1460, %1461 : vector<2x32xf32>
    %1463 = vector.broadcast %1431 : vector<2x1xf32> to vector<2x32xf32>
    %1464 = arith.mulf %1463, %1462 : vector<2x32xf32>
    %cst_325 = arith.constant 1.000000e+00 : f32
    %1465 = vector.broadcast %cst_325 : f32 to vector<2x1xf32>
    %1466 = arith.subf %1465, %1431 : vector<2x1xf32>
    %1467 = vector.broadcast %1466 : vector<2x1xf32> to vector<2x32xf32>
    %1468 = arith.mulf %1467, %1378 : vector<2x32xf32>
    %1469 = arith.addf %1464, %1468 : vector<2x32xf32>
    %1470 = vector.broadcast %1431 : vector<2x1xf32> to vector<2x32xf32>
    %1471 = arith.mulf %1470, %1469 : vector<2x32xf32>
    %1472 = arith.index_cast %1385 : i32 to index
    %c0_326 = arith.constant 0 : index
    %1473 = vector.load %arg18[%1472, %c0_326] : memref<32x32xf32, #tpu.memory_space<vmem>>, vector<2x32xf32>
    tpu.vector_store %arg18[%1472, %c0_326], %1471 {strides = array<i32>} : memref<32x32xf32, #tpu.memory_space<vmem>>, vector<2x32xf32>,
    %c16_i32 = arith.constant 16 : i32
    %c0_327 = arith.constant 0 : index
    %c0_328 = arith.constant 0 : index
    %1474 = vector.load %arg17[%c0_327, %c0_328] : memref<32x32xf32, #tpu.memory_space<vmem>>, vector<32x32xf32>
    %c0_329 = arith.constant 0 : index
    %c0_330 = arith.constant 0 : index
    %1475 = vector.load %arg18[%c0_329, %c0_330] : memref<32x32xf32, #tpu.memory_space<vmem>>, vector<32x32xf32>
    %1476 = tpu.concatenate %1474, %1475 in 1 : vector<32x32xf32>, vector<32x32xf32> -> vector<32x64xf32>
    %c0_331 = arith.constant 0 : index
    %c0_332 = arith.constant 0 : index
    %1477 = vector.load %arg10[%c0_331, %c0_332] : memref<64x32xf32, #tpu.memory_space<vmem>>, vector<64x32xf32>
    %cst_333 = arith.constant dense<0.000000e+00> : vector<32x32xf32>
    %1478 = tpu.matmul %1476, %1477, %cst_333 {dimension_numbers = #tpu.dot_dimension_numbers<[1], [0], [0], [1], [0, 0, 1, 1], [], []>} : vector<32x64xf32>, vector<64x32xf32>, vector<32x32xf32> -> vector<32x32xf32>
    %c0_334 = arith.constant 0 : index
    %c0_335 = arith.constant 0 : index
    %1479 = vector.load %arg11[%c0_334, %c0_335] : memref<1x32xf32, #tpu.memory_space<vmem>>, vector<1x32xf32>
    %1480 = vector.broadcast %1479 : vector<1x32xf32> to vector<32x32xf32>
    %1481 = arith.addf %1478, %1480 : vector<32x32xf32>
    %1482 = math.tanh %1481 : vector<32x32xf32>
    %c0_336 = arith.constant 0 : index
    %c0_337 = arith.constant 0 : index
    %1483 = vector.load %arg12[%c0_336, %c0_337] : memref<32x8xf32, #tpu.memory_space<vmem>>, vector<32x8xf32>
    %cst_338 = arith.constant dense<0.000000e+00> : vector<32x8xf32>
    %1484 = tpu.matmul %1482, %1483, %cst_338 {dimension_numbers = #tpu.dot_dimension_numbers<[1], [0], [0], [1], [0, 0, 1, 1], [], []>} : vector<32x32xf32>, vector<32x8xf32>, vector<32x8xf32> -> vector<32x8xf32>
    %c0_339 = arith.constant 0 : index
    %c0_340 = arith.constant 0 : index
    %1485 = vector.load %arg19[%c0_339, %c0_340] : memref<32x8xf32, #tpu.memory_space<vmem>>, vector<32x8xf32>
    tpu.vector_store %arg19[%c0_339, %c0_340], %1484 {strides = array<i32>} : memref<32x8xf32, #tpu.memory_space<vmem>>, vector<32x8xf32>,
    %c0_341 = arith.constant 0 : index
    %c0_342 = arith.constant 0 : index
    %1486 = vector.load %arg13[%c0_341, %c0_342] : memref<8x64xf32, #tpu.memory_space<vmem>>, vector<8x64xf32>
    %c0_343 = arith.constant 0 : index
    %c0_344 = arith.constant 0 : index
    %1487 = tpu.strided_load %arg17[%c0_343, %c0_344] {strides = array<i32: 2, 1>} : memref<32x32xf32, #tpu.memory_space<vmem>>, vector<16x32xf32>
    %c0_345 = arith.constant 0 : index
    %c0_346 = arith.constant 0 : index
    %1488 = tpu.strided_load %arg18[%c0_345, %c0_346] {strides = array<i32: 2, 1>} : memref<32x32xf32, #tpu.memory_space<vmem>>, vector<16x32xf32>
    %1489 = tpu.concatenate %1487, %1488 in 1 : vector<16x32xf32>, vector<16x32xf32> -> vector<16x64xf32>
    %c0_347 = arith.constant 0 : index
    %c0_348 = arith.constant 0 : index
    %1490 = tpu.strided_load %arg19[%c0_347, %c0_348] {strides = array<i32: 2, 1>} : memref<32x8xf32, #tpu.memory_space<vmem>>, vector<16x8xf32>
    %cst_349 = arith.constant dense<0xFF800000> : vector<8xf32>
    %1491 = vector.multi_reduction <maximumf>, %1490, %cst_349 [0] : vector<16x8xf32> to vector<8xf32>
    %1492 = vector.shape_cast %1491 : vector<8xf32> to vector<1x8xf32>
    %1493 = vector.broadcast %1492 : vector<1x8xf32> to vector<16x8xf32>
    %1494 = arith.subf %1490, %1493 : vector<16x8xf32>
    %1495 = math.exp %1494 : vector<16x8xf32>
    %cst_350 = arith.constant dense<0.000000e+00> : vector<8xf32>
    %1496 = vector.multi_reduction <add>, %1495, %cst_350 [0] : vector<16x8xf32> to vector<8xf32>
    %1497 = vector.shape_cast %1496 : vector<8xf32> to vector<1x8xf32>
    %1498 = tpu.reciprocal %1497 {approx = true} : vector<1x8xf32> -> vector<1x8xf32>
    %1499 = vector.broadcast %1498 : vector<1x8xf32> to vector<16x8xf32>
    %1500 = arith.mulf %1495, %1499 : vector<16x8xf32>
    %cst_351 = arith.constant dense<0.000000e+00> : vector<8x64xf32>
    %1501 = tpu.matmul %1500, %1489, %cst_351 {dimension_numbers = #tpu.dot_dimension_numbers<[0], [0], [1], [1], [0, 1, 1, 1], [], []>} : vector<16x8xf32>, vector<16x64xf32>, vector<8x64xf32> -> vector<8x64xf32>
    %1502 = arith.mulf %1501, %1501 : vector<8x64xf32>
    %cst_352 = arith.constant dense<0.000000e+00> : vector<8xf32>
    %1503 = vector.multi_reduction <add>, %1502, %cst_352 [1] : vector<8x64xf32> to vector<8xf32>
    %1504 = vector.shape_cast %1503 : vector<8xf32> to vector<8x1xf32>
    %cst_353 = arith.constant 1.000000e-24 : f32
    %1505 = vector.broadcast %cst_353 : f32 to vector<8x1xf32>
    %1506 = arith.maximumf %1504, %1505 : vector<8x1xf32>
    %1507 = math.rsqrt %1506 : vector<8x1xf32>
    %1508 = vector.broadcast %1507 : vector<8x1xf32> to vector<8x64xf32>
    %1509 = arith.mulf %1501, %1508 : vector<8x64xf32>
    %cst_354 = arith.constant dense<0.000000e+00> : vector<8x16xf32>
    %1510 = tpu.matmul %1486, %1489, %cst_354 {dimension_numbers = #tpu.dot_dimension_numbers<[1], [1], [0], [0], [0, 0, 1, 0], [], []>} : vector<8x64xf32>, vector<16x64xf32>, vector<8x16xf32> -> vector<8x16xf32>
    %cst_355 = arith.constant dense<0xFF800000> : vector<8xf32>
    %1511 = vector.multi_reduction <maximumf>, %1510, %cst_355 [1] : vector<8x16xf32> to vector<8xf32>
    %1512 = vector.shape_cast %1511 : vector<8xf32> to vector<8x1xf32>
    %1513 = vector.broadcast %1512 : vector<8x1xf32> to vector<8x16xf32>
    %1514 = arith.subf %1510, %1513 : vector<8x16xf32>
    %1515 = math.exp %1514 : vector<8x16xf32>
    %cst_356 = arith.constant dense<0.000000e+00> : vector<8xf32>
    %1516 = vector.multi_reduction <add>, %1515, %cst_356 [1] : vector<8x16xf32> to vector<8xf32>
    %1517 = vector.shape_cast %1516 : vector<8xf32> to vector<8x1xf32>
    %1518 = tpu.reciprocal %1517 {approx = true} : vector<8x1xf32> -> vector<8x1xf32>
    %1519 = vector.broadcast %1518 : vector<8x1xf32> to vector<8x16xf32>
    %1520 = arith.mulf %1515, %1519 : vector<8x16xf32>
    %cst_357 = arith.constant dense<0.000000e+00> : vector<8x64xf32>
    %1521 = tpu.matmul %1520, %1489, %cst_357 {dimension_numbers = #tpu.dot_dimension_numbers<[1], [0], [0], [1], [0, 0, 1, 1], [], []>} : vector<8x16xf32>, vector<16x64xf32>, vector<8x64xf32> -> vector<8x64xf32>
    %1522 = arith.mulf %1521, %1521 : vector<8x64xf32>
    %cst_358 = arith.constant dense<0.000000e+00> : vector<8xf32>
    %1523 = vector.multi_reduction <add>, %1522, %cst_358 [1] : vector<8x64xf32> to vector<8xf32>
    %1524 = vector.shape_cast %1523 : vector<8xf32> to vector<8x1xf32>
    %cst_359 = arith.constant 1.000000e-24 : f32
    %1525 = vector.broadcast %cst_359 : f32 to vector<8x1xf32>
    %1526 = arith.maximumf %1524, %1525 : vector<8x1xf32>
    %1527 = math.rsqrt %1526 : vector<8x1xf32>
    %1528 = vector.broadcast %1527 : vector<8x1xf32> to vector<8x64xf32>
    %1529 = arith.mulf %1521, %1528 : vector<8x64xf32>
    %1530 = tpu.concatenate %1509, %1529 in 1 : vector<8x64xf32>, vector<8x64xf32> -> vector<8x128xf32>
    %c0_360 = arith.constant 0 : index
    %c0_361 = arith.constant 0 : index
    %c0_362 = arith.constant 0 : index
    %1531 = vector.load %arg14[%c0_360, %c0_361, %c0_362] : memref<2x8x128xf32, #tpu.memory_space<vmem>>, vector<1x8x128xf32>
    %1532 = vector.shape_cast %1531 : vector<1x8x128xf32> to vector<8x128xf32>
    %1533 = vector.shape_cast %1530 : vector<8x128xf32> to vector<1x8x128xf32>
    tpu.vector_store %arg14[%c0_360, %c0_361, %c0_362], %1533 {strides = array<i32>} : memref<2x8x128xf32, #tpu.memory_space<vmem>>, vector<1x8x128xf32>,
    %c1 = arith.constant 1 : index
    %c0_363 = arith.constant 0 : index
    %1534 = tpu.strided_load %arg17[%c1, %c0_363] {strides = array<i32: 2, 1>} : memref<32x32xf32, #tpu.memory_space<vmem>>, vector<16x32xf32>
    %c1_364 = arith.constant 1 : index
    %c0_365 = arith.constant 0 : index
    %1535 = tpu.strided_load %arg18[%c1_364, %c0_365] {strides = array<i32: 2, 1>} : memref<32x32xf32, #tpu.memory_space<vmem>>, vector<16x32xf32>
    %1536 = tpu.concatenate %1534, %1535 in 1 : vector<16x32xf32>, vector<16x32xf32> -> vector<16x64xf32>
    %c1_366 = arith.constant 1 : index
    %c0_367 = arith.constant 0 : index
    %1537 = tpu.strided_load %arg19[%c1_366, %c0_367] {strides = array<i32: 2, 1>} : memref<32x8xf32, #tpu.memory_space<vmem>>, vector<16x8xf32>
    %cst_368 = arith.constant dense<0xFF800000> : vector<8xf32>
    %1538 = vector.multi_reduction <maximumf>, %1537, %cst_368 [0] : vector<16x8xf32> to vector<8xf32>
    %1539 = vector.shape_cast %1538 : vector<8xf32> to vector<1x8xf32>
    %1540 = vector.broadcast %1539 : vector<1x8xf32> to vector<16x8xf32>
    %1541 = arith.subf %1537, %1540 : vector<16x8xf32>
    %1542 = math.exp %1541 : vector<16x8xf32>
    %cst_369 = arith.constant dense<0.000000e+00> : vector<8xf32>
    %1543 = vector.multi_reduction <add>, %1542, %cst_369 [0] : vector<16x8xf32> to vector<8xf32>
    %1544 = vector.shape_cast %1543 : vector<8xf32> to vector<1x8xf32>
    %1545 = tpu.reciprocal %1544 {approx = true} : vector<1x8xf32> -> vector<1x8xf32>
    %1546 = vector.broadcast %1545 : vector<1x8xf32> to vector<16x8xf32>
    %1547 = arith.mulf %1542, %1546 : vector<16x8xf32>
    %cst_370 = arith.constant dense<0.000000e+00> : vector<8x64xf32>
    %1548 = tpu.matmul %1547, %1536, %cst_370 {dimension_numbers = #tpu.dot_dimension_numbers<[0], [0], [1], [1], [0, 1, 1, 1], [], []>} : vector<16x8xf32>, vector<16x64xf32>, vector<8x64xf32> -> vector<8x64xf32>
    %1549 = arith.mulf %1548, %1548 : vector<8x64xf32>
    %cst_371 = arith.constant dense<0.000000e+00> : vector<8xf32>
    %1550 = vector.multi_reduction <add>, %1549, %cst_371 [1] : vector<8x64xf32> to vector<8xf32>
    %1551 = vector.shape_cast %1550 : vector<8xf32> to vector<8x1xf32>
    %cst_372 = arith.constant 1.000000e-24 : f32
    %1552 = vector.broadcast %cst_372 : f32 to vector<8x1xf32>
    %1553 = arith.maximumf %1551, %1552 : vector<8x1xf32>
    %1554 = math.rsqrt %1553 : vector<8x1xf32>
    %1555 = vector.broadcast %1554 : vector<8x1xf32> to vector<8x64xf32>
    %1556 = arith.mulf %1548, %1555 : vector<8x64xf32>
    %cst_373 = arith.constant dense<0.000000e+00> : vector<8x16xf32>
    %1557 = tpu.matmul %1486, %1536, %cst_373 {dimension_numbers = #tpu.dot_dimension_numbers<[1], [1], [0], [0], [0, 0, 1, 0], [], []>} : vector<8x64xf32>, vector<16x64xf32>, vector<8x16xf32> -> vector<8x16xf32>
    %cst_374 = arith.constant dense<0xFF800000> : vector<8xf32>
    %1558 = vector.multi_reduction <maximumf>, %1557, %cst_374 [1] : vector<8x16xf32> to vector<8xf32>
    %1559 = vector.shape_cast %1558 : vector<8xf32> to vector<8x1xf32>
    %1560 = vector.broadcast %1559 : vector<8x1xf32> to vector<8x16xf32>
    %1561 = arith.subf %1557, %1560 : vector<8x16xf32>
    %1562 = math.exp %1561 : vector<8x16xf32>
    %cst_375 = arith.constant dense<0.000000e+00> : vector<8xf32>
    %1563 = vector.multi_reduction <add>, %1562, %cst_375 [1] : vector<8x16xf32> to vector<8xf32>
    %1564 = vector.shape_cast %1563 : vector<8xf32> to vector<8x1xf32>
    %1565 = tpu.reciprocal %1564 {approx = true} : vector<8x1xf32> -> vector<8x1xf32>
    %1566 = vector.broadcast %1565 : vector<8x1xf32> to vector<8x16xf32>
    %1567 = arith.mulf %1562, %1566 : vector<8x16xf32>
    %cst_376 = arith.constant dense<0.000000e+00> : vector<8x64xf32>
    %1568 = tpu.matmul %1567, %1536, %cst_376 {dimension_numbers = #tpu.dot_dimension_numbers<[1], [0], [0], [1], [0, 0, 1, 1], [], []>} : vector<8x16xf32>, vector<16x64xf32>, vector<8x64xf32> -> vector<8x64xf32>
    %1569 = arith.mulf %1568, %1568 : vector<8x64xf32>
    %cst_377 = arith.constant dense<0.000000e+00> : vector<8xf32>
    %1570 = vector.multi_reduction <add>, %1569, %cst_377 [1] : vector<8x64xf32> to vector<8xf32>
    %1571 = vector.shape_cast %1570 : vector<8xf32> to vector<8x1xf32>
    %cst_378 = arith.constant 1.000000e-24 : f32
    %1572 = vector.broadcast %cst_378 : f32 to vector<8x1xf32>
    %1573 = arith.maximumf %1571, %1572 : vector<8x1xf32>
    %1574 = math.rsqrt %1573 : vector<8x1xf32>
    %1575 = vector.broadcast %1574 : vector<8x1xf32> to vector<8x64xf32>
    %1576 = arith.mulf %1568, %1575 : vector<8x64xf32>
    %1577 = tpu.concatenate %1556, %1576 in 1 : vector<8x64xf32>, vector<8x64xf32> -> vector<8x128xf32>
    %c1_379 = arith.constant 1 : index
    %c0_380 = arith.constant 0 : index
    %c0_381 = arith.constant 0 : index
    %1578 = vector.load %arg14[%c1_379, %c0_380, %c0_381] : memref<2x8x128xf32, #tpu.memory_space<vmem>>, vector<1x8x128xf32>
    %1579 = vector.shape_cast %1578 : vector<1x8x128xf32> to vector<8x128xf32>
    %1580 = vector.shape_cast %1577 : vector<8x128xf32> to vector<1x8x128xf32>
    tpu.vector_store %arg14[%c1_379, %c0_380, %c0_381], %1580 {strides = array<i32>} : memref<2x8x128xf32, #tpu.memory_space<vmem>>, vector<1x8x128xf32>,
    return
  }
}

</mosaic_0001>

<bundles_post_ra>
// kernel: hybrid_rnn_forward.1
= control target key start
LH: loop header
LB: loop body
LE: loop exit
PB: predicated region body
PF: predicated region fallthrough
CT: control target
= control target key end

     0   :  { %19 = vsyncpa [#allocation8], 0  ;;  %s7794_s0 = inlined_call_operand.vmem [shape: f32[32,32], index: 0, kind: input, shape index: {}]   ;;  %s7795_s1 = inlined_call_operand.vmem [shape: f32[32,1], index: 1, kind: input, shape index: {}]   ;;  %s7796_s2 = inlined_call_operand.hbm [shape: f32[32,96], index: 2, kind: input, shape index: {}]   ;;  %s7797_s3 = inlined_call_operand.hbm [shape: f32[32,96], index: 3, kind: input, shape index: {}]   ;;  %s7798_s4 = inlined_call_operand.vmem [shape: f32[1,96], index: 4, kind: input, shape index: {}]   ;;  %s7799_s5 = inlined_call_operand.vmem [shape: f32[1,96], index: 5, kind: input, shape index: {}]   ;;  %s7800_s6 = inlined_call_operand.hbm [shape: f32[32,96], index: 6, kind: input, shape index: {}]   ;;  %s7801_s7 = inlined_call_operand.vmem [shape: f32[32,96], index: 7, kind: input, shape index: {}]   ;;  %s7802_s8 = inlined_call_operand.vmem [shape: f32[1,96], index: 8, kind: input, shape index: {}]   ;;  %s7803_s9 = inlined_call_operand.vmem [shape: f32[1,96], index: 9, kind: input, shape index: {}]   ;;  %s7804_s10 = inlined_call_operand.vmem [shape: f32[64,32], index: 10, kind: input, shape index: {}]   ;;  %s7805_s11 = inlined_call_operand.vmem [shape: f32[1,32], index: 11, kind: input, shape index: {}]   ;;  %s7806_s12 = inlined_call_operand.vmem [shape: f32[32,8], index: 12, kind: input, shape index: {}]   ;;  %s7807_s13 = inlined_call_operand.vmem [shape: f32[8,64], index: 13, kind: input, shape index: {}]   ;;  %s7808_s14 = inlined_call_operand.hbm [shape: f32[2,8,128], index: 14, kind: output, shape index: {}]  }
   0x1   :  { %20 = vsyncpa [#allocation11], 0 }
   0x2   :  { %21 = vsyncpa [#allocation9], 0  ;;  %s6567_s29 = smov [#allocation10]   ;;  %s6568_s15 = smov [#allocation7]  }
   0x3   :  { %s43_s30 = sshll.u32 %s6567_s29, 4  ;;  %s31_s16 = sshll.u32 %s6568_s15, 4  ;;  %s44_s30 = int_to_ptr.vmem [resolvable:$true] %s43_s30  ;;  %s6655_s16 = int_to_ptr.vmem [resolvable:$true] %s31_s16 }
   0x4   :  { %s6473_s19 = scalar_lea.hbm %s7797_s3, 512 }
   0x5   :  { %p6474_p0 = scmp.ne.s32.totalorder %s7797_s3, %s6473_s19  ;;  %p6477_p1 = scmp.lt.u32.totalorder %s6473_s19, %s7797_s3 }
   0x7   :  { %p6479_p2 = pnand %p6477_p1, %p6474_p0 }
   0x9   :  { %6482 = shalt.err (!%p6479_p2)
}
   0xa   :  { %s6483_s24 = scalar_lea.vmem %s44_s30, 512  ;;  %p6488_p4 = scmp.lt.s32.totalorder %s44_s30, %s44_s30 }
   0xb   :  { %p6484_p3 = scmp.ne.s32.totalorder %s44_s30, %s6483_s24  ;;  %p6489_p5 = scmp.lt.s32.totalorder %s6483_s24, %s6483_s24 }
   0xd   :  { %p6490_p6 = por %p6489_p5, %p6488_p4 }
   0xf   :  { %p6491_p7 = pnand %p6490_p6, %p6484_p3 }
  0x11   :  { %6494 = shalt.err (!%p6491_p7)
}
  0x12   :  { %s6569_s25 = smov 128   ;;  %s6570_s26 = smov 8  }
  0x13   :  { %49 = dma.hbm_to_vmem [thread:$0]  %s7797_s3, 512, %s44_s30, [#allocation11], %s6569_s25, %s6569_s25, %s6570_s26  }
  0x14   :  { %s6495_s17 = scalar_lea.hbm %s7796_s2, 512 }
  0x15   :  { %p6496_p8 = scmp.ne.s32.totalorder %s7796_s2, %s6495_s17  ;;  %p6499_p9 = scmp.lt.u32.totalorder %s6495_s17, %s7796_s2 }
  0x17   :  { %p6501_p10 = pnand %p6499_p9, %p6496_p8 }
  0x19   :  { %6504 = shalt.err (!%p6501_p10)
}
  0x1a   :  { %s6505_s22 = scalar_lea.vmem %s6655_s16, 512  ;;  %p6510_p12 = scmp.lt.s32.totalorder %s6655_s16, %s6655_s16 }
  0x1b   :  { %p6506_p11 = scmp.ne.s32.totalorder %s6655_s16, %s6505_s22  ;;  %p6511_p13 = scmp.lt.s32.totalorder %s6505_s22, %s6505_s22 }
  0x1d   :  { %p6512_p0 = por %p6511_p13, %p6510_p12 }
  0x1f   :  { %p6513_p1 = pnand %p6512_p0, %p6506_p11 }
  0x21   :  { %6516 = shalt.err (!%p6513_p1)
}
  0x22   :  { %37 = dma.hbm_to_vmem [thread:$0]  %s7796_s2, 512, %s6655_s16, [#allocation8], %s6569_s25, %s6569_s25, %s6570_s26  }
  0x23   :  { %s6571_s23 = smov [#allocation12]   ;;  %s6517_s29 = scalar_lea.hbm %s7800_s6, 512 }
  0x24   :  { %s59_s24 = sshll.u32 %s6571_s23, 4  ;;  %p6518_p2 = scmp.ne.s32.totalorder %s7800_s6, %s6517_s29  ;;  %s60_s24 = int_to_ptr.vmem [resolvable:$true] %s59_s24 }
  0x25   :  { %p6521_p3 = scmp.lt.u32.totalorder %s6517_s29, %s7800_s6 }
  0x27   :  { %p6523_p4 = pnand %p6521_p3, %p6518_p2 }
  0x29   :  { %6526 = shalt.err (!%p6523_p4)
}
  0x2a   :  { %s6527_s20 = scalar_lea.vmem %s60_s24, 512  ;;  %p6532_p6 = scmp.lt.s32.totalorder %s60_s24, %s60_s24 }
  0x2b   :  { %p6528_p5 = scmp.ne.s32.totalorder %s60_s24, %s6527_s20  ;;  %p6533_p7 = scmp.lt.s32.totalorder %s6527_s20, %s6527_s20 }
  0x2d   :  { %p6534_p8 = por %p6533_p7, %p6532_p6 }
  0x2f   :  { %p6535_p9 = pnand %p6534_p8, %p6528_p5 }
  0x31   :  { %6538 = shalt.err (!%p6535_p9)
}
  0x32   :  { %65 = dma.hbm_to_vmem [thread:$0]  %s7800_s6, 512, %s60_s24, [#allocation11], %s6569_s25, %s6569_s25, %s6570_s26  }
  0x33   :  { %6561 = dma.done.wait [#allocation8], 512  }
  0x34   :  { %6562 = vsyncadd [#allocation8], 4294966784 }
  0x35   :  { %6563 = dma.done.wait [#allocation11], 1024  }
  0x36   :  { %6564 = vsyncadd [#allocation11], 4294966272  ;;  %v93_v0 = vld [vmem:[#allocation7] sm:$0xff]  ;;  %v94_v1 = vld [vmem:[#allocation7 + $0x8] sm:$0xff]  ;;  %vm104_vm0 = vcmask 261120   ;;  %v7809_v19 = vmov 0.0|0.0  }
  0x37   :  { %v207_v2 = vld [vmem:[#allocation12] sm:$0xff]  ;;  %v5964_v3 = vpack.c.bf16 %v94_v1, %v93_v0  ;;  %v208_v4 = vld [vmem:[#allocation12 + $0x8] sm:$0xff]  ;;  %v95_v5 = vld [vmem:[#allocation7 + $0x10] sm:$0xff]  ;;  %vm6573_vm1 = vmmov 0   ;;  %v7811_v29 = vmov 0.0   ;;  %vm202_vm2 = vcmask 785408  }
  0x38   :  { %v96_v6 = vld [vmem:[#allocation7 + $0x18] sm:$0xff]  ;;  %v5972_v7 = vpack.c.bf16 %v208_v4, %v207_v2  ;;  %v209_v9 = vld [vmem:[#allocation12 + $0x10] sm:$0xff]  ;;  %v89_v11 = vld [vmem:[%s7794_s0] sm:$0xff]  ;;  %v6575_v39 = vmov 0   ;;  %s6576_s3 = smov 64   ;;  %s6577_s28 = smov 96  }
  0x39   :  { %v5968_v8 = vpack.c.bf16 %v96_v6, %v95_v5  ;;  %v210_v10 = vld [vmem:[#allocation12 + $0x18] sm:$0xff]  ;;  %5965 = vmatprep.subr.bf16.mxu0 %v5964_v3  ;;  %5514 = vmatprep.mubr.msk.f32.mxu0 %vm104_vm0, %v89_v11  ;;  %v307_v13 = vld [vmem:[#allocation10] sm:$0xff]  ;;  %v308_v14 = vld [vmem:[#allocation10 + $0x8] sm:$0xff]  ;;  %vm443_vm3 = vcmask 254976   ;;  %vm4302_vm4 = vcmask 523264   ;;  %vm4589_vm6 = vcmask 130048  }
  0x3a   :  { %v5976_v12 = vpack.c.bf16 %v210_v10, %v209_v9  ;;  %5973 = vmatprep.subr.bf16.mxu1 %v5972_v7  ;;  %5967 = vmatpush3.bf16.msra.mxu0 %v5964_v3  ;;  %v312_v15 = vld [vmem:[%s7801_s7] sm:$0xff]  ;;  %v313_v16 = vld [vmem:[%s7801_s7 + $0x8] sm:$0xff]  ;;  %v6721_v18 = vpack.c.bf16 %v308_v14, %v307_v13  ;;  %v309_v21 = vld [vmem:[#allocation10 + $0x10] sm:$0xff]  ;;  %vm4505_vm7 = vcmask 64512  }
  0x3b   :  { %5975 = vmatpush3.bf16.msra.mxu1 %v5972_v7  ;;  %5969 = vmatprep.subr.bf16.mxu0 %v5968_v8  ;;  %v90_v17 = vld [vmem:[%s7794_s0 + $0x8] sm:$0xff]  ;;  %v6724_v20 = vpack.c.bf16 %v313_v16, %v312_v15  ;;  %v310_v22 = vld [vmem:[#allocation10 + $0x18] sm:$0xff]  ;;  %v91_v23 = vld [vmem:[%s7794_s0 + $0x10] sm:$0xff] }
  0x3c   :  { %5977 = vmatprep.subr.bf16.mxu1 %v5976_v12  ;;  %5528 = vmatprep.mubr.msk.f32.mxu1 %vm104_vm0, %v89_v11  ;;  %v314_v24 = vld [vmem:[%s7801_s7 + $0x10] sm:$0xff]  ;;  %v315_v25 = vld [vmem:[%s7801_s7 + $0x18] sm:$0xff]  ;;  %v6742_v27 = vpack.c.bf16 %v310_v22, %v309_v21  ;;  %v5204_v30 = vld [vmem:[%s7802_s8] ss:$0 sm:$0xff] }
  0x3d   :  { %v92_v26 = vld [vmem:[%s7794_s0 + $0x18] sm:$0xff]  ;;  %v6746_v28 = vpack.c.bf16 %v315_v25, %v314_v24  ;;  %v5199_v31 = vld [vmem:[%s7798_s4] ss:$0 sm:$0xff]  ;;  %6229 = vset.pattern.permute.xlu0 %v6575_v39  ;;  %6230 = vset.pattern.permute.xlu1 %v6575_v39  ;;  %vm6201_vm5 = vmpackc.low %vm4302_vm4, %vm4302_vm4 }
  0x3e   :  { %5971 = vmatpush3.bf16.msra.mxu0 %v5968_v8  ;;  %v6788_v48 = vld [vmem:[%s7799_s5] ss:$0 sm:$0xff]  ;;  %v445_v9 = vld [vmem:[%s7795_s1 + $0x1e] sm:$0x3] }
  0x3f   :  { %5979 = vmatpush3.bf16.msra.mxu1 %v5976_v12  ;;  %5980 = vmatprep.subr.bf16.mxu0 %v7809_v19  ;;  %v6794_v50 = vld [vmem:[%s7803_s9] ss:$0 sm:$0xff]  ;;  %v555_v10 = vsub.f32 1.0, %v445_v9 }
  0x40   :  { %5986 = vmatprep.subr.bf16.mxu1 %v7809_v19  ;;  %v317_v11 = vld [vmem:[%s7795_s1] sm:$0x3] }
  0x41   :  { %5515 = vmatmul.mubr.msk.f32.vlgmr.msra.gmra.mrb[0].mxu0 %vm104_vm0, %v90_v17  ;;  %v430_v21 = vsub.f32 1.0, %v317_v11 }
  0x42   :  { %5529 = vmatmul.mubr.msk.f32.vlgmr.msra.gmra.mrb[0].mxu1 %vm104_vm0, %v90_v17  ;;  %5982 = vmatpush3.bf16.msra.mxu0 %v6721_v18 }
  0x43   :  { %5988 = vmatpush3.bf16.msra.mxu1 %v6724_v20  ;;  %5517 = vmatprep.mubr.msk.f32.mxu0 %vm104_vm0, %v91_v23 }
  0x44   :  { %5531 = vmatprep.mubr.msk.f32.mxu1 %vm104_vm0, %v91_v23  ;;  %5983 = vmatprep.subr.bf16.mxu0 %v7809_v19 }
  0x45   :  { %5518 = vmatmul.mubr.msk.f32.gmra.mrb[2].mxu0 %vm104_vm0, %v92_v26  ;;  %5989 = vmatprep.subr.bf16.mxu1 %v7809_v19 }
  0x46   :  { %5532 = vmatmul.mubr.msk.f32.gmra.mrb[2].mxu1 %vm104_vm0, %v92_v26  ;;  %5985 = vmatpush3.bf16.msra.mxu0 %v6742_v27 }
  0x47   :  { %5991 = vmatpush3.bf16.msra.mxu1 %v6746_v28  ;;  %5542 = vmatprep.mubr.msk.f32.mxu0 %vm6573_vm1, %v7811_v29 }
  0x48   :  { %5553 = vmatprep.mubr.msk.f32.mxu1 %vm6573_vm1, %v7811_v29  ;;  %5998 = vmatprep.subr.bf16.mxu1 %v7809_v19 }
  0x49   :  { %5543 = vmatmul.mubr.f32.vlgmr.msra.gmra.mrb[4].mxu0 %v7811_v29  ;;  %5992 = vmatprep.subr.bf16.mxu0 %v7809_v19 }
  0x4a   :  { %5554 = vmatmul.mubr.f32.vlgmr.msra.gmra.mrb[4].mxu1 %v7811_v29  ;;  %5994 = vmatpush3.bf16.msra.mxu0 %v6721_v18 }
  0x4b   :  { %6000 = vmatpush3.bf16.msra.mxu1 %v6724_v20  ;;  %5575 = vmatprep.mubr.msk.f32.mxu1 %vm6573_vm1, %v7811_v29 }
  0x4c   :  { %6001 = vmatprep.subr.bf16.mxu1 %v7809_v19  ;;  %5995 = vmatprep.subr.bf16.mxu0 %v7809_v19 }
  0x4d   :  { %5564 = vmatprep.mubr.msk.f32.mxu0 %vm6573_vm1, %v7811_v29 }
  0x4e   :  { %5997 = vmatpush3.bf16.msra.mxu0 %v6742_v27 }
  0x4f   :  { %6003 = vmatpush3.bf16.msra.mxu1 %v6746_v28  ;;  %6004 = vmatprep.subr.bf16.mxu0 %v7809_v19 }
  0x50   :  { %6010 = vmatprep.subr.bf16.mxu1 %v7809_v19 }
 0x114   :  { %v5516_v32 = vpop.f32.mrb[0].mxu0 }
 0x115   :  { %v5530_v33 = vpop.f32.mrb[0].mxu1  ;;  %v189_v34 = vadd.f32 %v5516_v32, %v5199_v31  ;;  %v183_v35 = vpop.f32.mrb[1].mxu0 }
 0x116   :  { %v290_v36 = vadd.f32 %v5530_v33, %v5204_v30  ;;  %v284_v37 = vpop.f32.mrb[1].mxu1  ;;  %v184_v38 = vadd.f32 %v5199_v31, %v183_v35 }
 0x117   :  { %v285_v40 = vadd.f32 %v5204_v30, %v284_v37  ;;  %204 = vst.msk [vmem:[#allocation2 + $0x8] sm:$0xff] %vm202_vm2, %v189_v34 }
 0x118   :  { %304 = vst.msk [vmem:[#allocation3 + $0x8] sm:$0xff] %vm202_vm2, %v290_v36  ;;  %203 = vst.msk [vmem:[#allocation2] sm:$0xff] %vm202_vm2, %v184_v38  ;;  %v5519_v41 = vpop.f32.mrb[2].mxu0 }
 0x119   :  { %303 = vst.msk [vmem:[#allocation3] sm:$0xff] %vm202_vm2, %v285_v40  ;;  %v5533_v42 = vpop.f32.mrb[2].mxu1  ;;  %v199_v43 = vadd.f32 %v5519_v41, %v5199_v31  ;;  %v193_v44 = vpop.f32.mrb[3].mxu0 }
 0x11a   :  { %v300_v45 = vadd.f32 %v5533_v42, %v5204_v30  ;;  %v294_v46 = vpop.f32.mrb[3].mxu1  ;;  %v194_v47 = vadd.f32 %v5199_v31, %v193_v44 }
 0x11b   :  { %v295_v49 = vadd.f32 %v5204_v30, %v294_v46  ;;  %206 = vst.msk [vmem:[#allocation2 + $0x18] sm:$0xff] %vm202_vm2, %v199_v43 }
 0x11c   :  { %306 = vst.msk [vmem:[#allocation3 + $0x18] sm:$0xff] %vm202_vm2, %v300_v45  ;;  %205 = vst.msk [vmem:[#allocation2 + $0x10] sm:$0xff] %vm202_vm2, %v194_v47  ;;  %v394_v51 = vpop.f32.mrb[4].mxu0 }
 0x11d   :  { %305 = vst.msk [vmem:[#allocation3 + $0x10] sm:$0xff] %vm202_vm2, %v295_v49  ;;  %v395_v52 = vadd.f32 %v6788_v48, %v394_v51  ;;  %v519_v53 = vpop.f32.mrb[4].mxu1  ;;  %v5544_v54 = vpop.f32.mrb[5].mxu0 }
 0x11e   :  { %v520_v55 = vadd.f32 %v6794_v50, %v519_v53  ;;  %v5555_v56 = vpop.f32.mrb[5].mxu1 }
 0x11f   :  { %406 = vrot.lane.b32.xlu1 %v395_v52, %s6576_s3  ;;  %v318_v57 = vld [vmem:[#allocation2] sm:$0x3] }
 0x120   :  { %531 = vrot.lane.b32.xlu0 %v520_v55, %s6576_s3  ;;  %v398_v58 = vadd.f32 %v395_v52, %v318_v57 }
 0x122   :  { %v5210_v61 = vmul.f32 -1.442695, %v398_v58 }
 0x123   :  { %v446_v59 = vld [vmem:[#allocation3 + $0x1e] sm:$0x3]  ;;  %v693_v56 = vld [vmem:[#allocation3 + $0x1c] sm:$0x3] }
 0x124   :  { %v523_v60 = vadd.f32 %v520_v55, %v446_v59  ;;  %6241 = vpow2.f32 %v5210_v61  ;;  %v692_v55 = vld [vmem:[%s7795_s1 + $0x1c] sm:$0x3] }
 0x126   :  { %v5212_v62 = vmul.f32 -1.442695, %v523_v60 }
 0x128   :  { %6243 = vpow2.f32 %v5212_v62 }
 0x12e   :  { %v6242_v63 = vpop.eup %6241 }
 0x12f   :  { %v402_v1 = vadd.f32 1.0, %v6242_v63 }
 0x131   :  { %6245 = vrcp.f32 %v402_v1 }
 0x132   :  { %v6244_v0 = vpop.eup %6243 }
 0x133   :  { %v527_v2 = vadd.f32 1.0, %v6244_v0 }
 0x135   :  { %6247 = vrcp.f32 %v527_v2 }
 0x13b   :  { %v6246_v3 = vpop.eup %6245 }
 0x13c   :  { %v416_v37 = vsub.f32 1.0, %v6246_v3  ;;  %v422_v39 = vmul.f32 0.0, %v6246_v3 }
 0x13f   :  { %v6248_v5 = vpop.eup %6247 }
 0x140   :  { %v541_v24 = vsub.f32 1.0, %v6248_v5  ;;  %v547_v30 = vmul.f32 0.0, %v6248_v5 }
 0x191   :  { %v407_v4 = vpop.permute.xlu1 %406 }
 0x192   :  { %v532_v6 = vpop.permute.xlu0 %531  ;;  %v409_v7 = vmul.f32 %v6246_v3, %v407_v4 }
 0x193   :  { %v534_v8 = vmul.f32 %v6248_v5, %v532_v6 }
 0x194   :  { %411 = vrot.lane.b32.xlu1 %v409_v7, %s6576_s3 }
 0x195   :  { %536 = vrot.lane.b32.xlu0 %v534_v8, %s6576_s3  ;;  %v801_v8 = vsub.f32 1.0, %v692_v55 }
 0x198   :  { %558 = vperm.xlu1 %6230, %v555_v10  }
 0x199   :  { %551 = vperm.xlu0 %6229, %v445_v9   ;;  %v569_v9 = vld [vmem:[%s7795_s1 + $0x2] sm:$0x3] }
 0x19d   :  { %426 = vperm.xlu0 %6229, %v317_v11  }
 0x206   :  { %v412_v12 = vpop.permute.xlu1 %411 }
 0x207   :  { %v537_v13 = vpop.permute.xlu0 %536  ;;  %v414_v14 = vadd.f32 %v412_v12, %v318_v57 }
 0x208   :  { %v539_v15 = vadd.f32 %v537_v13, %v446_v59  ;;  %v570_v59 = vld [vmem:[#allocation2 + $0x2] sm:$0x3] }
 0x209   :  { %6249 = vtanh.f32 %v414_v14  ;;  %v678_v14 = vsub.f32 1.0, %v569_v9 }
 0x20a   :  { %6251 = vtanh.f32 %v539_v15 }
 0x213   :  { %v6250_v16 = vpop.eup %6249 }
 0x214   :  { %v6252_v17 = vpop.eup %6251  ;;  %418 = vrot.lane.b32.xlu0 %v6250_v16, %s6577_s28 }
 0x215   :  { %543 = vrot.lane.b32.xlu1 %v6252_v17, %s6577_s28 }
 0x217   :  { %v559_v22 = vpop.permute.xlu1 %558 }
 0x218   :  { %v6813_v23 = vpop.permute.xlu0 %551  ;;  %v561_v33 = vmul.f32 0.0, %v559_v22 }
 0x219   :  { %433 = vperm.xlu1 %6230, %v430_v21  }
 0x21c   :  { %v6815_v26 = vpop.permute.xlu0 %426 }
 0x286   :  { %v419_v35 = vpop.permute.xlu0 %418 }
 0x287   :  { %v544_v25 = vpop.permute.xlu1 %543  ;;  %v421_v38 = vmul.f32 %v419_v35, %v416_v37 }
 0x288   :  { %v546_v31 = vmul.f32 %v544_v25, %v541_v24 }
 0x289   :  { %v423_v40 = vadd.f32 %v422_v39, %v421_v38 }
 0x28a   :  { %v548_v32 = vadd.f32 %v547_v30, %v546_v31 }
 0x28b   :  { %v429_v42 = vmul.f32 %v6815_v26, %v423_v40 }
 0x28c   :  { %v554_v34 = vmul.f32 %v6813_v23, %v548_v32 }
 0x28e   :  { %v6818_v36 = vadd.f32 %v561_v33, %v554_v34 }
 0x290   :  { %695 = vrot.lane.b32.xlu1 %v6818_v36, %s6577_s28 }
 0x298   :  { %v434_v41 = vpop.permute.xlu1 %433 }
 0x299   :  { %v436_v43 = vmul.f32 0.0, %v434_v41 }
 0x29b   :  { %v6823_v44 = vadd.f32 %v436_v43, %v429_v42 }
 0x29d   :  { %572 = vrot.lane.b32.xlu0 %v6823_v44, %s6577_s28 }
 0x302   :  { %v696_v45 = vpop.permute.xlu1 %695 }
 0x303   :  { %5576 = vmatmul.mubr.msk.f32.vlgmr.msra.gmra.mrb[6].mxu1 %vm104_vm0, %v696_v45 }
 0x304   :  { %6012 = vmatpush3.bf16.msra.mxu1 %v6724_v20  ;;  %5597 = vmatprep.mubr.msk.f32.mxu1 %vm6573_vm1, %v7811_v29 }
 0x305   :  { %6013 = vmatprep.subr.bf16.mxu1 %v7809_v19 }
 0x308   :  { %6015 = vmatpush3.bf16.msra.mxu1 %v6746_v28 }
 0x309   :  { %6022 = vmatprep.subr.bf16.mxu1 %v7809_v19 }
 0x30f   :  { %v573_v46 = vpop.permute.xlu0 %572 }
 0x310   :  { %5565 = vmatmul.mubr.msk.f32.vlgmr.msra.gmra.mrb[6].mxu0 %vm104_vm0, %v573_v46 }
 0x311   :  { %6006 = vmatpush3.bf16.msra.mxu0 %v6721_v18  ;;  %5586 = vmatprep.mubr.msk.f32.mxu0 %vm6573_vm1, %v7811_v29 }
 0x312   :  { %6007 = vmatprep.subr.bf16.mxu0 %v7809_v19 }
 0x315   :  { %6009 = vmatpush3.bf16.msra.mxu0 %v6742_v27 }
 0x316   :  { %6016 = vmatprep.subr.bf16.mxu0 %v7809_v19 }
 0x3d6   :  { %v765_v47 = vpop.f32.mrb[6].mxu1 }
 0x3d7   :  { %v766_v49 = vadd.f32 %v6794_v50, %v765_v47  ;;  %v5577_v51 = vpop.f32.mrb[7].mxu1 }
 0x3d9   :  { %777 = vrot.lane.b32.xlu1 %v766_v49, %s6576_s3  ;;  %v769_v57 = vadd.f32 %v766_v49, %v693_v56 }
 0x3db   :  { %v5216_v58 = vmul.f32 -1.442695, %v769_v57  ;;  %v938_v57 = vld [vmem:[%s7795_s1 + $0x1a] sm:$0x3] }
 0x3dd   :  { %6253 = vpow2.f32 %v5216_v58  ;;  %v939_v58 = vld [vmem:[#allocation3 + $0x1a] sm:$0x3] }
 0x3e3   :  { %v642_v52 = vpop.f32.mrb[6].mxu0 }
 0x3e4   :  { %v643_v53 = vadd.f32 %v6788_v48, %v642_v52  ;;  %v5566_v54 = vpop.f32.mrb[7].mxu0 }
 0x3e6   :  { %654 = vrot.lane.b32.xlu1 %v643_v53, %s6576_s3  ;;  %v646_v60 = vadd.f32 %v643_v53, %v570_v59 }
 0x3e7   :  { %v6254_v62 = vpop.eup %6253 }
 0x3e8   :  { %v5214_v61 = vmul.f32 -1.442695, %v646_v60  ;;  %v773_v63 = vadd.f32 1.0, %v6254_v62 }
 0x3ea   :  { %797 = vperm.xlu1 %6230, %v692_v55   ;;  %6255 = vpow2.f32 %v5214_v61  ;;  %v816_v61 = vld [vmem:[#allocation2 + $0x4] sm:$0x3] }
 0x3eb   :  { %6257 = vrcp.f32 %v773_v63 }
 0x3f4   :  { %v6256_v0 = vpop.eup %6255 }
 0x3f5   :  { %v650_v1 = vadd.f32 1.0, %v6256_v0  ;;  %v6258_v2 = vpop.eup %6257 }
 0x3f6   :  { %v787_v21 = vsub.f32 1.0, %v6258_v2  ;;  %v793_v24 = vmul.f32 %v6258_v2, %v6818_v36 }
 0x3f7   :  { %6259 = vrcp.f32 %v650_v1 }
 0x401   :  { %v6260_v5 = vpop.eup %6259 }
 0x402   :  { %v664_v37 = vsub.f32 1.0, %v6260_v5  ;;  %v670_v39 = vmul.f32 %v6260_v5, %v6823_v44 }
 0x44b   :  { %v778_v3 = vpop.permute.xlu1 %777 }
 0x44c   :  { %v780_v4 = vmul.f32 %v6258_v2, %v778_v3 }
 0x44e   :  { %782 = vrot.lane.b32.xlu0 %v780_v4, %s6576_s3 }
 0x458   :  { %v655_v6 = vpop.permute.xlu1 %654 }
 0x459   :  { %v657_v7 = vmul.f32 %v6260_v5, %v655_v6 }
 0x45b   :  { %659 = vrot.lane.b32.xlu0 %v657_v7, %s6576_s3 }
 0x45f   :  { %804 = vperm.xlu0 %6229, %v801_v8  }
 0x463   :  { %674 = vperm.xlu0 %6229, %v569_v9  }
 0x469   :  { %v6855_v17 = vpop.permute.xlu1 %797 }
 0x4c0   :  { %v783_v10 = vpop.permute.xlu0 %782 }
 0x4c1   :  { %v785_v11 = vadd.f32 %v783_v10, %v693_v56  ;;  %v1047_v10 = vsub.f32 1.0, %v938_v57 }
 0x4c3   :  { %6261 = vtanh.f32 %v785_v11  ;;  %v815_v11 = vld [vmem:[%s7795_s1 + $0x4] sm:$0x3] }
 0x4cd   :  { %v6262_v12 = vpop.eup %6261  ;;  %v660_v13 = vpop.permute.xlu0 %659 }
 0x4ce   :  { %v662_v15 = vadd.f32 %v660_v13, %v570_v59  ;;  %789 = vrot.lane.b32.xlu1 %v6262_v12, %s6577_s28 }
 0x4d0   :  { %6263 = vtanh.f32 %v662_v15 }
 0x4d2   :  { %681 = vperm.xlu1 %6230, %v678_v14  }
 0x4da   :  { %v6264_v16 = vpop.eup %6263 }
 0x4db   :  { %666 = vrot.lane.b32.xlu0 %v6264_v16, %s6577_s28  ;;  %v924_v16 = vsub.f32 1.0, %v815_v11 }
 0x4de   :  { %v805_v30 = vpop.permute.xlu0 %804 }
 0x4df   :  { %v807_v32 = vmul.f32 %v805_v30, %v6818_v36 }
 0x4e2   :  { %v6862_v35 = vpop.permute.xlu0 %674 }
 0x4e3   :  { %7827 = vst [vmem:[#allocation17_spill] sm:$0xff] %v6862_v35 }
 0x540   :  { %v790_v22 = vpop.permute.xlu1 %789 }
 0x541   :  { %v792_v25 = vmul.f32 %v790_v22, %v787_v21 }
 0x543   :  { %v794_v31 = vadd.f32 %v793_v24, %v792_v25 }
 0x545   :  { %v800_v33 = vmul.f32 %v6855_v17, %v794_v31 }
 0x547   :  { %v6860_v34 = vadd.f32 %v807_v32, %v800_v33 }
 0x549   :  { %941 = vrot.lane.b32.xlu1 %v6860_v34, %s6577_s28 }
 0x54d   :  { %v667_v38 = vpop.permute.xlu0 %666 }
 0x54e   :  { %v669_v40 = vmul.f32 %v667_v38, %v664_v37 }
 0x550   :  { %v671_v41 = vadd.f32 %v670_v39, %v669_v40 }
 0x551   :  { %v682_v42 = vpop.permute.xlu1 %681 }
 0x552   :  { %v677_v43 = vmul.f32 %v6862_v35, %v671_v41  ;;  %v684_v45 = vmul.f32 %v682_v42, %v6823_v44 }
 0x554   :  { %v6869_v46 = vadd.f32 %v684_v45, %v677_v43 }
 0x556   :  { %7828 = vst [vmem:[#allocation18_spill] sm:$0xff] %v6869_v46  ;;  %818 = vrot.lane.b32.xlu0 %v6869_v46, %s6577_s28 }
 0x5bb   :  { %v942_v47 = vpop.permute.xlu1 %941 }
 0x5bc   :  { %5598 = vmatmul.mubr.msk.f32.vlgmr.msra.gmra.mrb[8].mxu1 %vm104_vm0, %v942_v47 }
 0x5bd   :  { %6024 = vmatpush3.bf16.msra.mxu1 %v6724_v20  ;;  %5619 = vmatprep.mubr.msk.f32.mxu1 %vm6573_vm1, %v7811_v29 }
 0x5be   :  { %6025 = vmatprep.subr.bf16.mxu1 %v7809_v19 }
 0x5c1   :  { %6027 = vmatpush3.bf16.msra.mxu1 %v6746_v28 }
 0x5c2   :  { %6034 = vmatprep.subr.bf16.mxu1 %v7809_v19 }
 0x5c8   :  { %v819_v49 = vpop.permute.xlu0 %818 }
 0x5c9   :  { %5587 = vmatmul.mubr.msk.f32.vlgmr.msra.gmra.mrb[8].mxu0 %vm104_vm0, %v819_v49 }
 0x5ca   :  { %6018 = vmatpush3.bf16.msra.mxu0 %v6721_v18  ;;  %5608 = vmatprep.mubr.msk.f32.mxu0 %vm6573_vm1, %v7811_v29 }
 0x5cb   :  { %6019 = vmatprep.subr.bf16.mxu0 %v7809_v19 }
 0x5ce   :  { %6021 = vmatpush3.bf16.msra.mxu0 %v6742_v27 }
 0x5cf   :  { %6028 = vmatprep.subr.bf16.mxu0 %v7809_v19 }
 0x68f   :  { %v1011_v51 = vpop.f32.mrb[8].mxu1 }
 0x690   :  { %v1012_v52 = vadd.f32 %v6794_v50, %v1011_v51  ;;  %v5599_v53 = vpop.f32.mrb[9].mxu1 }
 0x692   :  { %1023 = vrot.lane.b32.xlu1 %v1012_v52, %s6576_s3  ;;  %v1015_v59 = vadd.f32 %v1012_v52, %v939_v58 }
 0x694   :  { %v5220_v60 = vmul.f32 -1.442695, %v1015_v59 }
 0x696   :  { %6265 = vpow2.f32 %v5220_v60 }
 0x69c   :  { %v888_v54 = vpop.f32.mrb[8].mxu0 }
 0x69d   :  { %v889_v55 = vadd.f32 %v6788_v48, %v888_v54  ;;  %v5588_v56 = vpop.f32.mrb[9].mxu0 }
 0x69f   :  { %900 = vrot.lane.b32.xlu1 %v889_v55, %s6576_s3  ;;  %v892_v62 = vadd.f32 %v889_v55, %v816_v61 }
 0x6a0   :  { %v6266_v0 = vpop.eup %6265 }
 0x6a1   :  { %v5218_v63 = vmul.f32 -1.442695, %v892_v62  ;;  %v1019_v1 = vadd.f32 1.0, %v6266_v0  ;;  %v1185_v0 = vld [vmem:[#allocation3 + $0x18] sm:$0x3] }
 0x6a3   :  { %1043 = vperm.xlu1 %6230, %v938_v57   ;;  %6267 = vpow2.f32 %v5218_v63  ;;  %v1184_v63 = vld [vmem:[%s7795_s1 + $0x18] sm:$0x3] }
 0x6a4   :  { %6269 = vrcp.f32 %v1019_v1 }
 0x6ad   :  { %v6268_v2 = vpop.eup %6267 }
 0x6ae   :  { %v896_v3 = vadd.f32 1.0, %v6268_v2  ;;  %v6270_v4 = vpop.eup %6269 }
 0x6af   :  { %v1033_v25 = vsub.f32 1.0, %v6270_v4  ;;  %v1039_v31 = vmul.f32 %v6270_v4, %v6860_v34 }
 0x6b0   :  { %6271 = vrcp.f32 %v896_v3  ;;  %v1062_v3 = vld [vmem:[#allocation2 + $0x6] sm:$0x3] }
 0x6ba   :  { %v6272_v7 = vpop.eup %6271 }
 0x6bb   :  { %v910_v42 = vsub.f32 1.0, %v6272_v7  ;;  %v916_v45 = vmul.f32 %v6272_v7, %v6869_v46 }
 0x704   :  { %v1024_v5 = vpop.permute.xlu1 %1023 }
 0x705   :  { %v1026_v6 = vmul.f32 %v6270_v4, %v1024_v5 }
 0x707   :  { %1028 = vrot.lane.b32.xlu0 %v1026_v6, %s6576_s3 }
 0x711   :  { %v901_v8 = vpop.permute.xlu1 %900 }
 0x712   :  { %v903_v9 = vmul.f32 %v6272_v7, %v901_v8 }
 0x714   :  { %905 = vrot.lane.b32.xlu0 %v903_v9, %s6576_s3 }
 0x718   :  { %1050 = vperm.xlu0 %6229, %v1047_v10  }
 0x71c   :  { %920 = vperm.xlu0 %6229, %v815_v11  }
 0x722   :  { %v6901_v24 = vpop.permute.xlu1 %1043 }
 0x779   :  { %v1029_v12 = vpop.permute.xlu0 %1028 }
 0x77a   :  { %v1031_v13 = vadd.f32 %v1029_v12, %v939_v58 }
 0x77c   :  { %6273 = vtanh.f32 %v1031_v13 }
 0x786   :  { %v6274_v14 = vpop.eup %6273  ;;  %v906_v15 = vpop.permute.xlu0 %905 }
 0x787   :  { %v908_v21 = vadd.f32 %v906_v15, %v816_v61  ;;  %1035 = vrot.lane.b32.xlu1 %v6274_v14, %s6577_s28 }
 0x789   :  { %6275 = vtanh.f32 %v908_v21  ;;  %v1061_v21 = vld [vmem:[%s7795_s1 + $0x6] sm:$0x3] }
 0x78b   :  { %927 = vperm.xlu1 %6230, %v924_v16   ;;  %v1293_v16 = vsub.f32 1.0, %v1184_v63 }
 0x793   :  { %v6276_v22 = vpop.eup %6275 }
 0x794   :  { %912 = vrot.lane.b32.xlu0 %v6276_v22, %s6577_s28 }
 0x797   :  { %v1051_v33 = vpop.permute.xlu0 %1050 }
 0x798   :  { %v1053_v38 = vmul.f32 %v1051_v33, %v6860_v34 }
 0x79b   :  { %v6908_v41 = vpop.permute.xlu0 %920 }
 0x7f9   :  { %v1036_v30 = vpop.permute.xlu1 %1035 }
 0x7fa   :  { %v1038_v32 = vmul.f32 %v1036_v30, %v1033_v25 }
 0x7fc   :  { %v1040_v37 = vadd.f32 %v1039_v31, %v1038_v32  ;;  %v1170_v32 = vsub.f32 1.0, %v1061_v21 }
 0x7fe   :  { %v1046_v39 = vmul.f32 %v6901_v24, %v1040_v37 }
 0x800   :  { %v6906_v40 = vadd.f32 %v1053_v38, %v1046_v39 }
 0x802   :  { %1187 = vrot.lane.b32.xlu1 %v6906_v40, %s6577_s28 }
 0x806   :  { %v913_v43 = vpop.permute.xlu0 %912 }
 0x807   :  { %v915_v47 = vmul.f32 %v913_v43, %v910_v42 }
 0x809   :  { %v917_v49 = vadd.f32 %v916_v45, %v915_v47 }
 0x80a   :  { %v928_v51 = vpop.permute.xlu1 %927 }
 0x80b   :  { %v923_v52 = vmul.f32 %v6908_v41, %v917_v49  ;;  %v930_v53 = vmul.f32 %v928_v51, %v6869_v46 }
 0x80d   :  { %v6915_v54 = vadd.f32 %v930_v53, %v923_v52 }
 0x80f   :  { %1064 = vrot.lane.b32.xlu0 %v6915_v54, %s6577_s28 }
 0x874   :  { %v1188_v55 = vpop.permute.xlu1 %1187 }
 0x875   :  { %5620 = vmatmul.mubr.msk.f32.vlgmr.msra.gmra.mrb[10].mxu1 %vm104_vm0, %v1188_v55 }
 0x876   :  { %6036 = vmatpush3.bf16.msra.mxu1 %v6724_v20  ;;  %5641 = vmatprep.mubr.msk.f32.mxu1 %vm6573_vm1, %v7811_v29 }
 0x877   :  { %6037 = vmatprep.subr.bf16.mxu1 %v7809_v19 }
 0x87a   :  { %6039 = vmatpush3.bf16.msra.mxu1 %v6746_v28 }
 0x87b   :  { %6046 = vmatprep.subr.bf16.mxu1 %v7809_v19 }
 0x881   :  { %v1065_v56 = vpop.permute.xlu0 %1064 }
 0x882   :  { %5609 = vmatmul.mubr.msk.f32.vlgmr.msra.gmra.mrb[10].mxu0 %vm104_vm0, %v1065_v56 }
 0x883   :  { %6030 = vmatpush3.bf16.msra.mxu0 %v6721_v18  ;;  %5630 = vmatprep.mubr.msk.f32.mxu0 %vm6573_vm1, %v7811_v29 }
 0x884   :  { %6031 = vmatprep.subr.bf16.mxu0 %v7809_v19 }
 0x887   :  { %6033 = vmatpush3.bf16.msra.mxu0 %v6742_v27 }
 0x888   :  { %6040 = vmatprep.subr.bf16.mxu0 %v7809_v19 }
 0x948   :  { %v1257_v57 = vpop.f32.mrb[10].mxu1 }
 0x949   :  { %v1258_v58 = vadd.f32 %v6794_v50, %v1257_v57  ;;  %v5621_v59 = vpop.f32.mrb[11].mxu1 }
 0x94b   :  { %1269 = vrot.lane.b32.xlu1 %v1258_v58, %s6576_s3  ;;  %v1261_v1 = vadd.f32 %v1258_v58, %v1185_v0 }
 0x94d   :  { %v5224_v2 = vmul.f32 -1.442695, %v1261_v1 }
 0x94f   :  { %6277 = vpow2.f32 %v5224_v2 }
 0x955   :  { %v1134_v60 = vpop.f32.mrb[10].mxu0 }
 0x956   :  { %v1135_v61 = vadd.f32 %v6788_v48, %v1134_v60  ;;  %v5610_v62 = vpop.f32.mrb[11].mxu0 }
 0x958   :  { %1146 = vrot.lane.b32.xlu1 %v1135_v61, %s6576_s3  ;;  %v1138_v4 = vadd.f32 %v1135_v61, %v1062_v3 }
 0x959   :  { %v6278_v6 = vpop.eup %6277 }
 0x95a   :  { %v5222_v5 = vmul.f32 -1.442695, %v1138_v4  ;;  %v1265_v7 = vadd.f32 1.0, %v6278_v6 }
 0x95c   :  { %1289 = vperm.xlu1 %6230, %v1184_v63   ;;  %6279 = vpow2.f32 %v5222_v5 }
 0x95d   :  { %6281 = vrcp.f32 %v1265_v7 }
 0x966   :  { %v6280_v8 = vpop.eup %6279 }
 0x967   :  { %v1142_v9 = vadd.f32 1.0, %v6280_v8  ;;  %v6282_v10 = vpop.eup %6281 }
 0x968   :  { %v1279_v39 = vsub.f32 1.0, %v6282_v10  ;;  %v1285_v43 = vmul.f32 %v6282_v10, %v6906_v40 }
 0x969   :  { %6283 = vrcp.f32 %v1142_v9  ;;  %v1430_v9 = vld [vmem:[%s7795_s1 + $0x16] sm:$0x3] }
 0x973   :  { %v6284_v13 = vpop.eup %6283 }
 0x974   :  { %v1156_v56 = vsub.f32 1.0, %v6284_v13  ;;  %v1162_v58 = vmul.f32 %v6284_v13, %v6915_v54 }
 0x9bd   :  { %v1270_v11 = vpop.permute.xlu1 %1269 }
 0x9be   :  { %v1272_v12 = vmul.f32 %v6282_v10, %v1270_v11  ;;  %v1431_v10 = vld [vmem:[#allocation3 + $0x16] sm:$0x3] }
 0x9c0   :  { %1274 = vrot.lane.b32.xlu0 %v1272_v12, %s6576_s3 }
 0x9ca   :  { %v1147_v14 = vpop.permute.xlu1 %1146 }
 0x9cb   :  { %v1149_v15 = vmul.f32 %v6284_v13, %v1147_v14  ;;  %v1308_v13 = vld [vmem:[#allocation2 + $0x8] sm:$0x3] }
 0x9cd   :  { %1151 = vrot.lane.b32.xlu0 %v1149_v15, %s6576_s3 }
 0x9d1   :  { %1296 = vperm.xlu0 %6229, %v1293_v16  }
 0x9d5   :  { %1166 = vperm.xlu0 %6229, %v1061_v21  }
 0x9db   :  { %v6947_v38 = vpop.permute.xlu1 %1289 }
 0xa32   :  { %v1275_v22 = vpop.permute.xlu0 %1274 }
 0xa33   :  { %v1277_v25 = vadd.f32 %v1275_v22, %v1185_v0 }
 0xa35   :  { %6285 = vtanh.f32 %v1277_v25 }
 0xa3f   :  { %v6286_v30 = vpop.eup %6285  ;;  %v1152_v31 = vpop.permute.xlu0 %1151 }
 0xa40   :  { %v1154_v33 = vadd.f32 %v1152_v31, %v1062_v3  ;;  %1281 = vrot.lane.b32.xlu1 %v6286_v30, %s6577_s28 }
 0xa42   :  { %6287 = vtanh.f32 %v1154_v33 }
 0xa44   :  { %1173 = vperm.xlu1 %6230, %v1170_v32  }
 0xa4c   :  { %v6288_v37 = vpop.eup %6287 }
 0xa4d   :  { %1158 = vrot.lane.b32.xlu0 %v6288_v37, %s6577_s28 }
 0xa50   :  { %v1297_v47 = vpop.permute.xlu0 %1296 }
 0xa51   :  { %v1299_v51 = vmul.f32 %v1297_v47, %v6906_v40 }
 0xa54   :  { %v6954_v55 = vpop.permute.xlu0 %1166 }
 0xa55   :  { %7830 = vst [vmem:[#allocation20_spill] sm:$0xff] %v6954_v55 }
 0xab2   :  { %v1282_v42 = vpop.permute.xlu1 %1281 }
 0xab3   :  { %v1284_v45 = vmul.f32 %v1282_v42, %v1279_v39  ;;  %v1539_v42 = vsub.f32 1.0, %v1430_v9 }
 0xab5   :  { %v1286_v49 = vadd.f32 %v1285_v43, %v1284_v45  ;;  %v1307_v43 = vld [vmem:[%s7795_s1 + $0x8] sm:$0x3] }
 0xab7   :  { %v1292_v52 = vmul.f32 %v6947_v38, %v1286_v49 }
 0xab9   :  { %v6952_v53 = vadd.f32 %v1299_v51, %v1292_v52  ;;  %v1416_v52 = vsub.f32 1.0, %v1307_v43 }
 0xabb   :  { %7829 = vst [vmem:[#allocation19_spill] sm:$0xff] %v6952_v53  ;;  %1433 = vrot.lane.b32.xlu1 %v6952_v53, %s6577_s28 }
 0xabf   :  { %v1159_v57 = vpop.permute.xlu0 %1158 }
 0xac0   :  { %v1161_v59 = vmul.f32 %v1159_v57, %v1156_v56 }
 0xac2   :  { %v1163_v60 = vadd.f32 %v1162_v58, %v1161_v59 }
 0xac3   :  { %v1174_v61 = vpop.permute.xlu1 %1173 }
 0xac4   :  { %v1169_v62 = vmul.f32 %v6954_v55, %v1163_v60  ;;  %v1176_v63 = vmul.f32 %v1174_v61, %v6915_v54 }
 0xac6   :  { %v6961_v0 = vadd.f32 %v1176_v63, %v1169_v62 }
 0xac8   :  { %7831 = vst [vmem:[#allocation21_spill] sm:$0xff] %v6961_v0  ;;  %1310 = vrot.lane.b32.xlu0 %v6961_v0, %s6577_s28 }
 0xb2d   :  { %v1434_v1 = vpop.permute.xlu1 %1433 }
 0xb2e   :  { %5642 = vmatmul.mubr.msk.f32.vlgmr.msra.gmra.mrb[12].mxu1 %vm104_vm0, %v1434_v1 }
 0xb2f   :  { %6048 = vmatpush3.bf16.msra.mxu1 %v6724_v20  ;;  %5663 = vmatprep.mubr.msk.f32.mxu1 %vm6573_vm1, %v7811_v29 }
 0xb30   :  { %6049 = vmatprep.subr.bf16.mxu1 %v7809_v19 }
 0xb33   :  { %6051 = vmatpush3.bf16.msra.mxu1 %v6746_v28 }
 0xb34   :  { %6058 = vmatprep.subr.bf16.mxu1 %v7809_v19 }
 0xb3a   :  { %v1311_v2 = vpop.permute.xlu0 %1310 }
 0xb3b   :  { %5631 = vmatmul.mubr.msk.f32.vlgmr.msra.gmra.mrb[12].mxu0 %vm104_vm0, %v1311_v2 }
 0xb3c   :  { %6042 = vmatpush3.bf16.msra.mxu0 %v6721_v18  ;;  %5652 = vmatprep.mubr.msk.f32.mxu0 %vm6573_vm1, %v7811_v29 }
 0xb3d   :  { %6043 = vmatprep.subr.bf16.mxu0 %v7809_v19 }
 0xb40   :  { %6045 = vmatpush3.bf16.msra.mxu0 %v6742_v27 }
 0xb41   :  { %6052 = vmatprep.subr.bf16.mxu0 %v7809_v19 }
 0xc01   :  { %v1503_v3 = vpop.f32.mrb[12].mxu1 }
 0xc02   :  { %v1504_v4 = vadd.f32 %v6794_v50, %v1503_v3  ;;  %v5643_v5 = vpop.f32.mrb[13].mxu1 }
 0xc04   :  { %1515 = vrot.lane.b32.xlu1 %v1504_v4, %s6576_s3  ;;  %v1507_v11 = vadd.f32 %v1504_v4, %v1431_v10 }
 0xc06   :  { %v5228_v12 = vmul.f32 -1.442695, %v1507_v11 }
 0xc08   :  { %6289 = vpow2.f32 %v5228_v12 }
 0xc0e   :  { %v1380_v6 = vpop.f32.mrb[12].mxu0 }
 0xc0f   :  { %v1381_v7 = vadd.f32 %v6788_v48, %v1380_v6  ;;  %v5632_v8 = vpop.f32.mrb[13].mxu0 }
 0xc11   :  { %1392 = vrot.lane.b32.xlu1 %v1381_v7, %s6576_s3  ;;  %v1384_v14 = vadd.f32 %v1381_v7, %v1308_v13 }
 0xc12   :  { %v6290_v16 = vpop.eup %6289 }
 0xc13   :  { %v5226_v15 = vmul.f32 -1.442695, %v1384_v14  ;;  %v1511_v21 = vadd.f32 1.0, %v6290_v16 }
 0xc15   :  { %1535 = vperm.xlu1 %6230, %v1430_v9   ;;  %6291 = vpow2.f32 %v5226_v15 }
 0xc16   :  { %6293 = vrcp.f32 %v1511_v21 }
 0xc1f   :  { %v6292_v22 = vpop.eup %6291 }
 0xc20   :  { %v1388_v25 = vadd.f32 1.0, %v6292_v22  ;;  %v6294_v30 = vpop.eup %6293 }
 0xc21   :  { %v1525_v59 = vsub.f32 1.0, %v6294_v30  ;;  %v1531_v61 = vmul.f32 %v6294_v30, %v6952_v53 }
 0xc22   :  { %6295 = vrcp.f32 %v1388_v25 }
 0xc2c   :  { %v6296_v33 = vpop.eup %6295 }
 0xc2d   :  { %v1402_v6 = vsub.f32 1.0, %v6296_v33  ;;  %v1408_v8 = vmul.f32 %v6296_v33, %v6961_v0 }
 0xc76   :  { %v1516_v31 = vpop.permute.xlu1 %1515 }
 0xc77   :  { %v1518_v32 = vmul.f32 %v6294_v30, %v1516_v31 }
 0xc79   :  { %1520 = vrot.lane.b32.xlu0 %v1518_v32, %s6576_s3 }
 0xc83   :  { %v1393_v37 = vpop.permute.xlu1 %1392 }
 0xc84   :  { %v1395_v39 = vmul.f32 %v6296_v33, %v1393_v37  ;;  %v1676_v33 = vld [vmem:[%s7795_s1 + $0x14] sm:$0x3] }
 0xc85   :  { %v1677_v37 = vld [vmem:[#allocation3 + $0x14] sm:$0x3] }
 0xc86   :  { %1397 = vrot.lane.b32.xlu0 %v1395_v39, %s6576_s3 }
 0xc8a   :  { %1542 = vperm.xlu0 %6229, %v1539_v42  }
 0xc8e   :  { %1412 = vperm.xlu0 %6229, %v1307_v43   ;;  %v1554_v43 = vld [vmem:[#allocation2 + $0xa] sm:$0x3] }
 0xc94   :  { %v6993_v58 = vpop.permute.xlu1 %1535 }
 0xceb   :  { %v1521_v45 = vpop.permute.xlu0 %1520 }
 0xcec   :  { %v1523_v47 = vadd.f32 %v1521_v45, %v1431_v10 }
 0xcee   :  { %6297 = vtanh.f32 %v1523_v47 }
 0xcf8   :  { %v6298_v49 = vpop.eup %6297  ;;  %v1398_v51 = vpop.permute.xlu0 %1397 }
 0xcf9   :  { %v1400_v56 = vadd.f32 %v1398_v51, %v1308_v13  ;;  %1527 = vrot.lane.b32.xlu1 %v6298_v49, %s6577_s28 }
 0xcfb   :  { %6299 = vtanh.f32 %v1400_v56 }
 0xcfd   :  { %1419 = vperm.xlu1 %6230, %v1416_v52  }
 0xd05   :  { %v6300_v57 = vpop.eup %6299 }
 0xd06   :  { %1404 = vrot.lane.b32.xlu0 %v6300_v57, %s6577_s28 }
 0xd09   :  { %v1543_v63 = vpop.permute.xlu0 %1542 }
 0xd0a   :  { %v1545_v2 = vmul.f32 %v1543_v63, %v6952_v53  ;;  %v1785_v63 = vsub.f32 1.0, %v1676_v33 }
 0xd0d   :  { %v7000_v5 = vpop.permute.xlu0 %1412 }
 0xd6b   :  { %v1528_v60 = vpop.permute.xlu1 %1527 }
 0xd6c   :  { %v1530_v62 = vmul.f32 %v1528_v60, %v1525_v59 }
 0xd6e   :  { %v1532_v1 = vadd.f32 %v1531_v61, %v1530_v62 }
 0xd70   :  { %v1538_v3 = vmul.f32 %v6993_v58, %v1532_v1  ;;  %v1553_v1 = vld [vmem:[%s7795_s1 + $0xa] sm:$0x3] }
 0xd72   :  { %v6998_v4 = vadd.f32 %v1545_v2, %v1538_v3 }
 0xd74   :  { %1679 = vrot.lane.b32.xlu1 %v6998_v4, %s6577_s28 }
 0xd78   :  { %v1405_v7 = vpop.permute.xlu0 %1404 }
 0xd79   :  { %v1407_v9 = vmul.f32 %v1405_v7, %v1402_v6 }
 0xd7b   :  { %v1409_v10 = vadd.f32 %v1408_v8, %v1407_v9  ;;  %v1662_v8 = vsub.f32 1.0, %v1553_v1 }
 0xd7c   :  { %v1420_v11 = vpop.permute.xlu1 %1419 }
 0xd7d   :  { %v1415_v12 = vmul.f32 %v7000_v5, %v1409_v10  ;;  %v1422_v13 = vmul.f32 %v1420_v11, %v6961_v0 }
 0xd7f   :  { %v7007_v14 = vadd.f32 %v1422_v13, %v1415_v12 }
 0xd81   :  { %1556 = vrot.lane.b32.xlu0 %v7007_v14, %s6577_s28 }
 0xde6   :  { %v1680_v15 = vpop.permute.xlu1 %1679 }
 0xde7   :  { %5664 = vmatmul.mubr.msk.f32.vlgmr.msra.gmra.mrb[14].mxu1 %vm104_vm0, %v1680_v15 }
 0xde8   :  { %6060 = vmatpush3.bf16.msra.mxu1 %v6724_v20  ;;  %5685 = vmatprep.mubr.msk.f32.mxu1 %vm6573_vm1, %v7811_v29 }
 0xde9   :  { %6061 = vmatprep.subr.bf16.mxu1 %v7809_v19 }
 0xdec   :  { %6063 = vmatpush3.bf16.msra.mxu1 %v6746_v28 }
 0xded   :  { %6070 = vmatprep.subr.bf16.mxu1 %v7809_v19 }
 0xdf3   :  { %v1557_v16 = vpop.permute.xlu0 %1556 }
 0xdf4   :  { %5653 = vmatmul.mubr.msk.f32.vlgmr.msra.gmra.mrb[14].mxu0 %vm104_vm0, %v1557_v16 }
 0xdf5   :  { %6054 = vmatpush3.bf16.msra.mxu0 %v6721_v18  ;;  %5674 = vmatprep.mubr.msk.f32.mxu0 %vm6573_vm1, %v7811_v29 }
 0xdf6   :  { %6055 = vmatprep.subr.bf16.mxu0 %v7809_v19 }
 0xdf9   :  { %6057 = vmatpush3.bf16.msra.mxu0 %v6742_v27 }
 0xdfa   :  { %6064 = vmatprep.subr.bf16.mxu0 %v7809_v19 }
 0xeba   :  { %v1749_v21 = vpop.f32.mrb[14].mxu1 }
 0xebb   :  { %v1750_v22 = vadd.f32 %v6794_v50, %v1749_v21  ;;  %v5665_v25 = vpop.f32.mrb[15].mxu1 }
 0xebd   :  { %1761 = vrot.lane.b32.xlu1 %v1750_v22, %s6576_s3  ;;  %v1753_v39 = vadd.f32 %v1750_v22, %v1677_v37 }
 0xebf   :  { %v5232_v42 = vmul.f32 -1.442695, %v1753_v39 }
 0xec1   :  { %6301 = vpow2.f32 %v5232_v42 }
 0xec7   :  { %v1626_v30 = vpop.f32.mrb[14].mxu0 }
 0xec8   :  { %v1627_v31 = vadd.f32 %v6788_v48, %v1626_v30  ;;  %v5654_v32 = vpop.f32.mrb[15].mxu0 }
 0xeca   :  { %1638 = vrot.lane.b32.xlu1 %v1627_v31, %s6576_s3  ;;  %v1630_v45 = vadd.f32 %v1627_v31, %v1554_v43 }
 0xecb   :  { %v6302_v49 = vpop.eup %6301 }
 0xecc   :  { %v5230_v47 = vmul.f32 -1.442695, %v1630_v45  ;;  %v1757_v51 = vadd.f32 1.0, %v6302_v49 }
 0xece   :  { %1781 = vperm.xlu1 %6230, %v1676_v33   ;;  %6303 = vpow2.f32 %v5230_v47 }
 0xecf   :  { %6305 = vrcp.f32 %v1757_v51 }
 0xed8   :  { %v6304_v48 = vpop.eup %6303 }
 0xed9   :  { %v1634_v52 = vadd.f32 1.0, %v6304_v48  ;;  %v6306_v56 = vpop.eup %6305 }
 0xeda   :  { %v1771_v12 = vsub.f32 1.0, %v6306_v56  ;;  %v1777_v15 = vmul.f32 %v6306_v56, %v6998_v4 }
 0xedb   :  { %6307 = vrcp.f32 %v1634_v52 }
 0xee5   :  { %v6308_v60 = vpop.eup %6307 }
 0xee6   :  { %v1648_v33 = vsub.f32 1.0, %v6308_v60  ;;  %v1654_v39 = vmul.f32 %v6308_v60, %v7007_v14 }
 0xf2f   :  { %v1762_v57 = vpop.permute.xlu1 %1761 }
 0xf30   :  { %v1764_v59 = vmul.f32 %v6306_v56, %v1762_v57 }
 0xf32   :  { %1766 = vrot.lane.b32.xlu0 %v1764_v59, %s6576_s3 }
 0xf3c   :  { %v1639_v61 = vpop.permute.xlu1 %1638 }
 0xf3d   :  { %v1641_v62 = vmul.f32 %v6308_v60, %v1639_v61  ;;  %v7076_v61 = vld [vmem:[%s7799_s5] ss:$0 sm:$0xff] }
 0xf3f   :  { %1643 = vrot.lane.b32.xlu0 %v1641_v62, %s6576_s3 }
 0xf43   :  { %1788 = vperm.xlu0 %6229, %v1785_v63  }
 0xf47   :  { %1658 = vperm.xlu0 %6229, %v1553_v1   ;;  %v1922_v1 = vld [vmem:[%s7795_s1 + $0x12] sm:$0x3] }
 0xf4d   :  { %v7039_v11 = vpop.permute.xlu1 %1781 }
 0xfa4   :  { %v1767_v2 = vpop.permute.xlu0 %1766 }
 0xfa5   :  { %v1769_v3 = vadd.f32 %v1767_v2, %v1677_v37 }
 0xfa7   :  { %6309 = vtanh.f32 %v1769_v3 }
 0xfb1   :  { %v6310_v6 = vpop.eup %6309  ;;  %v1644_v7 = vpop.permute.xlu0 %1643 }
 0xfb2   :  { %v1646_v9 = vadd.f32 %v1644_v7, %v1554_v43  ;;  %1773 = vrot.lane.b32.xlu1 %v6310_v6, %s6577_s28  ;;  %v1800_v6 = vld [vmem:[#allocation2 + $0xc] sm:$0x3] }
 0xfb4   :  { %6311 = vtanh.f32 %v1646_v9 }
 0xfb6   :  { %1665 = vperm.xlu1 %6230, %v1662_v8  }
 0xfbe   :  { %v6312_v10 = vpop.eup %6311 }
 0xfbf   :  { %1650 = vrot.lane.b32.xlu0 %v6312_v10, %s6577_s28 }
 0xfc2   :  { %v1789_v21 = vpop.permute.xlu0 %1788 }
 0xfc3   :  { %v1791_v25 = vmul.f32 %v1789_v21, %v6998_v4 }
 0xfc6   :  { %v7046_v32 = vpop.permute.xlu0 %1658 }
 0xfc7   :  { %7832 = vst [vmem:[#allocation22_spill] sm:$0xff] %v7046_v32 }
0x1024   :  { %v1774_v13 = vpop.permute.xlu1 %1773 }
0x1025   :  { %v1776_v16 = vmul.f32 %v1774_v13, %v1771_v12 }
0x1027   :  { %v1778_v22 = vadd.f32 %v1777_v15, %v1776_v16 }
0x1029   :  { %v1784_v30 = vmul.f32 %v7039_v11, %v1778_v22 }
0x102b   :  { %v7044_v31 = vadd.f32 %v1791_v25, %v1784_v30 }
0x102d   :  { %1925 = vrot.lane.b32.xlu1 %v7044_v31, %s6577_s28 }
0x1031   :  { %v1651_v37 = vpop.permute.xlu0 %1650 }
0x1032   :  { %v1653_v42 = vmul.f32 %v1651_v37, %v1648_v33  ;;  %v2031_v33 = vsub.f32 1.0, %v1922_v1  ;;  %v1799_v37 = vld [vmem:[%s7795_s1 + $0xc] sm:$0x3] }
0x1034   :  { %v1655_v43 = vadd.f32 %v1654_v39, %v1653_v42 }
0x1035   :  { %v1666_v45 = vpop.permute.xlu1 %1665 }
0x1036   :  { %v1661_v47 = vmul.f32 %v7046_v32, %v1655_v43  ;;  %v1668_v49 = vmul.f32 %v1666_v45, %v7007_v14 }
0x1038   :  { %v7053_v51 = vadd.f32 %v1668_v49, %v1661_v47  ;;  %v1908_v47 = vsub.f32 1.0, %v1799_v37 }
0x103a   :  { %7833 = vst [vmem:[#allocation23_spill] sm:$0xff] %v7053_v51  ;;  %1802 = vrot.lane.b32.xlu0 %v7053_v51, %s6577_s28 }
0x109f   :  { %v1926_v48 = vpop.permute.xlu1 %1925 }
0x10a0   :  { %5686 = vmatmul.mubr.msk.f32.vlgmr.msra.gmra.mrb[16].mxu1 %vm104_vm0, %v1926_v48 }
0x10a1   :  { %6072 = vmatpush3.bf16.msra.mxu1 %v6724_v20  ;;  %5707 = vmatprep.mubr.msk.f32.mxu1 %vm6573_vm1, %v7811_v29 }
0x10a2   :  { %6073 = vmatprep.subr.bf16.mxu1 %v7809_v19 }
0x10a5   :  { %6075 = vmatpush3.bf16.msra.mxu1 %v6746_v28 }
0x10a6   :  { %6082 = vmatprep.subr.bf16.mxu1 %v7809_v19 }
0x10ac   :  { %v1803_v52 = vpop.permute.xlu0 %1802 }
0x10ad   :  { %5675 = vmatmul.mubr.msk.f32.vlgmr.msra.gmra.mrb[16].mxu0 %vm104_vm0, %v1803_v52 }
0x10ae   :  { %6066 = vmatpush3.bf16.msra.mxu0 %v6721_v18  ;;  %5696 = vmatprep.mubr.msk.f32.mxu0 %vm6573_vm1, %v7811_v29 }
0x10af   :  { %6067 = vmatprep.subr.bf16.mxu0 %v7809_v19 }
0x10b2   :  { %6069 = vmatpush3.bf16.msra.mxu0 %v6742_v27 }
0x10b3   :  { %6076 = vmatprep.subr.bf16.mxu0 %v7809_v19 }
0x1173   :  { %v1995_v56 = vpop.f32.mrb[16].mxu1 }
0x1174   :  { %v1996_v57 = vadd.f32 %v6794_v50, %v1995_v56  ;;  %v5687_v59 = vpop.f32.mrb[17].mxu1  ;;  %v1923_v50 = vld [vmem:[#allocation3 + $0x12] sm:$0x3] }
0x1176   :  { %2007 = vrot.lane.b32.xlu1 %v1996_v57, %s6576_s3  ;;  %v1999_v2 = vadd.f32 %v1996_v57, %v1923_v50 }
0x1178   :  { %v5236_v3 = vmul.f32 -1.442695, %v1999_v2 }
0x117a   :  { %6313 = vpow2.f32 %v5236_v3 }
0x1180   :  { %v1872_v60 = vpop.f32.mrb[16].mxu0 }
0x1181   :  { %v1873_v62 = vadd.f32 %v7076_v61, %v1872_v60  ;;  %v5676_v63 = vpop.f32.mrb[17].mxu0 }
0x1183   :  { %1884 = vrot.lane.b32.xlu1 %v1873_v62, %s6576_s3  ;;  %v1876_v7 = vadd.f32 %v1873_v62, %v1800_v6 }
0x1184   :  { %v6314_v9 = vpop.eup %6313 }
0x1185   :  { %v5234_v8 = vmul.f32 -1.442695, %v1876_v7  ;;  %v2003_v10 = vadd.f32 1.0, %v6314_v9 }
0x1187   :  { %2027 = vperm.xlu1 %6230, %v1922_v1   ;;  %6315 = vpow2.f32 %v5234_v8 }
0x1188   :  { %6317 = vrcp.f32 %v2003_v10 }
0x1191   :  { %v6316_v12 = vpop.eup %6315 }
0x1192   :  { %v1880_v13 = vadd.f32 1.0, %v6316_v12  ;;  %v6318_v15 = vpop.eup %6317 }
0x1193   :  { %v2017_v56 = vsub.f32 1.0, %v6318_v15  ;;  %v2023_v59 = vmul.f32 %v6318_v15, %v7044_v31 }
0x1194   :  { %6319 = vrcp.f32 %v1880_v13 }
0x119e   :  { %v6320_v22 = vpop.eup %6319 }
0x119f   :  { %v1900_v8 = vmul.f32 %v6320_v22, %v7053_v51 }
0x11e8   :  { %v2008_v16 = vpop.permute.xlu1 %2007 }
0x11e9   :  { %v2010_v21 = vmul.f32 %v6318_v15, %v2008_v16 }
0x11eb   :  { %2012 = vrot.lane.b32.xlu0 %v2010_v21, %s6576_s3 }
0x11f5   :  { %v1885_v25 = vpop.permute.xlu1 %1884 }
0x11f6   :  { %v1887_v30 = vmul.f32 %v6320_v22, %v1885_v25 }
0x11f8   :  { %1889 = vrot.lane.b32.xlu0 %v1887_v30, %s6576_s3  ;;  %v7125_v30 = vld [vmem:[%s7803_s9] ss:$0 sm:$0xff] }
0x11fc   :  { %2034 = vperm.xlu0 %6229, %v2031_v33  }
0x1200   :  { %1904 = vperm.xlu0 %6229, %v1799_v37  }
0x1206   :  { %v7090_v52 = vpop.permute.xlu1 %2027 }
0x125d   :  { %v2013_v39 = vpop.permute.xlu0 %2012 }
0x125e   :  { %v2015_v42 = vadd.f32 %v2013_v39, %v1923_v50 }
0x1260   :  { %6321 = vtanh.f32 %v2015_v42 }
0x126a   :  { %v6322_v43 = vpop.eup %6321  ;;  %v1890_v45 = vpop.permute.xlu0 %1889 }
0x126b   :  { %v1892_v49 = vadd.f32 %v1890_v45, %v1800_v6  ;;  %2019 = vrot.lane.b32.xlu1 %v6322_v43, %s6577_s28  ;;  %v1894_v6 = vsub.f32 1.0, %v6320_v22  ;;  %v2168_v45 = vld [vmem:[%s7795_s1 + $0x10] sm:$0x3] }
0x126d   :  { %6323 = vtanh.f32 %v1892_v49 }
0x126f   :  { %1911 = vperm.xlu1 %6230, %v1908_v47   ;;  %v2169_v47 = vld [vmem:[#allocation3 + $0x10] sm:$0x3] }
0x1277   :  { %v6324_v48 = vpop.eup %6323 }
0x1278   :  { %1896 = vrot.lane.b32.xlu0 %v6324_v48, %s6577_s28 }
0x127b   :  { %v2035_v62 = vpop.permute.xlu0 %2034 }
0x127c   :  { %v2037_v1 = vmul.f32 %v2035_v62, %v7044_v31 }
0x127f   :  { %v7097_v3 = vpop.permute.xlu0 %1904 }
0x12dd   :  { %v2020_v57 = vpop.permute.xlu1 %2019 }
0x12de   :  { %v2022_v60 = vmul.f32 %v2020_v57, %v2017_v56  ;;  %v2046_v56 = vld [vmem:[#allocation2 + $0xe] sm:$0x3] }
0x12e0   :  { %v2024_v63 = vadd.f32 %v2023_v59, %v2022_v60 }
0x12e2   :  { %v2030_v50 = vmul.f32 %v7090_v52, %v2024_v63 }
0x12e4   :  { %v7095_v2 = vadd.f32 %v2037_v1, %v2030_v50 }
0x12e6   :  { %2171 = vrot.lane.b32.xlu1 %v7095_v2, %s6577_s28 }
0x12ea   :  { %v1897_v7 = vpop.permute.xlu0 %1896 }
0x12eb   :  { %v1899_v9 = vmul.f32 %v1897_v7, %v1894_v6 }
0x12ed   :  { %v1901_v10 = vadd.f32 %v1900_v8, %v1899_v9 }
0x12ee   :  { %v1912_v12 = vpop.permute.xlu1 %1911 }
0x12ef   :  { %v1907_v13 = vmul.f32 %v7097_v3, %v1901_v10  ;;  %v1914_v15 = vmul.f32 %v1912_v12, %v7053_v51  ;;  %v2277_v12 = vsub.f32 1.0, %v2168_v45 }
0x12f1   :  { %v7104_v16 = vadd.f32 %v1914_v15, %v1907_v13  ;;  %v2045_v13 = vld [vmem:[%s7795_s1 + $0xe] sm:$0x3] }
0x12f3   :  { %2048 = vrot.lane.b32.xlu0 %v7104_v16, %s6577_s28 }
0x1358   :  { %v2172_v21 = vpop.permute.xlu1 %2171 }
0x1359   :  { %5708 = vmatmul.mubr.msk.f32.vlgmr.msra.gmra.mrb[18].mxu1 %vm104_vm0, %v2172_v21 }
0x135a   :  { %6084 = vmatpush3.bf16.msra.mxu1 %v6724_v20  ;;  %5729 = vmatprep.mubr.msk.f32.mxu1 %vm6573_vm1, %v7811_v29 }
0x135b   :  { %6085 = vmatprep.subr.bf16.mxu1 %v7809_v19 }
0x135e   :  { %6087 = vmatpush3.bf16.msra.mxu1 %v6746_v28 }
0x135f   :  { %6094 = vmatprep.subr.bf16.mxu1 %v7809_v19 }
0x1365   :  { %v2049_v22 = vpop.permute.xlu0 %2048 }
0x1366   :  { %5697 = vmatmul.mubr.msk.f32.vlgmr.msra.gmra.mrb[18].mxu0 %vm104_vm0, %v2049_v22 }
0x1367   :  { %6078 = vmatpush3.bf16.msra.mxu0 %v6721_v18  ;;  %5718 = vmatprep.mubr.msk.f32.mxu0 %vm6573_vm1, %v7811_v29 }
0x1368   :  { %6079 = vmatprep.subr.bf16.mxu0 %v7809_v19 }
0x136b   :  { %6081 = vmatpush3.bf16.msra.mxu0 %v6742_v27 }
0x136c   :  { %6088 = vmatprep.subr.bf16.mxu0 %v7809_v19 }
0x142c   :  { %v2241_v25 = vpop.f32.mrb[18].mxu1 }
0x142d   :  { %v2242_v33 = vadd.f32 %v7125_v30, %v2241_v25  ;;  %v5709_v37 = vpop.f32.mrb[19].mxu1 }
0x142f   :  { %2253 = vrot.lane.b32.xlu1 %v2242_v33, %s6576_s3  ;;  %v2245_v49 = vadd.f32 %v2242_v33, %v2169_v47  ;;  %v2154_v33 = vsub.f32 1.0, %v2045_v13 }
0x1431   :  { %v5240_v48 = vmul.f32 -1.442695, %v2245_v49 }
0x1433   :  { %6325 = vpow2.f32 %v5240_v48 }
0x1439   :  { %v2118_v39 = vpop.f32.mrb[18].mxu0 }
0x143a   :  { %v2119_v42 = vadd.f32 %v7076_v61, %v2118_v39  ;;  %v5698_v43 = vpop.f32.mrb[19].mxu0 }
0x143c   :  { %2130 = vrot.lane.b32.xlu1 %v2119_v42, %s6576_s3  ;;  %v2122_v57 = vadd.f32 %v2119_v42, %v2046_v56 }
0x143d   :  { %v6326_v60 = vpop.eup %6325 }
0x143e   :  { %v5238_v59 = vmul.f32 -1.442695, %v2122_v57  ;;  %v2249_v62 = vadd.f32 1.0, %v6326_v60 }
0x1440   :  { %2273 = vperm.xlu1 %6230, %v2168_v45   ;;  %6327 = vpow2.f32 %v5238_v59 }
0x1441   :  { %6329 = vrcp.f32 %v2249_v62 }
0x144a   :  { %v6328_v63 = vpop.eup %6327 }
0x144b   :  { %v2126_v1 = vadd.f32 1.0, %v6328_v63  ;;  %v6330_v50 = vpop.eup %6329 }
0x144c   :  { %v2263_v43 = vsub.f32 1.0, %v6330_v50  ;;  %v2269_v49 = vmul.f32 %v6330_v50, %v7095_v2 }
0x144d   :  { %6331 = vrcp.f32 %v2126_v1 }
0x1457   :  { %v6332_v8 = vpop.eup %6331 }
0x1458   :  { %v2140_v63 = vsub.f32 1.0, %v6332_v8 }
0x14a1   :  { %v2254_v6 = vpop.permute.xlu1 %2253 }
0x14a2   :  { %v2256_v7 = vmul.f32 %v6330_v50, %v2254_v6  ;;  %v2146_v6 = vmul.f32 %v6332_v8, %v7104_v16 }
0x14a4   :  { %2258 = vrot.lane.b32.xlu0 %v2256_v7, %s6576_s3 }
0x14ae   :  { %v2131_v9 = vpop.permute.xlu1 %2130 }
0x14af   :  { %v2133_v10 = vmul.f32 %v6332_v8, %v2131_v9 }
0x14b1   :  { %2135 = vrot.lane.b32.xlu0 %v2133_v10, %s6576_s3 }
0x14b5   :  { %2280 = vperm.xlu0 %6229, %v2277_v12  }
0x14b9   :  { %2150 = vperm.xlu0 %6229, %v2045_v13  }
0x14bf   :  { %v7141_v42 = vpop.permute.xlu1 %2273 }
0x1516   :  { %v2259_v15 = vpop.permute.xlu0 %2258 }
0x1517   :  { %v2261_v21 = vadd.f32 %v2259_v15, %v2169_v47 }
0x1519   :  { %6333 = vtanh.f32 %v2261_v21 }
0x1523   :  { %v6334_v22 = vpop.eup %6333  ;;  %v2136_v25 = vpop.permute.xlu0 %2135 }
0x1524   :  { %v2138_v37 = vadd.f32 %v2136_v25, %v2046_v56  ;;  %2265 = vrot.lane.b32.xlu1 %v6334_v22, %s6577_s28 }
0x1526   :  { %6335 = vtanh.f32 %v2138_v37 }
0x1528   :  { %2157 = vperm.xlu1 %6230, %v2154_v33  }
0x1530   :  { %v6336_v39 = vpop.eup %6335 }
0x1531   :  { %2142 = vrot.lane.b32.xlu0 %v6336_v39, %s6577_s28 }
0x1534   :  { %v2281_v47 = vpop.permute.xlu0 %2280 }
0x1535   :  { %v2283_v59 = vmul.f32 %v2281_v47, %v7095_v2  ;;  %v2292_v47 = vld [vmem:[#allocation2 + $0x10] sm:$0x3] }
0x1538   :  { %v7148_v62 = vpop.permute.xlu0 %2150 }
0x1539   :  { %7834 = vst [vmem:[#allocation24_spill] sm:$0xff] %v7148_v62 }
0x1596   :  { %v2266_v45 = vpop.permute.xlu1 %2265 }
0x1597   :  { %v2268_v48 = vmul.f32 %v2266_v45, %v2263_v43  ;;  %v2414_v43 = vld [vmem:[%s7795_s1 + $0xe] sm:$0x3] }
0x1598   :  { %v2415_v45 = vld [vmem:[#allocation3 + $0xe] sm:$0x3] }
0x1599   :  { %v2270_v57 = vadd.f32 %v2269_v49, %v2268_v48 }
0x159b   :  { %v2276_v56 = vmul.f32 %v7141_v42, %v2270_v57 }
0x159d   :  { %v7146_v60 = vadd.f32 %v2283_v59, %v2276_v56 }
0x159f   :  { %2417 = vrot.lane.b32.xlu1 %v7146_v60, %s6577_s28 }
0x15a3   :  { %v2143_v1 = vpop.permute.xlu0 %2142 }
0x15a4   :  { %v2145_v7 = vmul.f32 %v2143_v1, %v2140_v63 }
0x15a6   :  { %v2147_v50 = vadd.f32 %v2146_v6, %v2145_v7 }
0x15a7   :  { %v2158_v9 = vpop.permute.xlu1 %2157 }
0x15a8   :  { %v2153_v10 = vmul.f32 %v7148_v62, %v2147_v50  ;;  %v2160_v12 = vmul.f32 %v2158_v9, %v7104_v16 }
0x15aa   :  { %v7155_v13 = vadd.f32 %v2160_v12, %v2153_v10 }
0x15ac   :  { %7835 = vst [vmem:[#allocation25_spill] sm:$0xff] %v7155_v13  ;;  %2294 = vrot.lane.b32.xlu0 %v7155_v13, %s6577_s28 }
0x1611   :  { %v2418_v15 = vpop.permute.xlu1 %2417 }
0x1612   :  { %5730 = vmatmul.mubr.msk.f32.vlgmr.msra.gmra.mrb[20].mxu1 %vm104_vm0, %v2418_v15 }
0x1613   :  { %6096 = vmatpush3.bf16.msra.mxu1 %v6724_v20  ;;  %5751 = vmatprep.mubr.msk.f32.mxu1 %vm6573_vm1, %v7811_v29 }
0x1614   :  { %6097 = vmatprep.subr.bf16.mxu1 %v7809_v19 }
0x1617   :  { %6099 = vmatpush3.bf16.msra.mxu1 %v6746_v28 }
0x1618   :  { %6106 = vmatprep.subr.bf16.mxu1 %v7809_v19 }
0x161e   :  { %v2295_v8 = vpop.permute.xlu0 %2294 }
0x161f   :  { %5719 = vmatmul.mubr.msk.f32.vlgmr.msra.gmra.mrb[20].mxu0 %vm104_vm0, %v2295_v8  ;;  %v2523_v8 = vsub.f32 1.0, %v2414_v43 }
0x1620   :  { %6090 = vmatpush3.bf16.msra.mxu0 %v6721_v18  ;;  %5740 = vmatprep.mubr.msk.f32.mxu0 %vm6573_vm1, %v7811_v29 }
0x1621   :  { %6091 = vmatprep.subr.bf16.mxu0 %v7809_v19 }
0x1624   :  { %6093 = vmatpush3.bf16.msra.mxu0 %v6742_v27 }
0x1625   :  { %6100 = vmatprep.subr.bf16.mxu0 %v7809_v19 }
0x16e5   :  { %v2487_v21 = vpop.f32.mrb[20].mxu1 }
0x16e6   :  { %v2488_v22 = vadd.f32 %v7125_v30, %v2487_v21  ;;  %v5731_v25 = vpop.f32.mrb[21].mxu1  ;;  %v2291_v21 = vld [vmem:[%s7795_s1 + $0x10] sm:$0x3] }
0x16e8   :  { %2499 = vrot.lane.b32.xlu1 %v2488_v22, %s6576_s3  ;;  %v2491_v49 = vadd.f32 %v2488_v22, %v2415_v45 }
0x16ea   :  { %v5244_v48 = vmul.f32 -1.442695, %v2491_v49 }
0x16ec   :  { %6337 = vpow2.f32 %v5244_v48 }
0x16f2   :  { %v2364_v33 = vpop.f32.mrb[20].mxu0 }
0x16f3   :  { %v2365_v37 = vadd.f32 %v7076_v61, %v2364_v33  ;;  %v5720_v39 = vpop.f32.mrb[21].mxu0 }
0x16f4   :  { %v2400_v39 = vsub.f32 1.0, %v2291_v21 }
0x16f5   :  { %2376 = vrot.lane.b32.xlu1 %v2365_v37, %s6576_s3  ;;  %v2368_v57 = vadd.f32 %v2365_v37, %v2292_v47 }
0x16f6   :  { %v6338_v56 = vpop.eup %6337 }
0x16f7   :  { %v5242_v59 = vmul.f32 -1.442695, %v2368_v57  ;;  %v2495_v63 = vadd.f32 1.0, %v6338_v56 }
0x16f9   :  { %2519 = vperm.xlu1 %6230, %v2414_v43   ;;  %6339 = vpow2.f32 %v5242_v59 }
0x16fa   :  { %6341 = vrcp.f32 %v2495_v63 }
0x1703   :  { %v6340_v1 = vpop.eup %6339 }
0x1704   :  { %v2372_v6 = vadd.f32 1.0, %v6340_v1  ;;  %v6342_v7 = vpop.eup %6341 }
0x1705   :  { %v2509_v57 = vsub.f32 1.0, %v6342_v7  ;;  %v2515_v56 = vmul.f32 %v6342_v7, %v7146_v60 }
0x1706   :  { %6343 = vrcp.f32 %v2372_v6 }
0x1710   :  { %v6344_v10 = vpop.eup %6343 }
0x175a   :  { %v2500_v50 = vpop.permute.xlu1 %2499 }
0x175b   :  { %v2502_v9 = vmul.f32 %v6342_v7, %v2500_v50 }
0x175d   :  { %2504 = vrot.lane.b32.xlu0 %v2502_v9, %s6576_s3 }
0x1767   :  { %v2377_v12 = vpop.permute.xlu1 %2376 }
0x1768   :  { %v2379_v15 = vmul.f32 %v6344_v10, %v2377_v12  ;;  %v2386_v12 = vsub.f32 1.0, %v6344_v10 }
0x176a   :  { %2381 = vrot.lane.b32.xlu0 %v2379_v15, %s6576_s3 }
0x176e   :  { %2526 = vperm.xlu0 %6229, %v2523_v8   ;;  %v2392_v8 = vmul.f32 %v6344_v10, %v7155_v13 }
0x1772   :  { %2396 = vperm.xlu0 %6229, %v2291_v21  }
0x1778   :  { %v7187_v48 = vpop.permute.xlu1 %2519 }
0x17cf   :  { %v2505_v22 = vpop.permute.xlu0 %2504 }
0x17d0   :  { %v2507_v25 = vadd.f32 %v2505_v22, %v2415_v45 }
0x17d2   :  { %6345 = vtanh.f32 %v2507_v25 }
0x17dc   :  { %v6346_v33 = vpop.eup %6345  ;;  %v2382_v37 = vpop.permute.xlu0 %2381 }
0x17dd   :  { %v2384_v49 = vadd.f32 %v2382_v37, %v2292_v47  ;;  %2511 = vrot.lane.b32.xlu1 %v6346_v33, %s6577_s28 }
0x17df   :  { %6347 = vtanh.f32 %v2384_v49 }
0x17e1   :  { %2403 = vperm.xlu1 %6230, %v2400_v39  }
0x17e9   :  { %v6348_v43 = vpop.eup %6347 }
0x17ea   :  { %2388 = vrot.lane.b32.xlu0 %v6348_v43, %s6577_s28 }
0x17ed   :  { %v2527_v45 = vpop.permute.xlu0 %2526 }
0x17ee   :  { %v2529_v6 = vmul.f32 %v2527_v45, %v7146_v60  ;;  %v2660_v45 = vld [vmem:[%s7795_s1 + $0xc] sm:$0x3] }
0x17f1   :  { %v7194_v9 = vpop.permute.xlu0 %2396 }
0x184f   :  { %v2512_v59 = vpop.permute.xlu1 %2511 }
0x1850   :  { %v2514_v63 = vmul.f32 %v2512_v59, %v2509_v57 }
0x1852   :  { %v2516_v1 = vadd.f32 %v2515_v56, %v2514_v63 }
0x1854   :  { %v2522_v47 = vmul.f32 %v7187_v48, %v2516_v1  ;;  %v2661_v1 = vld [vmem:[#allocation3 + $0xc] sm:$0x3] }
0x1856   :  { %v7192_v50 = vadd.f32 %v2529_v6, %v2522_v47 }
0x1858   :  { %2663 = vrot.lane.b32.xlu1 %v7192_v50, %s6577_s28 }
0x185c   :  { %v2389_v15 = vpop.permute.xlu0 %2388 }
0x185d   :  { %v2391_v21 = vmul.f32 %v2389_v15, %v2386_v12  ;;  %v2538_v12 = vld [vmem:[#allocation2 + $0x12] sm:$0x3] }
0x185f   :  { %v2393_v7 = vadd.f32 %v2392_v8, %v2391_v21 }
0x1860   :  { %v2404_v22 = vpop.permute.xlu1 %2403 }
0x1861   :  { %v2399_v25 = vmul.f32 %v7194_v9, %v2393_v7  ;;  %v2406_v33 = vmul.f32 %v2404_v22, %v7155_v13 }
0x1863   :  { %v7201_v37 = vadd.f32 %v2406_v33, %v2399_v25 }
0x1865   :  { %2540 = vrot.lane.b32.xlu0 %v7201_v37, %s6577_s28 }
0x18ca   :  { %v2664_v39 = vpop.permute.xlu1 %2663 }
0x18cb   :  { %5752 = vmatmul.mubr.msk.f32.vlgmr.msra.gmra.mrb[22].mxu1 %vm104_vm0, %v2664_v39 }
0x18cc   :  { %6108 = vmatpush3.bf16.msra.mxu1 %v6724_v20  ;;  %5773 = vmatprep.mubr.msk.f32.mxu1 %vm6573_vm1, %v7811_v29 }
0x18cd   :  { %6109 = vmatprep.subr.bf16.mxu1 %v7809_v19 }
0x18d0   :  { %6111 = vmatpush3.bf16.msra.mxu1 %v6746_v28 }
0x18d1   :  { %6118 = vmatprep.subr.bf16.mxu1 %v7809_v19 }
0x18d7   :  { %v2541_v10 = vpop.permute.xlu0 %2540 }
0x18d8   :  { %5741 = vmatmul.mubr.msk.f32.vlgmr.msra.gmra.mrb[22].mxu0 %vm104_vm0, %v2541_v10 }
0x18d9   :  { %6102 = vmatpush3.bf16.msra.mxu0 %v6721_v18  ;;  %5762 = vmatprep.mubr.msk.f32.mxu0 %vm6573_vm1, %v7811_v29 }
0x18da   :  { %6103 = vmatprep.subr.bf16.mxu0 %v7809_v19 }
0x18dd   :  { %6105 = vmatpush3.bf16.msra.mxu0 %v6742_v27 }
0x18de   :  { %6112 = vmatprep.subr.bf16.mxu0 %v7809_v19 }
0x199e   :  { %v2733_v49 = vpop.f32.mrb[22].mxu1 }
0x199f   :  { %v2734_v43 = vadd.f32 %v7125_v30, %v2733_v49  ;;  %v5753_v57 = vpop.f32.mrb[23].mxu1 }
0x19a1   :  { %2745 = vrot.lane.b32.xlu1 %v2734_v43, %s6576_s3  ;;  %v2737_v6 = vadd.f32 %v2734_v43, %v2661_v1 }
0x19a3   :  { %v5248_v47 = vmul.f32 -1.442695, %v2737_v6 }
0x19a5   :  { %6349 = vpow2.f32 %v5248_v47 }
0x19ab   :  { %v2610_v59 = vpop.f32.mrb[22].mxu0 }
0x19ac   :  { %v2611_v56 = vadd.f32 %v7076_v61, %v2610_v59  ;;  %v5742_v63 = vpop.f32.mrb[23].mxu0  ;;  %v2769_v59 = vsub.f32 1.0, %v2660_v45 }
0x19ae   :  { %2622 = vrot.lane.b32.xlu1 %v2611_v56, %s6576_s3  ;;  %v2614_v15 = vadd.f32 %v2611_v56, %v2538_v12  ;;  %v2537_v56 = vld [vmem:[%s7795_s1 + $0x12] sm:$0x3] }
0x19af   :  { %v6350_v21 = vpop.eup %6349 }
0x19b0   :  { %v5246_v8 = vmul.f32 -1.442695, %v2614_v15  ;;  %v2741_v7 = vadd.f32 1.0, %v6350_v21 }
0x19b2   :  { %2765 = vperm.xlu1 %6230, %v2660_v45   ;;  %6351 = vpow2.f32 %v5246_v8  ;;  %v2646_v8 = vsub.f32 1.0, %v2537_v56 }
0x19b3   :  { %6353 = vrcp.f32 %v2741_v7 }
0x19bc   :  { %v6352_v22 = vpop.eup %6351 }
0x19bd   :  { %v2618_v25 = vadd.f32 1.0, %v6352_v22  ;;  %v6354_v33 = vpop.eup %6353 }
0x19be   :  { %v2755_v22 = vsub.f32 1.0, %v6354_v33 }
0x19bf   :  { %6355 = vrcp.f32 %v2618_v25 }
0x19c9   :  { %v6356_v49 = vpop.eup %6355 }
0x1a13   :  { %v2746_v39 = vpop.permute.xlu1 %2745 }
0x1a14   :  { %v2748_v10 = vmul.f32 %v6354_v33, %v2746_v39  ;;  %v2761_v39 = vmul.f32 %v6354_v33, %v7192_v50 }
0x1a16   :  { %2750 = vrot.lane.b32.xlu0 %v2748_v10, %s6576_s3 }
0x1a20   :  { %v2623_v57 = vpop.permute.xlu1 %2622 }
0x1a21   :  { %v2625_v43 = vmul.f32 %v6356_v49, %v2623_v57 }
0x1a23   :  { %2627 = vrot.lane.b32.xlu0 %v2625_v43, %s6576_s3 }
0x1a27   :  { %2772 = vperm.xlu0 %6229, %v2769_v59  }
0x1a2b   :  { %2642 = vperm.xlu0 %6229, %v2537_v56  }
0x1a31   :  { %v7233_v7 = vpop.permute.xlu1 %2765 }
0x1a88   :  { %v2751_v63 = vpop.permute.xlu0 %2750 }
0x1a89   :  { %v2753_v6 = vadd.f32 %v2751_v63, %v2661_v1  ;;  %v2632_v63 = vsub.f32 1.0, %v6356_v49 }
0x1a8b   :  { %6357 = vtanh.f32 %v2753_v6 }
0x1a95   :  { %v6358_v47 = vpop.eup %6357  ;;  %v2628_v15 = vpop.permute.xlu0 %2627 }
0x1a96   :  { %v2630_v21 = vadd.f32 %v2628_v15, %v2538_v12  ;;  %2757 = vrot.lane.b32.xlu1 %v6358_v47, %s6577_s28  ;;  %v2638_v47 = vmul.f32 %v6356_v49, %v7201_v37 }
0x1a98   :  { %6359 = vtanh.f32 %v2630_v21 }
0x1a9a   :  { %2649 = vperm.xlu1 %6230, %v2646_v8  }
0x1aa2   :  { %v6360_v45 = vpop.eup %6359 }
0x1aa3   :  { %2634 = vrot.lane.b32.xlu0 %v6360_v45, %s6577_s28 }
0x1aa6   :  { %v2773_v1 = vpop.permute.xlu0 %2772 }
0x1aa7   :  { %v2775_v43 = vmul.f32 %v2773_v1, %v7192_v50 }
0x1aaa   :  { %v7240_v56 = vpop.permute.xlu0 %2642 }
0x1aab   :  { %7836 = vst [vmem:[#allocation26_spill] sm:$0xff] %v7240_v56 }
0x1b08   :  { %v2758_v25 = vpop.permute.xlu1 %2757 }
0x1b09   :  { %v2760_v10 = vmul.f32 %v2758_v25, %v2755_v22 }
0x1b0b   :  { %v2762_v57 = vadd.f32 %v2761_v39, %v2760_v10 }
0x1b0d   :  { %v2768_v12 = vmul.f32 %v7233_v7, %v2762_v57 }
0x1b0f   :  { %v7238_v59 = vadd.f32 %v2775_v43, %v2768_v12 }
0x1b11   :  { %2909 = vrot.lane.b32.xlu1 %v7238_v59, %s6577_s28 }
0x1b15   :  { %v2635_v6 = vpop.permute.xlu0 %2634 }
0x1b16   :  { %v2637_v15 = vmul.f32 %v2635_v6, %v2632_v63  ;;  %v2906_v63 = vld [vmem:[%s7795_s1 + $0xa] sm:$0x3] }
0x1b17   :  { %v2907_v6 = vld [vmem:[#allocation3 + $0xa] sm:$0x3] }
0x1b18   :  { %v2639_v33 = vadd.f32 %v2638_v47, %v2637_v15 }
0x1b19   :  { %v2650_v8 = vpop.permute.xlu1 %2649 }
0x1b1a   :  { %v2645_v21 = vmul.f32 %v7240_v56, %v2639_v33  ;;  %v2652_v45 = vmul.f32 %v2650_v8, %v7201_v37  ;;  %v2784_v33 = vld [vmem:[#allocation2 + $0x14] sm:$0x3] }
0x1b1c   :  { %v7247_v22 = vadd.f32 %v2652_v45, %v2645_v21 }
0x1b1e   :  { %7837 = vst [vmem:[#allocation27_spill] sm:$0xff] %v7247_v22  ;;  %2786 = vrot.lane.b32.xlu0 %v7247_v22, %s6577_s28 }
0x1b83   :  { %v2910_v25 = vpop.permute.xlu1 %2909 }
0x1b84   :  { %5774 = vmatmul.mubr.msk.f32.vlgmr.msra.gmra.mrb[24].mxu1 %vm104_vm0, %v2910_v25 }
0x1b85   :  { %6120 = vmatpush3.bf16.msra.mxu1 %v6724_v20  ;;  %5795 = vmatprep.mubr.msk.f32.mxu1 %vm6573_vm1, %v7811_v29 }
0x1b86   :  { %6121 = vmatprep.subr.bf16.mxu1 %v7809_v19 }
0x1b89   :  { %6123 = vmatpush3.bf16.msra.mxu1 %v6746_v28 }
0x1b8a   :  { %6130 = vmatprep.subr.bf16.mxu1 %v7809_v19 }
0x1b90   :  { %v2787_v49 = vpop.permute.xlu0 %2786 }
0x1b91   :  { %5763 = vmatmul.mubr.msk.f32.vlgmr.msra.gmra.mrb[24].mxu0 %vm104_vm0, %v2787_v49 }
0x1b92   :  { %6114 = vmatpush3.bf16.msra.mxu0 %v6721_v18  ;;  %5784 = vmatprep.mubr.msk.f32.mxu0 %vm6573_vm1, %v7811_v29 }
0x1b93   :  { %6115 = vmatprep.subr.bf16.mxu0 %v7809_v19 }
0x1b96   :  { %6117 = vmatpush3.bf16.msra.mxu0 %v6742_v27 }
0x1b97   :  { %6124 = vmatprep.subr.bf16.mxu0 %v7809_v19 }
0x1c57   :  { %v2979_v39 = vpop.f32.mrb[24].mxu1 }
0x1c58   :  { %v2980_v10 = vadd.f32 %v7125_v30, %v2979_v39  ;;  %v5775_v1 = vpop.f32.mrb[25].mxu1 }
0x1c5a   :  { %2991 = vrot.lane.b32.xlu1 %v2980_v10, %s6576_s3  ;;  %v2983_v47 = vadd.f32 %v2980_v10, %v2907_v6 }
0x1c5c   :  { %v5252_v15 = vmul.f32 -1.442695, %v2983_v47  ;;  %v3015_v47 = vsub.f32 1.0, %v2906_v63 }
0x1c5e   :  { %6361 = vpow2.f32 %v5252_v15 }
0x1c64   :  { %v2856_v57 = vpop.f32.mrb[24].mxu0 }
0x1c65   :  { %v2857_v43 = vadd.f32 %v7076_v61, %v2856_v57  ;;  %v5764_v12 = vpop.f32.mrb[25].mxu0 }
0x1c67   :  { %2868 = vrot.lane.b32.xlu1 %v2857_v43, %s6576_s3  ;;  %v2860_v8 = vadd.f32 %v2857_v43, %v2784_v33  ;;  %v2783_v43 = vld [vmem:[%s7795_s1 + $0x14] sm:$0x3] }
0x1c68   :  { %v6362_v45 = vpop.eup %6361 }
0x1c69   :  { %v5250_v21 = vmul.f32 -1.442695, %v2860_v8  ;;  %v2987_v25 = vadd.f32 1.0, %v6362_v45 }
0x1c6b   :  { %3011 = vperm.xlu1 %6230, %v2906_v63   ;;  %6363 = vpow2.f32 %v5250_v21 }
0x1c6c   :  { %6365 = vrcp.f32 %v2987_v25  ;;  %v2892_v25 = vsub.f32 1.0, %v2783_v43 }
0x1c75   :  { %v6364_v49 = vpop.eup %6363 }
0x1c76   :  { %v2864_v39 = vadd.f32 1.0, %v6364_v49  ;;  %v6366_v1 = vpop.eup %6365 }
0x1c78   :  { %6367 = vrcp.f32 %v2864_v39  ;;  %v3001_v39 = vsub.f32 1.0, %v6366_v1 }
0x1c82   :  { %v6368_v19 = vpop.eup %6367 }
0x1ccc   :  { %v2992_v57 = vpop.permute.xlu1 %2991 }
0x1ccd   :  { %v2994_v12 = vmul.f32 %v6366_v1, %v2992_v57 }
0x1ccf   :  { %2996 = vrot.lane.b32.xlu0 %v2994_v12, %s6576_s3  ;;  %v3007_v12 = vmul.f32 %v6366_v1, %v7238_v59 }
0x1cd9   :  { %v2869_v29 = vpop.permute.xlu1 %2868 }
0x1cda   :  { %v2871_v10 = vmul.f32 %v6368_v19, %v2869_v29 }
0x1cdc   :  { %2873 = vrot.lane.b32.xlu0 %v2871_v10, %s6576_s3 }
0x1ce0   :  { %3018 = vperm.xlu0 %6229, %v3015_v47  }
0x1ce4   :  { %2888 = vperm.xlu0 %6229, %v2783_v43  }
0x1cea   :  { %v7279_v63 = vpop.permute.xlu1 %3011 }
0x1d41   :  { %v2997_v15 = vpop.permute.xlu0 %2996 }
0x1d42   :  { %v2999_v8 = vadd.f32 %v2997_v15, %v2907_v6 }
0x1d44   :  { %6369 = vtanh.f32 %v2999_v8 }
0x1d4e   :  { %v6370_v21 = vpop.eup %6369  ;;  %v2874_v45 = vpop.permute.xlu0 %2873 }
0x1d4f   :  { %v2876_v49 = vadd.f32 %v2874_v45, %v2784_v33  ;;  %3003 = vrot.lane.b32.xlu1 %v6370_v21, %s6577_s28  ;;  %v2878_v21 = vsub.f32 1.0, %v6368_v19 }
0x1d51   :  { %6371 = vtanh.f32 %v2876_v49 }
0x1d53   :  { %2895 = vperm.xlu1 %6230, %v2892_v25   ;;  %v2884_v25 = vmul.f32 %v6368_v19, %v7247_v22  ;;  %v7839_v19 = vmov 0.0|0.0  }
0x1d5b   :  { %v6372_v29 = vpop.eup %6371 }
0x1d5c   :  { %2880 = vrot.lane.b32.xlu0 %v6372_v29, %s6577_s28 }
0x1d5f   :  { %v3019_v6 = vpop.permute.xlu0 %3018 }
0x1d60   :  { %v3021_v15 = vmul.f32 %v3019_v6, %v7238_v59  ;;  %v7838_v6 = vmov 0.0  }
0x1d63   :  { %v7286_v8 = vpop.permute.xlu0 %2888 }
0x1dc1   :  { %v3004_v57 = vpop.permute.xlu1 %3003 }
0x1dc2   :  { %v3006_v10 = vmul.f32 %v3004_v57, %v3001_v39 }
0x1dc4   :  { %v3008_v47 = vadd.f32 %v3007_v12, %v3006_v10 }
0x1dc6   :  { %v3014_v33 = vmul.f32 %v7279_v63, %v3008_v47 }
0x1dc8   :  { %v7284_v43 = vadd.f32 %v3021_v15, %v3014_v33 }
0x1dca   :  { %3155 = vrot.lane.b32.xlu1 %v7284_v43, %s6577_s28 }
0x1dce   :  { %v2881_v45 = vpop.permute.xlu0 %2880 }
0x1dcf   :  { %v2883_v49 = vmul.f32 %v2881_v45, %v2878_v21 }
0x1dd1   :  { %v2885_v1 = vadd.f32 %v2884_v25, %v2883_v49 }
0x1dd2   :  { %v2896_v29 = vpop.permute.xlu1 %2895 }
0x1dd3   :  { %v2891_v39 = vmul.f32 %v7286_v8, %v2885_v1  ;;  %v2898_v57 = vmul.f32 %v2896_v29, %v7247_v22  ;;  %v3152_v1 = vld [vmem:[%s7795_s1 + $0x8] sm:$0x3] }
0x1dd4   :  { %v3153_v29 = vld [vmem:[#allocation3 + $0x8] sm:$0x3] }
0x1dd5   :  { %v7293_v12 = vadd.f32 %v2898_v57, %v2891_v39 }
0x1dd7   :  { %3032 = vrot.lane.b32.xlu0 %v7293_v12, %s6577_s28 }
0x1e3c   :  { %v3156_v10 = vpop.permute.xlu1 %3155 }
0x1e3d   :  { %5796 = vmatmul.mubr.msk.f32.vlgmr.msra.gmra.mrb[26].mxu1 %vm104_vm0, %v3156_v10  ;;  %v3030_v10 = vld [vmem:[#allocation2 + $0x16] sm:$0x3] }
0x1e3e   :  { %6132 = vmatpush3.bf16.msra.mxu1 %v6724_v20  ;;  %5817 = vmatprep.mubr.msk.f32.mxu1 %vm6573_vm1, %v7838_v6 }
0x1e3f   :  { %6133 = vmatprep.subr.bf16.mxu1 %v7839_v19 }
0x1e42   :  { %6135 = vmatpush3.bf16.msra.mxu1 %v6746_v28 }
0x1e43   :  { %6142 = vmatprep.subr.bf16.mxu1 %v7839_v19 }
0x1e49   :  { %v3033_v47 = vpop.permute.xlu0 %3032 }
0x1e4a   :  { %5785 = vmatmul.mubr.msk.f32.vlgmr.msra.gmra.mrb[26].mxu0 %vm104_vm0, %v3033_v47 }
0x1e4b   :  { %6126 = vmatpush3.bf16.msra.mxu0 %v6721_v18  ;;  %5806 = vmatprep.mubr.msk.f32.mxu0 %vm6573_vm1, %v7838_v6 }
0x1e4c   :  { %6127 = vmatprep.subr.bf16.mxu0 %v7839_v19 }
0x1e4f   :  { %6129 = vmatpush3.bf16.msra.mxu0 %v6742_v27 }
0x1e50   :  { %6136 = vmatprep.subr.bf16.mxu0 %v7839_v19 }
0x1f10   :  { %v3225_v15 = vpop.f32.mrb[26].mxu1 }
0x1f11   :  { %v3226_v33 = vadd.f32 %v7125_v30, %v3225_v15  ;;  %v5797_v21 = vpop.f32.mrb[27].mxu1 }
0x1f13   :  { %3237 = vrot.lane.b32.xlu1 %v3226_v33, %s6576_s3  ;;  %v3229_v39 = vadd.f32 %v3226_v33, %v3153_v29 }
0x1f15   :  { %v5256_v57 = vmul.f32 -1.442695, %v3229_v39  ;;  %v3261_v39 = vsub.f32 1.0, %v3152_v1 }
0x1f17   :  { %6373 = vpow2.f32 %v5256_v57 }
0x1f1d   :  { %v3102_v45 = vpop.f32.mrb[26].mxu0 }
0x1f1e   :  { %v3103_v25 = vadd.f32 %v7076_v61, %v3102_v45  ;;  %v5786_v49 = vpop.f32.mrb[27].mxu0 }
0x1f20   :  { %3114 = vrot.lane.b32.xlu1 %v3103_v25, %s6576_s3  ;;  %v3106_v47 = vadd.f32 %v3103_v25, %v3030_v10  ;;  %v3029_v25 = vld [vmem:[%s7795_s1 + $0x16] sm:$0x3] }
0x1f21   :  { %v6374_v21 = vpop.eup %6373 }
0x1f22   :  { %v5254_v15 = vmul.f32 -1.442695, %v3106_v47  ;;  %v3233_v22 = vadd.f32 1.0, %v6374_v21 }
0x1f24   :  { %3257 = vperm.xlu1 %6230, %v3152_v1   ;;  %6375 = vpow2.f32 %v5254_v15  ;;  %v3138_v15 = vsub.f32 1.0, %v3029_v25 }
0x1f25   :  { %6377 = vrcp.f32 %v3233_v22 }
0x1f2e   :  { %v6376_v45 = vpop.eup %6375 }
0x1f2f   :  { %v3110_v49 = vadd.f32 1.0, %v6376_v45  ;;  %v6378_v56 = vpop.eup %6377 }
0x1f30   :  { %v3247_v1 = vsub.f32 1.0, %v6378_v56 }
0x1f31   :  { %6379 = vrcp.f32 %v3110_v49  ;;  %v3253_v49 = vmul.f32 %v6378_v56, %v7284_v43 }
0x1f3b   :  { %v6380_v51 = vpop.eup %6379 }
0x1f85   :  { %v3238_v13 = vpop.permute.xlu1 %3237 }
0x1f86   :  { %v3240_v62 = vmul.f32 %v6378_v56, %v3238_v13 }
0x1f88   :  { %3242 = vrot.lane.b32.xlu0 %v3240_v62, %s6576_s3 }
0x1f92   :  { %v3115_v32 = vpop.permute.xlu1 %3114 }
0x1f93   :  { %v3117_v33 = vmul.f32 %v6380_v51, %v3115_v32 }
0x1f95   :  { %3119 = vrot.lane.b32.xlu0 %v3117_v33, %s6576_s3 }
0x1f99   :  { %3264 = vperm.xlu0 %6229, %v3261_v39  }
0x1f9d   :  { %3134 = vperm.xlu0 %6229, %v3029_v25  }
0x1fa3   :  { %v7325_v62 = vpop.permute.xlu1 %3257 }
0x1ffa   :  { %v3243_v22 = vpop.permute.xlu0 %3242 }
0x1ffb   :  { %v3245_v57 = vadd.f32 %v3243_v22, %v3153_v29 }
0x1ffd   :  { %6381 = vtanh.f32 %v3245_v57 }
0x2007   :  { %v6382_v47 = vpop.eup %6381  ;;  %v3120_v13 = vpop.permute.xlu0 %3119 }
0x2008   :  { %v3122_v21 = vadd.f32 %v3120_v13, %v3030_v10  ;;  %3249 = vrot.lane.b32.xlu1 %v6382_v47, %s6577_s28  ;;  %v3124_v47 = vsub.f32 1.0, %v6380_v51 }
0x200a   :  { %6383 = vtanh.f32 %v3122_v21 }
0x200c   :  { %3141 = vperm.xlu1 %6230, %v3138_v15   ;;  %v3130_v15 = vmul.f32 %v6380_v51, %v7293_v12 }
0x2014   :  { %v6384_v32 = vpop.eup %6383 }
0x2015   :  { %3126 = vrot.lane.b32.xlu0 %v6384_v32, %s6577_s28 }
0x2018   :  { %v3265_v29 = vpop.permute.xlu0 %3264 }
0x2019   :  { %v3267_v22 = vmul.f32 %v3265_v29, %v7284_v43 }
0x201c   :  { %v7332_v57 = vpop.permute.xlu0 %3134 }
0x201d   :  { %7840 = vst [vmem:[#allocation28_spill] sm:$0xff] %v7332_v57 }
0x207a   :  { %v3250_v45 = vpop.permute.xlu1 %3249 }
0x207b   :  { %v3252_v33 = vmul.f32 %v3250_v45, %v3247_v1 }
0x207d   :  { %v3254_v39 = vadd.f32 %v3253_v49, %v3252_v33 }
0x207f   :  { %v3260_v10 = vmul.f32 %v7325_v62, %v3254_v39 }
0x2081   :  { %v7330_v25 = vadd.f32 %v3267_v22, %v3260_v10 }
0x2083   :  { %3401 = vrot.lane.b32.xlu1 %v7330_v25, %s6577_s28 }
0x2087   :  { %v3127_v13 = vpop.permute.xlu0 %3126 }
0x2088   :  { %v3129_v21 = vmul.f32 %v3127_v13, %v3124_v47 }
0x208a   :  { %v3131_v56 = vadd.f32 %v3130_v15, %v3129_v21  ;;  %v3398_v15 = vld [vmem:[%s7795_s1 + $0x6] sm:$0x3] }
0x208b   :  { %v3142_v32 = vpop.permute.xlu1 %3141  ;;  %v3399_v21 = vld [vmem:[#allocation3 + $0x6] sm:$0x3] }
0x208c   :  { %v3137_v1 = vmul.f32 %v7332_v57, %v3131_v56  ;;  %v3144_v45 = vmul.f32 %v3142_v32, %v7293_v12 }
0x208e   :  { %v7339_v49 = vadd.f32 %v3144_v45, %v3137_v1  ;;  %v3276_v1 = vld [vmem:[#allocation2 + $0x18] sm:$0x3] }
0x2090   :  { %7841 = vst [vmem:[#allocation29_spill] sm:$0xff] %v7339_v49  ;;  %3278 = vrot.lane.b32.xlu0 %v7339_v49, %s6577_s28 }
0x20f5   :  { %v3402_v33 = vpop.permute.xlu1 %3401 }
0x20f6   :  { %5818 = vmatmul.mubr.msk.f32.vlgmr.msra.gmra.mrb[28].mxu1 %vm104_vm0, %v3402_v33 }
0x20f7   :  { %6144 = vmatpush3.bf16.msra.mxu1 %v6724_v20  ;;  %5839 = vmatprep.mubr.msk.f32.mxu1 %vm6573_vm1, %v7838_v6 }
0x20f8   :  { %6145 = vmatprep.subr.bf16.mxu1 %v7839_v19 }
0x20fb   :  { %6147 = vmatpush3.bf16.msra.mxu1 %v6746_v28 }
0x20fc   :  { %6154 = vmatprep.subr.bf16.mxu1 %v7839_v19 }
0x2102   :  { %v3279_v51 = vpop.permute.xlu0 %3278 }
0x2103   :  { %5807 = vmatmul.mubr.msk.f32.vlgmr.msra.gmra.mrb[28].mxu0 %vm104_vm0, %v3279_v51 }
0x2104   :  { %6138 = vmatpush3.bf16.msra.mxu0 %v6721_v18  ;;  %5828 = vmatprep.mubr.msk.f32.mxu0 %vm6573_vm1, %v7838_v6 }
0x2105   :  { %6139 = vmatprep.subr.bf16.mxu0 %v7839_v19 }
0x2108   :  { %6141 = vmatpush3.bf16.msra.mxu0 %v6742_v27 }
0x2109   :  { %6148 = vmatprep.subr.bf16.mxu0 %v7839_v19 }
0x21c9   :  { %v3471_v29 = vpop.f32.mrb[28].mxu1 }
0x21ca   :  { %v3472_v39 = vadd.f32 %v7125_v30, %v3471_v29  ;;  %v5819_v22 = vpop.f32.mrb[29].mxu1 }
0x21cc   :  { %3483 = vrot.lane.b32.xlu1 %v3472_v39, %s6576_s3  ;;  %v3475_v56 = vadd.f32 %v3472_v39, %v3399_v21 }
0x21ce   :  { %v5260_v32 = vmul.f32 -1.442695, %v3475_v56  ;;  %v3507_v56 = vsub.f32 1.0, %v3398_v15 }
0x21d0   :  { %6385 = vpow2.f32 %v5260_v32 }
0x21d6   :  { %v3348_v10 = vpop.f32.mrb[28].mxu0 }
0x21d7   :  { %v3349_v47 = vadd.f32 %v7076_v61, %v3348_v10  ;;  %v5808_v13 = vpop.f32.mrb[29].mxu0 }
0x21d9   :  { %3360 = vrot.lane.b32.xlu1 %v3349_v47, %s6576_s3  ;;  %v3352_v45 = vadd.f32 %v3349_v47, %v3276_v1  ;;  %v3275_v47 = vld [vmem:[%s7795_s1 + $0x18] sm:$0x3] }
0x21da   :  { %v6386_v51 = vpop.eup %6385 }
0x21db   :  { %v5258_v33 = vmul.f32 -1.442695, %v3352_v45  ;;  %v3479_v29 = vadd.f32 1.0, %v6386_v51 }
0x21dd   :  { %3503 = vperm.xlu1 %6230, %v3398_v15   ;;  %6387 = vpow2.f32 %v5258_v33 }
0x21de   :  { %6389 = vrcp.f32 %v3479_v29  ;;  %v3384_v29 = vsub.f32 1.0, %v3275_v47 }
0x21e7   :  { %v6388_v61 = vpop.eup %6387 }
0x21e8   :  { %v3356_v22 = vadd.f32 1.0, %v6388_v61  ;;  %v6390_v10 = vpop.eup %6389 }
0x21e9   :  { %v3493_v15 = vsub.f32 1.0, %v6390_v10 }
0x21ea   :  { %6391 = vrcp.f32 %v3356_v22 }
0x21f4   :  { %v6392_v0 = vpop.eup %6391 }
0x223e   :  { %v3484_v13 = vpop.permute.xlu1 %3483 }
0x223f   :  { %v3486_v57 = vmul.f32 %v6390_v10, %v3484_v13  ;;  %v3499_v13 = vmul.f32 %v6390_v10, %v7330_v25 }
0x2241   :  { %3488 = vrot.lane.b32.xlu0 %v3486_v57, %s6576_s3 }
0x224b   :  { %v3361_v55 = vpop.permute.xlu1 %3360 }
0x224c   :  { %v3363_v39 = vmul.f32 %v6392_v0, %v3361_v55 }
0x224e   :  { %3365 = vrot.lane.b32.xlu0 %v3363_v39, %s6576_s3 }
0x2252   :  { %3510 = vperm.xlu0 %6229, %v3507_v56  }
0x2256   :  { %3380 = vperm.xlu0 %6229, %v3275_v47  }
0x225c   :  { %v7371_v57 = vpop.permute.xlu1 %3503 }
0x22b3   :  { %v3489_v32 = vpop.permute.xlu0 %3488 }
0x22b4   :  { %v3491_v45 = vadd.f32 %v3489_v32, %v3399_v21 }
0x22b6   :  { %6393 = vtanh.f32 %v3491_v45 }
0x22c0   :  { %v6394_v33 = vpop.eup %6393  ;;  %v3366_v51 = vpop.permute.xlu0 %3365 }
0x22c1   :  { %v3368_v61 = vadd.f32 %v3366_v51, %v3276_v1  ;;  %3495 = vrot.lane.b32.xlu1 %v6394_v33, %s6577_s28  ;;  %v3370_v33 = vsub.f32 1.0, %v6392_v0 }
0x22c3   :  { %6395 = vtanh.f32 %v3368_v61 }
0x22c5   :  { %3387 = vperm.xlu1 %6230, %v3384_v29   ;;  %v3376_v29 = vmul.f32 %v6392_v0, %v7339_v49 }
0x22cd   :  { %v6396_v55 = vpop.eup %6395 }
0x22ce   :  { %3372 = vrot.lane.b32.xlu0 %v6396_v55, %s6577_s28 }
0x22d1   :  { %v3511_v21 = vpop.permute.xlu0 %3510 }
0x22d2   :  { %v3513_v32 = vmul.f32 %v3511_v21, %v7330_v25 }
0x22d5   :  { %v7378_v45 = vpop.permute.xlu0 %3380 }
0x2333   :  { %v3496_v22 = vpop.permute.xlu1 %3495 }
0x2334   :  { %v3498_v39 = vmul.f32 %v3496_v22, %v3493_v15 }
0x2336   :  { %v3500_v56 = vadd.f32 %v3499_v13, %v3498_v39 }
0x2338   :  { %v3506_v1 = vmul.f32 %v7371_v57, %v3500_v56 }
0x233a   :  { %v7376_v47 = vadd.f32 %v3513_v32, %v3506_v1 }
0x233c   :  { %3647 = vrot.lane.b32.xlu1 %v7376_v47, %s6577_s28 }
0x2340   :  { %v3373_v51 = vpop.permute.xlu0 %3372 }
0x2341   :  { %v3375_v61 = vmul.f32 %v3373_v51, %v3370_v33  ;;  %v7408_v33 = vld [vmem:[%s7799_s5] ss:$0 sm:$0xff] }
0x2343   :  { %v3377_v10 = vadd.f32 %v3376_v29, %v3375_v61  ;;  %v3644_v61 = vld [vmem:[%s7795_s1 + $0x4] sm:$0x3] }
0x2344   :  { %v3388_v55 = vpop.permute.xlu1 %3387 }
0x2345   :  { %v3383_v15 = vmul.f32 %v7378_v45, %v3377_v10  ;;  %v3390_v22 = vmul.f32 %v3388_v55, %v7339_v49 }
0x2347   :  { %v7385_v13 = vadd.f32 %v3390_v22, %v3383_v15  ;;  %v3522_v15 = vld [vmem:[#allocation2 + $0x1a] sm:$0x3] }
0x2349   :  { %3524 = vrot.lane.b32.xlu0 %v7385_v13, %s6577_s28 }
0x23ae   :  { %v3648_v39 = vpop.permute.xlu1 %3647 }
0x23af   :  { %5840 = vmatmul.mubr.msk.f32.vlgmr.msra.gmra.mrb[30].mxu1 %vm104_vm0, %v3648_v39 }
0x23b0   :  { %6156 = vmatpush3.bf16.msra.mxu1 %v6724_v20  ;;  %5861 = vmatprep.mubr.msk.f32.mxu1 %vm6573_vm1, %v7838_v6 }
0x23b1   :  { %6157 = vmatprep.subr.bf16.mxu1 %v7839_v19 }
0x23b4   :  { %6159 = vmatpush3.bf16.msra.mxu1 %v6746_v28 }
0x23b5   :  { %6166 = vmatprep.subr.bf16.mxu1 %v7839_v19 }
0x23bb   :  { %v3525_v0 = vpop.permute.xlu0 %3524 }
0x23bc   :  { %5829 = vmatmul.mubr.msk.f32.vlgmr.msra.gmra.mrb[30].mxu0 %vm104_vm0, %v3525_v0 }
0x23bd   :  { %6150 = vmatpush3.bf16.msra.mxu0 %v6721_v18  ;;  %5850 = vmatprep.mubr.msk.f32.mxu0 %vm6573_vm1, %v7838_v6 }
0x23be   :  { %6151 = vmatprep.subr.bf16.mxu0 %v7839_v19 }
0x23c1   :  { %6153 = vmatpush3.bf16.msra.mxu0 %v6742_v27 }
0x23c2   :  { %6160 = vmatprep.subr.bf16.mxu0 %v7839_v19 }
0x2482   :  { %v3717_v21 = vpop.f32.mrb[30].mxu1 }
0x2483   :  { %v3718_v56 = vadd.f32 %v7125_v30, %v3717_v21  ;;  %v5841_v32 = vpop.f32.mrb[31].mxu1  ;;  %v3645_v30 = vld [vmem:[#allocation3 + $0x4] sm:$0x3] }
0x2485   :  { %3729 = vrot.lane.b32.xlu1 %v3718_v56, %s6576_s3  ;;  %v3721_v10 = vadd.f32 %v3718_v56, %v3645_v30 }
0x2487   :  { %v5264_v55 = vmul.f32 -1.442695, %v3721_v10  ;;  %v3753_v10 = vsub.f32 1.0, %v3644_v61 }
0x2489   :  { %6397 = vpow2.f32 %v5264_v55 }
0x248f   :  { %v3594_v1 = vpop.f32.mrb[30].mxu0 }
0x2490   :  { %v3595_v51 = vadd.f32 %v7408_v33, %v3594_v1  ;;  %v5830_v29 = vpop.f32.mrb[31].mxu0 }
0x2492   :  { %3606 = vrot.lane.b32.xlu1 %v3595_v51, %s6576_s3  ;;  %v3598_v22 = vadd.f32 %v3595_v51, %v3522_v15  ;;  %v3521_v51 = vld [vmem:[%s7795_s1 + $0x1a] sm:$0x3] }
0x2493   :  { %v6398_v0 = vpop.eup %6397 }
0x2494   :  { %v5262_v39 = vmul.f32 -1.442695, %v3598_v22  ;;  %v3725_v21 = vadd.f32 1.0, %v6398_v0  ;;  %v3630_v0 = vsub.f32 1.0, %v3521_v51 }
0x2496   :  { %3749 = vperm.xlu1 %6230, %v3644_v61   ;;  %6399 = vpow2.f32 %v5262_v39 }
0x2497   :  { %6401 = vrcp.f32 %v3725_v21 }
0x24a0   :  { %v6400_v32 = vpop.eup %6399 }
0x24a1   :  { %v3602_v1 = vadd.f32 1.0, %v6400_v32  ;;  %v6402_v29 = vpop.eup %6401 }
0x24a2   :  { %v3739_v61 = vsub.f32 1.0, %v6402_v29 }
0x24a3   :  { %6403 = vrcp.f32 %v3602_v1  ;;  %v3745_v1 = vmul.f32 %v6402_v29, %v7376_v47 }
0x24ad   :  { %v6404_v35 = vpop.eup %6403 }
0x24f7   :  { %v3730_v49 = vpop.permute.xlu1 %3729 }
0x24f8   :  { %v3732_v46 = vmul.f32 %v6402_v29, %v3730_v49 }
0x24fa   :  { %3734 = vrot.lane.b32.xlu0 %v3732_v46, %s6576_s3 }
0x2504   :  { %v3607_v53 = vpop.permute.xlu1 %3606 }
0x2505   :  { %v3609_v56 = vmul.f32 %v6404_v35, %v3607_v53 }
0x2507   :  { %3611 = vrot.lane.b32.xlu0 %v3609_v56, %s6576_s3 }
0x250b   :  { %3756 = vperm.xlu0 %6229, %v3753_v10  }
0x250f   :  { %3626 = vperm.xlu0 %6229, %v3521_v51  }
0x2515   :  { %v7422_v53 = vpop.permute.xlu1 %3749 }
0x256c   :  { %v3735_v55 = vpop.permute.xlu0 %3734 }
0x256d   :  { %v3737_v22 = vadd.f32 %v3735_v55, %v3645_v30 }
0x256f   :  { %6405 = vtanh.f32 %v3737_v22 }
0x2579   :  { %v6406_v39 = vpop.eup %6405  ;;  %v3612_v49 = vpop.permute.xlu0 %3611 }
0x257a   :  { %v3614_v21 = vadd.f32 %v3612_v49, %v3522_v15  ;;  %3741 = vrot.lane.b32.xlu1 %v6406_v39, %s6577_s28  ;;  %v3616_v39 = vsub.f32 1.0, %v6404_v35 }
0x257c   :  { %6407 = vtanh.f32 %v3614_v21 }
0x257e   :  { %3633 = vperm.xlu1 %6230, %v3630_v0   ;;  %v3622_v0 = vmul.f32 %v6404_v35, %v7385_v13 }
0x2586   :  { %v6408_v46 = vpop.eup %6407 }
0x2587   :  { %3618 = vrot.lane.b32.xlu0 %v6408_v46, %s6577_s28 }
0x258a   :  { %v3757_v30 = vpop.permute.xlu0 %3756 }
0x258b   :  { %v3759_v55 = vmul.f32 %v3757_v30, %v7376_v47  ;;  %v7455_v30 = vld [vmem:[%s7803_s9] ss:$0 sm:$0xff]  ;;  %s6578_s9 = smov 32  }
0x258e   :  { %v7429_v22 = vpop.permute.xlu0 %3626 }
0x25ec   :  { %v3742_v32 = vpop.permute.xlu1 %3741 }
0x25ed   :  { %v3744_v56 = vmul.f32 %v3742_v32, %v3739_v61 }
0x25ef   :  { %v3746_v10 = vadd.f32 %v3745_v1, %v3744_v56 }
0x25f1   :  { %v3752_v15 = vmul.f32 %v7422_v53, %v3746_v10 }
0x25f3   :  { %v7427_v51 = vadd.f32 %v3759_v55, %v3752_v15 }
0x25f5   :  { %3893 = vrot.lane.b32.xlu1 %v7427_v51, %s6577_s28 }
0x25f9   :  { %v3619_v49 = vpop.permute.xlu0 %3618 }
0x25fa   :  { %v3621_v21 = vmul.f32 %v3619_v49, %v3616_v39  ;;  %v3891_v39 = vld [vmem:[#allocation3 + $0x2] sm:$0x3] }
0x25fc   :  { %v3623_v29 = vadd.f32 %v3622_v0, %v3621_v21  ;;  %v3768_v21 = vld [vmem:[#allocation2 + $0x1c] sm:$0x3] }
0x25fd   :  { %v3634_v46 = vpop.permute.xlu1 %3633 }
0x25fe   :  { %v3629_v61 = vmul.f32 %v7429_v22, %v3623_v29  ;;  %v3636_v32 = vmul.f32 %v3634_v46, %v7385_v13 }
0x2600   :  { %v7436_v1 = vadd.f32 %v3636_v32, %v3629_v61 }
0x2602   :  { %3770 = vrot.lane.b32.xlu0 %v7436_v1, %s6577_s28 }
0x2667   :  { %v3894_v56 = vpop.permute.xlu1 %3893 }
0x2668   :  { %5862 = vmatmul.mubr.msk.f32.vlgmr.msra.gmra.mrb[32].mxu1 %vm104_vm0, %v3894_v56 }
0x2669   :  { %6168 = vmatpush3.bf16.msra.mxu1 %v6724_v20  ;;  %5883 = vmatprep.mubr.msk.f32.mxu1 %vm6573_vm1, %v7838_v6 }
0x266a   :  { %6169 = vmatprep.subr.bf16.mxu1 %v7839_v19 }
0x266d   :  { %6171 = vmatpush3.bf16.msra.mxu1 %v6746_v28 }
0x2674   :  { %v3771_v35 = vpop.permute.xlu0 %3770 }
0x2675   :  { %5851 = vmatmul.mubr.msk.f32.vlgmr.msra.gmra.mrb[32].mxu0 %vm104_vm0, %v3771_v35 }
0x2676   :  { %6162 = vmatpush3.bf16.msra.mxu0 %v6721_v18  ;;  %5872 = vmatprep.mubr.msk.f32.mxu0 %vm6573_vm1, %v7838_v6 }
0x2677   :  { %6163 = vmatprep.subr.bf16.mxu0 %v7839_v19 }
0x267a   :  { %6165 = vmatpush3.bf16.msra.mxu0 %v6742_v27  ;;  %v3890_v27 = vld [vmem:[%s7795_s1 + $0x2] sm:$0x3] }
0x273b   :  { %v3963_v20 = vpop.f32.mrb[32].mxu1 }
0x273c   :  { %v3964_v28 = vadd.f32 %v7455_v30, %v3963_v20  ;;  %v5863_v10 = vpop.f32.mrb[33].mxu1 }
0x273e   :  { %3975 = vrot.lane.b32.xlu1 %v3964_v28, %s6576_s3  ;;  %v3967_v49 = vadd.f32 %v3964_v28, %v3891_v39 }
0x2740   :  { %v5268_v0 = vmul.f32 -1.442695, %v3967_v49  ;;  %v3999_v49 = vsub.f32 1.0, %v3890_v27 }
0x2742   :  { %6409 = vpow2.f32 %v5268_v0 }
0x2748   :  { %v3840_v55 = vpop.f32.mrb[32].mxu0 }
0x2749   :  { %v3841_v18 = vadd.f32 %v7408_v33, %v3840_v55  ;;  %v5852_v15 = vpop.f32.mrb[33].mxu0 }
0x274b   :  { %3852 = vrot.lane.b32.xlu1 %v3841_v18, %s6576_s3  ;;  %v3844_v29 = vadd.f32 %v3841_v18, %v3768_v21  ;;  %v3767_v18 = vld [vmem:[%s7795_s1 + $0x1c] sm:$0x3] }
0x274c   :  { %v6410_v61 = vpop.eup %6409 }
0x274d   :  { %v5266_v46 = vmul.f32 -1.442695, %v3844_v29  ;;  %v3971_v32 = vadd.f32 1.0, %v6410_v61 }
0x274f   :  { %3995 = vperm.xlu1 %6230, %v3890_v27   ;;  %6411 = vpow2.f32 %v5266_v46 }
0x2750   :  { %6413 = vrcp.f32 %v3971_v32  ;;  %v3876_v32 = vsub.f32 1.0, %v3767_v18 }
0x2759   :  { %v6412_v56 = vpop.eup %6411 }
0x275a   :  { %v3848_v35 = vadd.f32 1.0, %v6412_v56  ;;  %v6414_v20 = vpop.eup %6413 }
0x275c   :  { %6415 = vrcp.f32 %v3848_v35  ;;  %v3985_v35 = vsub.f32 1.0, %v6414_v20 }
0x2766   :  { %v6416_v15 = vpop.eup %6415 }
0x27b0   :  { %v3976_v10 = vpop.permute.xlu1 %3975 }
0x27b1   :  { %v3978_v55 = vmul.f32 %v6414_v20, %v3976_v10 }
0x27b3   :  { %3980 = vrot.lane.b32.xlu0 %v3978_v55, %s6576_s3  ;;  %v3991_v55 = vmul.f32 %v6414_v20, %v7427_v51 }
0x27bd   :  { %v3853_v6 = vpop.permute.xlu1 %3852 }
0x27be   :  { %v3855_v28 = vmul.f32 %v6416_v15, %v3853_v6 }
0x27c0   :  { %3857 = vrot.lane.b32.xlu0 %v3855_v28, %s6576_s3 }
0x27c4   :  { %4002 = vperm.xlu0 %6229, %v3999_v49  }
0x27c8   :  { %3872 = vperm.xlu0 %6229, %v3767_v18  }
0x27ce   :  { %v7471_v27 = vpop.permute.xlu1 %3995 }
0x2825   :  { %v3981_v0 = vpop.permute.xlu0 %3980 }
0x2826   :  { %v3983_v29 = vadd.f32 %v3981_v0, %v3891_v39 }
0x2828   :  { %6417 = vtanh.f32 %v3983_v29 }
0x2832   :  { %v6418_v46 = vpop.eup %6417  ;;  %v3858_v61 = vpop.permute.xlu0 %3857 }
0x2833   :  { %v3860_v56 = vadd.f32 %v3858_v61, %v3768_v21  ;;  %3987 = vrot.lane.b32.xlu1 %v6418_v46, %s6577_s28  ;;  %v3862_v46 = vsub.f32 1.0, %v6416_v15 }
0x2835   :  { %6419 = vtanh.f32 %v3860_v56 }
0x2837   :  { %3879 = vperm.xlu1 %6230, %v3876_v32   ;;  %v3868_v32 = vmul.f32 %v6416_v15, %v7436_v1 }
0x283f   :  { %v6420_v6 = vpop.eup %6419 }
0x2840   :  { %3864 = vrot.lane.b32.xlu0 %v6420_v6, %s6577_s28 }
0x2843   :  { %v4003_v39 = vpop.permute.xlu0 %4002 }
0x2844   :  { %v4005_v0 = vmul.f32 %v4003_v39, %v7427_v51 }
0x2847   :  { %v7478_v29 = vpop.permute.xlu0 %3872 }
0x28a5   :  { %v3988_v10 = vpop.permute.xlu1 %3987 }
0x28a6   :  { %v3990_v28 = vmul.f32 %v3988_v10, %v3985_v35 }
0x28a8   :  { %v3992_v49 = vadd.f32 %v3991_v55, %v3990_v28 }
0x28aa   :  { %v3998_v21 = vmul.f32 %v7471_v27, %v3992_v49 }
0x28ac   :  { %v7476_v18 = vadd.f32 %v4005_v0, %v3998_v21 }
0x28ae   :  { %4139 = vrot.lane.b32.xlu1 %v7476_v18, %s6577_s28 }
0x28b2   :  { %v3865_v61 = vpop.permute.xlu0 %3864 }
0x28b3   :  { %v3867_v56 = vmul.f32 %v3865_v61, %v3862_v46 }
0x28b5   :  { %v3869_v20 = vadd.f32 %v3868_v32, %v3867_v56  ;;  %v4136_v32 = vld [vmem:[%s7795_s1] sm:$0x3] }
0x28b6   :  { %v3880_v6 = vpop.permute.xlu1 %3879  ;;  %v4137_v56 = vld [vmem:[#allocation3] sm:$0x3] }
0x28b7   :  { %v3875_v35 = vmul.f32 %v7478_v29, %v3869_v20  ;;  %v3882_v10 = vmul.f32 %v3880_v6, %v7436_v1 }
0x28b9   :  { %v7485_v55 = vadd.f32 %v3882_v10, %v3875_v35  ;;  %v4014_v35 = vld [vmem:[#allocation2 + $0x1e] sm:$0x3] }
0x28bb   :  { %4016 = vrot.lane.b32.xlu0 %v7485_v55, %s6577_s28 }
0x2920   :  { %v4140_v28 = vpop.permute.xlu1 %4139 }
0x2921   :  { %5884 = vmatmul.mubr.msk.f32.vlgmr.msra.gmra.mrb[34].mxu1 %vm104_vm0, %v4140_v28 }
0x292d   :  { %v4017_v39 = vpop.permute.xlu0 %4016 }
0x292e   :  { %5873 = vmatmul.mubr.msk.f32.vlgmr.msra.gmra.mrb[34].mxu0 %vm104_vm0, %v4017_v39 }
0x29f4   :  { %v4209_v49 = vpop.f32.mrb[34].mxu1 }
0x29f5   :  { %v4210_v15 = vadd.f32 %v7455_v30, %v4209_v49  ;;  %v5885_v0 = vpop.f32.mrb[35].mxu1 }
0x29f7   :  { %4221 = vrot.lane.b32.xlu1 %v4210_v15, %s6576_s3  ;;  %v4213_v20 = vadd.f32 %v4210_v15, %v4137_v56 }
0x29f9   :  { %v5272_v6 = vmul.f32 -1.442695, %v4213_v20 }
0x29fb   :  { %6421 = vpow2.f32 %v5272_v6  ;;  %v4245_v6 = vsub.f32 1.0, %v4136_v32 }
0x2a01   :  { %v4086_v21 = vpop.f32.mrb[34].mxu0 }
0x2a02   :  { %v4087_v46 = vadd.f32 %v7408_v33, %v4086_v21  ;;  %v5874_v61 = vpop.f32.mrb[35].mxu0 }
0x2a04   :  { %4098 = vrot.lane.b32.xlu1 %v4087_v46, %s6576_s3  ;;  %v4090_v30 = vadd.f32 %v4087_v46, %v4014_v35 }
0x2a05   :  { %v6422_v28 = vpop.eup %6421 }
0x2a06   :  { %v5270_v10 = vmul.f32 -1.442695, %v4090_v30  ;;  %v4217_v39 = vadd.f32 1.0, %v6422_v28  ;;  %v4013_v30 = vld [vmem:[%s7795_s1 + $0x1e] sm:$0x3]  ;;  %v2777_v28 = vmul.f32 %v7238_v59, %v7233_v7 }
0x2a08   :  { %4241 = vperm.xlu1 %6230, %v4136_v32   ;;  %6423 = vpow2.f32 %v5270_v10  ;;  %v3761_v10 = vmul.f32 %v7427_v51, %v7422_v53  ;;  %v3269_v32 = vmul.f32 %v7330_v25, %v7325_v62  ;;  %v2285_v53 = vmul.f32 %v7146_v60, %v7141_v42 }
0x2a09   :  { %6425 = vrcp.f32 %v4217_v39  ;;  %v1793_v39 = vmul.f32 %v7044_v31, %v7039_v11  ;;  %v3515_v11 = vmul.f32 %v7376_v47, %v7371_v57  ;;  %v4007_v31 = vmul.f32 %v7476_v18, %v7471_v27 }
0x2a0a   :  { %v2531_v60 = vmul.f32 %v7192_v50, %v7187_v48  ;;  %v3023_v25 = vmul.f32 %v7284_v43, %v7279_v63  ;;  %v1547_v47 = vmul.f32 %v6998_v4, %v6993_v58  ;;  %v2039_v48 = vmul.f32 %v7095_v2, %v7090_v52 }
0x2a0b   :  { %v563_v63 = vmul.f32 %v6818_v36, %v6813_v23  ;;  %v1055_v4 = vmul.f32 %v6906_v40, %v6901_v24  ;;  %v438_v52 = vmul.f32 %v6823_v44, %v6815_v26  ;;  %v932_v23 = vmul.f32 %v6915_v54, %v6908_v41 }
0x2a0c   :  { %v1424_v36 = vmul.f32 %v7007_v14, %v7000_v5  ;;  %v1916_v24 = vmul.f32 %v7104_v16, %v7097_v3  ;;  %v2408_v26 = vmul.f32 %v7201_v37, %v7194_v9  ;;  %v2900_v44 = vmul.f32 %v7293_v12, %v7286_v8 }
0x2a0d   :  { %v3392_v40 = vmul.f32 %v7385_v13, %v7378_v45  ;;  %v3884_v41 = vmul.f32 %v7485_v55, %v7478_v29  ;;  %v809_v13 = vmul.f32 %v6860_v34, %v6855_v17 }
0x2a12   :  { %v6424_v33 = vpop.eup %6423 }
0x2a13   :  { %v4094_v49 = vadd.f32 1.0, %v6424_v33  ;;  %v7498_v0 = vpop.eup %6425 }
0x2a14   :  { %v4231_v5 = vsub.f32 1.0, %v7498_v0  ;;  %v4237_v3 = vmul.f32 %v7498_v0, %v7476_v18 }
0x2a15   :  { %6427 = vrcp.f32 %v4094_v49  ;;  %v4122_v49 = vsub.f32 1.0, %v4013_v30 }
0x2a1f   :  { %v7502_v15 = vpop.eup %6427 }
0x2a69   :  { %v4222_v21 = vpop.permute.xlu1 %4221 }
0x2a6a   :  { %v4224_v61 = vmul.f32 %v7498_v0, %v4222_v21 }
0x2a6c   :  { %4226 = vrot.lane.b32.xlu0 %v4224_v61, %s6576_s3  ;;  %v7843_v61 = vld [vmem:[#allocation17_spill] sm:$0xff] }
0x2a76   :  { %v4099_v20 = vpop.permute.xlu1 %4098 }
0x2a77   :  { %v4101_v46 = vmul.f32 %v7502_v15, %v4099_v20  ;;  %v7844_v20 = vld [vmem:[#allocation18_spill] sm:$0xff] }
0x2a79   :  { %4103 = vrot.lane.b32.xlu0 %v4101_v46, %s6576_s3 }
0x2a7d   :  { %4248 = vperm.xlu0 %6229, %v4245_v6   ;;  %v7845_v6 = vld [vmem:[#allocation20_spill] sm:$0xff] }
0x2a81   :  { %4118 = vperm.xlu0 %6229, %v4013_v30   ;;  %v7846_v30 = vld [vmem:[#allocation21_spill] sm:$0xff] }
0x2a82   :  { %v1178_v17 = vmul.f32 %v7846_v30, %v7845_v6 }
0x2a85   :  { %3763 = vrot.lane.b32.xlu0 %v3761_v10, %s6577_s28  ;;  %v7848_v10 = vld [vmem:[#allocation23_spill] sm:$0xff] }
0x2a87   :  { %v4242_v54 = vpop.permute.xlu1 %4241 }
0x2a89   :  { %2779 = vrot.lane.b32.xlu0 %v2777_v28, %s6577_s28 }
0x2a8d   :  { %3271 = vrot.lane.b32.xlu0 %v3269_v32, %s6577_s28 }
0x2a91   :  { %1795 = vrot.lane.b32.xlu0 %v1793_v39, %s6577_s28  ;;  %v4108_v39 = vsub.f32 1.0, %v7502_v15 }
0x2a95   :  { %2287 = vrot.lane.b32.xlu0 %v2285_v53, %s6577_s28 }
0x2ade   :  { %v4227_v51 = vpop.permute.xlu0 %4226 }
0x2adf   :  { %v4229_v33 = vadd.f32 %v4227_v51, %v4137_v56  ;;  %v7842_v56 = vld [vmem:[#allocation19_spill] sm:$0xff] }
0x2ae1   :  { %6429 = vtanh.f32 %v4229_v33  ;;  %v7849_v33 = vld [vmem:[#allocation24_spill] sm:$0xff] }
0x2aeb   :  { %v6430_v7 = vpop.eup %6429  ;;  %v4104_v59 = vpop.permute.xlu0 %4103 }
0x2aec   :  { %v4106_v21 = vadd.f32 %v4104_v59, %v4014_v35  ;;  %4233 = vrot.lane.b32.xlu1 %v6430_v7, %s6577_s28  ;;  %v1301_v35 = vmul.f32 %v7842_v56, %v6947_v38  ;;  %v7847_v38 = vld [vmem:[#allocation22_spill] sm:$0xff]  ;;  %v7850_v7 = vld [vmem:[#allocation25_spill] sm:$0xff] }
0x2aed   :  { %v1670_v28 = vmul.f32 %v7848_v10, %v7847_v38  ;;  %v2162_v59 = vmul.f32 %v7850_v7, %v7849_v33 }
0x2aee   :  { %6431 = vtanh.f32 %v4106_v21 }
0x2af0   :  { %4125 = vperm.xlu1 %6230, %v4122_v49   ;;  %v4114_v49 = vmul.f32 %v7502_v15, %v7485_v55  ;;  %v4287_v15 = vld [vmem:[%s7804_s10] sm:$0xff] }
0x2af4   :  { %3517 = vrot.lane.b32.xlu1 %v3515_v11, %s6577_s28 }
0x2af8   :  { %v6432_v42 = vpop.eup %6431  ;;  %4009 = vrot.lane.b32.xlu1 %v4007_v31, %s6577_s28  ;;  %v7851_v31 = vld [vmem:[#allocation26_spill] sm:$0xff] }
0x2af9   :  { %4110 = vrot.lane.b32.xlu0 %v6432_v42, %s6577_s28  ;;  %v7852_v42 = vld [vmem:[#allocation27_spill] sm:$0xff] }
0x2afc   :  { %2533 = vrot.lane.b32.xlu1 %v2531_v60, %s6577_s28  ;;  %v4249_v62 = vpop.permute.xlu0 %4248  ;;  %v2654_v60 = vmul.f32 %v7852_v42, %v7851_v31 }
0x2afd   :  { %v4251_v37 = vmul.f32 %v4249_v62, %v7476_v18  ;;  %v686_v18 = vmul.f32 %v7844_v20, %v7843_v61 }
0x2b00   :  { %3025 = vrot.lane.b32.xlu1 %v3023_v25, %s6577_s28  ;;  %v7538_v57 = vpop.permute.xlu0 %4118 }
0x2b04   :  { %1549 = vrot.lane.b32.xlu1 %v1547_v47, %s6577_s28  ;;  %v3764_v27 = vpop.permute.xlu0 %3763 }
0x2b05   :  { %3766 = vst.msk [vmem:[#allocation5 + $0x4] sm:$0x3] %vm443_vm3, %v3764_v27  ;;  %v7853_v27 = vld [vmem:[#allocation28_spill] sm:$0xff] }
0x2b08   :  { %2041 = vrot.lane.b32.xlu1 %v2039_v48, %s6577_s28  ;;  %v2780_v50 = vpop.permute.xlu0 %2779  ;;  %v7854_v48 = vld [vmem:[#allocation29_spill] sm:$0xff] }
0x2b09   :  { %2782 = vst.msk [vmem:[#allocation5 + $0xc] sm:$0x3] %vm443_vm3, %v2780_v50  ;;  %v3146_v50 = vmul.f32 %v7854_v48, %v7853_v27  ;;  %v7855_v48 = vmov 0.0  }
0x2b0c   :  { %565 = vrot.lane.b32.xlu1 %v563_v63, %s6577_s28  ;;  %v3272_v58 = vpop.permute.xlu0 %3271  ;;  %v4288_v63 = vld [vmem:[%s7804_s10 + $0x8] sm:$0xff] }
0x2b0d   :  { %3274 = vst.msk [vmem:[#allocation5 + $0x8] sm:$0x3] %vm443_vm3, %v3272_v58  ;;  %v4289_v58 = vld [vmem:[%s7804_s10 + $0x10] sm:$0xff] }
0x2b10   :  { %1057 = vrot.lane.b32.xlu1 %v1055_v4, %s6577_s28  ;;  %v1796_v43 = vpop.permute.xlu0 %1795  ;;  %v4290_v4 = vld [vmem:[%s7804_s10 + $0x18] sm:$0xff] }
0x2b11   :  { %1798 = vst.msk [vmem:[#allocation5 + $0x14] sm:$0x3] %vm443_vm3, %v1796_v43  ;;  %v6176_v43 = vpack.c.bf16 %v4290_v4, %v4289_v58 }
0x2b14   :  { %440 = vrot.lane.b32.xlu1 %v438_v52, %s6577_s28  ;;  %v2288_v2 = vpop.permute.xlu0 %2287  ;;  %v4291_v52 = vld [vmem:[%s7804_s10 + $0x20] sm:$0xff] }
0x2b15   :  { %2290 = vst.msk [vmem:[#allocation5 + $0x10] sm:$0x3] %vm443_vm3, %v2288_v2  ;;  %v4292_v2 = vld [vmem:[%s7804_s10 + $0x28] sm:$0xff] }
0x2b18   :  { %934 = vrot.lane.b32.xlu1 %v932_v23, %s6577_s28 }
0x2b1c   :  { %1426 = vrot.lane.b32.xlu1 %v1424_v36, %s6577_s28 }
0x2b20   :  { %1918 = vrot.lane.b32.xlu1 %v1916_v24, %s6577_s28  ;;  %v3638_v24 = vmul.f32 %v7436_v1, %v7429_v22 }
0x2b24   :  { %2410 = vrot.lane.b32.xlu1 %v2408_v26, %s6577_s28  ;;  %v6180_v26 = vpack.c.bf16 %v4292_v2, %v4291_v52 }
0x2b28   :  { %2902 = vrot.lane.b32.xlu1 %v2900_v44, %s6577_s28  ;;  %v4293_v44 = vld [vmem:[%s7804_s10 + $0x30] sm:$0xff] }
0x2b2c   :  { %3394 = vrot.lane.b32.xlu1 %v3392_v40, %s6577_s28  ;;  %v4294_v40 = vld [vmem:[%s7804_s10 + $0x38] sm:$0xff] }
0x2b2d   :  { %v6184_v22 = vpack.c.bf16 %v4294_v40, %v4293_v44  ;;  %v4404_v40 = vld [vmem:[%s7806_s12] sm:$0xff] }
0x2b30   :  { %3886 = vrot.lane.b32.xlu1 %v3884_v41, %s6577_s28 }
0x2b5e   :  { %v4234_v14 = vpop.permute.xlu1 %4233 }
0x2b5f   :  { %v4236_v16 = vmul.f32 %v4234_v14, %v4231_v5 }
0x2b61   :  { %v4238_v9 = vadd.f32 %v4237_v3, %v4236_v16 }
0x2b63   :  { %v4244_v8 = vmul.f32 %v4242_v54, %v4238_v9 }
0x2b65   :  { %v4252_v12 = vadd.f32 %v4251_v37, %v4244_v8 }
0x2b67   :  { %v4253_v45 = vmul.f32 %v4252_v12, %v4242_v54 }
0x2b69   :  { %4255 = vrot.lane.b32.xlu0 %v4253_v45, %s6577_s28 }
0x2b6b   :  { %v4111_v32 = vpop.permute.xlu0 %4110 }
0x2b6c   :  { %v4113_v53 = vmul.f32 %v4111_v32, %v4108_v39 }
0x2b6d   :  { %811 = vrot.lane.b32.xlu0 %v809_v13, %s6577_s28 }
0x2b6e   :  { %v4115_v21 = vadd.f32 %v4114_v49, %v4113_v53 }
0x2b6f   :  { %v4126_v29 = vpop.permute.xlu1 %4125 }
0x2b70   :  { %v4121_v62 = vmul.f32 %v7538_v57, %v4115_v21  ;;  %v4128_v25 = vmul.f32 %v4126_v29, %v7485_v55  ;;  %v6172_v55 = vpack.c.bf16 %v4288_v63, %v4287_v15 }
0x2b71   :  { %1303 = vrot.lane.b32.xlu0 %v1301_v35, %s6577_s28 }
0x2b72   :  { %v4129_v23 = vadd.f32 %v4128_v25, %v4121_v62  ;;  %6173 = vmatprep.subr.bf16.mxu0 %v6172_v55 }
0x2b73   :  { %v3518_v0 = vpop.permute.xlu1 %3517  ;;  %6175 = vmatpush3.bf16.msra.mxu0 %v6172_v55 }
0x2b74   :  { %3520 = vst.msk [vmem:[#allocation5 + $0x6] sm:$0x3] %vm443_vm3, %v3518_v0  ;;  %6177 = vmatprep.subr.bf16.mxu0 %v6176_v43  ;;  %v4130_v41 = vmul.f32 %v4129_v23, %v7538_v57 }
0x2b75   :  { %688 = vrot.lane.b32.xlu0 %v686_v18, %s6577_s28 }
0x2b77   :  { %v4010_v46 = vpop.permute.xlu1 %4009  ;;  %6179 = vmatpush3.bf16.msra.mxu0 %v6176_v43 }
0x2b78   :  { %4012 = vst.msk [vmem:[#allocation5 + $0x2] sm:$0x3] %vm443_vm3, %v4010_v46  ;;  %6181 = vmatprep.subr.bf16.mxu0 %v6180_v26 }
0x2b79   :  { %1180 = vrot.lane.b32.xlu0 %v1178_v17, %s6577_s28 }
0x2b7b   :  { %v2534_v34 = vpop.permute.xlu1 %2533  ;;  %6183 = vmatpush3.bf16.msra.mxu0 %v6180_v26  ;;  %v4510_v26 = vld [vmem:[%s7807_s13] sm:$0xff] }
0x2b7c   :  { %2536 = vst.msk [vmem:[#allocation5 + $0xe] sm:$0x3] %vm443_vm3, %v2534_v34  ;;  %6185 = vmatprep.subr.bf16.mxu0 %v6184_v22 }
0x2b7d   :  { %1672 = vrot.lane.b32.xlu0 %v1670_v28, %s6577_s28 }
0x2b7f   :  { %v3026_v51 = vpop.permute.xlu1 %3025  ;;  %6187 = vmatpush3.bf16.msra.mxu0 %v6184_v22  ;;  %v4406_v22 = vld [vmem:[%s7806_s12 + $0x10] sm:$0xff] }
0x2b80   :  { %3028 = vst.msk [vmem:[#allocation5 + $0xa] sm:$0x3] %vm443_vm3, %v3026_v51  ;;  %6199 = vmatprep.subr.bf16.mxu0 %v7839_v19 }
0x2b81   :  { %2164 = vrot.lane.b32.xlu0 %v2162_v59, %s6577_s28 }
0x2b83   :  { %v1550_v11 = vpop.permute.xlu1 %1549 }
0x2b84   :  { %1552 = vst.msk [vmem:[#allocation5 + $0x16] sm:$0x3] %vm443_vm3, %v1550_v11 }
0x2b85   :  { %2656 = vrot.lane.b32.xlu0 %v2654_v60, %s6577_s28 }
0x2b87   :  { %v2042_v47 = vpop.permute.xlu1 %2041  ;;  %v4264_v5 = vld [vmem:[#allocation5 + $0x8] sm:$0xff] }
0x2b88   :  { %2044 = vst.msk [vmem:[#allocation5 + $0x12] sm:$0x3] %vm443_vm3, %v2042_v47 }
0x2b89   :  { %3148 = vrot.lane.b32.xlu0 %v3146_v50, %s6577_s28 }
0x2b8b   :  { %v566_v36 = vpop.permute.xlu1 %565 }
0x2b8c   :  { %568 = vst.msk [vmem:[#allocation5 + $0x1e] sm:$0x3] %vm443_vm3, %v566_v36 }
0x2b8d   :  { %3640 = vrot.lane.b32.xlu0 %v3638_v24, %s6577_s28 }
0x2b8f   :  { %v1058_v54 = vpop.permute.xlu1 %1057  ;;  %v4265_v35 = vld [vmem:[#allocation5 + $0x10] sm:$0xff] }
0x2b90   :  { %1060 = vst.msk [vmem:[#allocation5 + $0x1a] sm:$0x3] %vm443_vm3, %v1058_v54 }
0x2b91   :  { %4132 = vrot.lane.b32.xlu0 %v4130_v41, %s6577_s28  ;;  %v4405_v41 = vld [vmem:[%s7806_s12 + $0x8] sm:$0xff] }
0x2b92   :  { %v6188_v54 = vpack.c.bf16 %v4405_v41, %v4404_v40 }
0x2b93   :  { %v441_v1 = vpop.permute.xlu1 %440 }
0x2b94   :  { %444 = vst.msk [vmem:[#allocation4] sm:$0x3] %vm443_vm3, %v441_v1  ;;  %v4407_v1 = vld [vmem:[%s7806_s12 + $0x18] sm:$0xff]  ;;  %6189 = vmatprep.subr.bf16.mxu1 %v6188_v54 }
0x2b95   :  { %4273 = vrot.lane.b32.xlu0 %v4264_v5, %s6578_s9  ;;  %v6192_v5 = vpack.c.bf16 %v4407_v1, %v4406_v22  ;;  %6191 = vmatpush3.bf16.msra.mxu1 %v6188_v54 }
0x2b97   :  { %v935_v14 = vpop.permute.xlu1 %934  ;;  %6193 = vmatprep.subr.bf16.mxu1 %v6192_v5 }
0x2b98   :  { %937 = vst.msk [vmem:[#allocation4 + $0x4] sm:$0x3] %vm443_vm3, %v935_v14  ;;  %v5273_v14 = vld [vmem:[%s7805_s11] ss:$0 sm:$0xff]  ;;  %s6579_s11 = smov [#allocation13]  }
0x2b99   :  { %6195 = vmatpush3.bf16.msra.mxu1 %v6192_v5  ;;  %s5186_s12 = sshll.u32 %s6579_s11, 4  ;;  %s5187_s12 = int_to_ptr.vmem [resolvable:$true] %s5186_s12 }
0x2b9a   :  { %6196 = vmatprep.subr.bf16.mxu1 %v7839_v19  ;;  %p6544_p11 = scmp.lt.s32.totalorder %s5187_s12, %s5187_s12 }
0x2b9b   :  { %v1427_v57 = vpop.permute.xlu1 %1426 }
0x2b9c   :  { %1429 = vst.msk [vmem:[#allocation4 + $0x8] sm:$0x3] %vm443_vm3, %v1427_v57 }
0x2b9f   :  { %v1919_v3 = vpop.permute.xlu1 %1918 }
0x2ba0   :  { %1921 = vst.msk [vmem:[#allocation4 + $0xc] sm:$0x3] %vm443_vm3, %v1919_v3 }
0x2ba3   :  { %v2411_v16 = vpop.permute.xlu1 %2410 }
0x2ba4   :  { %2413 = vst.msk [vmem:[#allocation4 + $0x10] sm:$0x3] %vm443_vm3, %v2411_v16 }
0x2ba7   :  { %v2903_v9 = vpop.permute.xlu1 %2902 }
0x2ba8   :  { %2905 = vst.msk [vmem:[#allocation4 + $0x14] sm:$0x3] %vm443_vm3, %v2903_v9 }
0x2bab   :  { %v3395_v37 = vpop.permute.xlu1 %3394 }
0x2bac   :  { %3397 = vst.msk [vmem:[#allocation4 + $0x18] sm:$0x3] %vm443_vm3, %v3395_v37 }
0x2baf   :  { %v3887_v8 = vpop.permute.xlu1 %3886 }
0x2bb0   :  { %3889 = vst.msk [vmem:[#allocation4 + $0x1c] sm:$0x3] %vm443_vm3, %v3887_v8 }
0x2bdb   :  { %v4256_v12 = vpop.permute.xlu0 %4255 }
0x2bdc   :  { %4258 = vst.msk [vmem:[#allocation5] sm:$0x3] %vm443_vm3, %v4256_v12 }
0x2bdf   :  { %v812_v45 = vpop.permute.xlu0 %811 }
0x2be0   :  { %814 = vst.msk [vmem:[#allocation5 + $0x1c] sm:$0x3] %vm443_vm3, %v812_v45 }
0x2be3   :  { %v1304_v13 = vpop.permute.xlu0 %1303  ;;  %v4263_v29 = vld [vmem:[#allocation5] sm:$0xff] }
0x2be4   :  { %1306 = vst.msk [vmem:[#allocation5 + $0x18] sm:$0x3] %vm443_vm3, %v1304_v13  ;;  %4271 = vrot.lane.b32.xlu1 %v4263_v29, %s6578_s9  ;;  %v4514_v0 = vld [vmem:[#allocation5] ss:$2 sm:$0xff]  ;;  %v4851_v30 = vld [vmem:[#allocation5 + $0x1] ss:$2 sm:$0xff] }
0x2be7   :  { %v689_v56 = vpop.permute.xlu0 %688 }
0x2be8   :  { %691 = vst.msk [vmem:[#allocation4 + $0x2] sm:$0x3] %vm443_vm3, %v689_v56  ;;  %4275 = vrot.lane.b32.xlu1 %v4265_v35, %s6578_s9 }
0x2beb   :  { %v1181_v61 = vpop.permute.xlu0 %1180  ;;  %v4266_v20 = vld [vmem:[#allocation5 + $0x18] sm:$0xff] }
0x2bec   :  { %v4516_v18 = vld [vmem:[#allocation5 + $0x10] ss:$2 sm:$0xff]  ;;  %v4853_v46 = vld [vmem:[#allocation5 + $0x11] ss:$2 sm:$0xff]  ;;  %1183 = vst.msk [vmem:[#allocation4 + $0x6] sm:$0x3] %vm443_vm3, %v1181_v61  ;;  %4277 = vrot.lane.b32.xlu0 %v4266_v20, %s6578_s9 }
0x2bed   :  { %v6231_v6 = vpack.i.bf16 %v4516_v18, %v4514_v0  ;;  %v6236_v17 = vpack.i.bf16 %v4853_v46, %v4851_v30 }
0x2bef   :  { %6232 = vrot.lane.b32.xlu1 %v6231_v6, %s6578_s9  ;;  %v1673_v34 = vpop.permute.xlu0 %1672 }
0x2bf0   :  { %1675 = vst.msk [vmem:[#allocation4 + $0xa] sm:$0x3] %vm443_vm3, %v1673_v34  ;;  %6237 = vrot.lane.b32.xlu0 %v6236_v17, %s6578_s9 }
0x2bf3   :  { %v2165_v38 = vpop.permute.xlu0 %2164  ;;  %v4259_v33 = vld [vmem:[#allocation4] sm:$0xff] }
0x2bf4   :  { %2167 = vst.msk [vmem:[#allocation4 + $0xe] sm:$0x3] %vm443_vm3, %v2165_v38 }
0x2bf7   :  { %v2657_v10 = vpop.permute.xlu0 %2656 }
0x2bf8   :  { %2659 = vst.msk [vmem:[#allocation4 + $0x12] sm:$0x3] %vm443_vm3, %v2657_v10 }
0x2bfb   :  { %v3149_v28 = vpop.permute.xlu0 %3148  ;;  %v4260_v7 = vld [vmem:[#allocation4 + $0x8] sm:$0xff] }
0x2bfc   :  { %3151 = vst.msk [vmem:[#allocation4 + $0x16] sm:$0x3] %vm443_vm3, %v3149_v28  ;;  %v4511_v50 = vld [vmem:[#allocation4] ss:$2 sm:$0xff]  ;;  %v4847_v2 = vld [vmem:[#allocation4 + $0x1] ss:$2 sm:$0xff] }
0x2bff   :  { %v3641_v32 = vpop.permute.xlu0 %3640 }
0x2c00   :  { %3643 = vst.msk [vmem:[#allocation4 + $0x1a] sm:$0x3] %vm443_vm3, %v3641_v32 }
0x2c03   :  { %v4133_v39 = vpop.permute.xlu0 %4132  ;;  %v4261_v11 = vld [vmem:[#allocation4 + $0x10] sm:$0xff] }
0x2c04   :  { %4135 = vst.msk [vmem:[#allocation4 + $0x1e] sm:$0x3] %vm443_vm3, %v4133_v39 }
0x2c07   :  { %v4274_v53 = vpop.permute.xlu0 %4273 }
0x2c08   :  { %v4284_v49 = vsel %vm104_vm0, %v4260_v7, %v4274_v53 }
0x2c0b   :  { %v4262_v42 = vld [vmem:[#allocation4 + $0x18] sm:$0xff] }
0x2c0c   :  { %v4513_v15 = vld [vmem:[#allocation4 + $0x10] ss:$2 sm:$0xff]  ;;  %v4849_v23 = vld [vmem:[#allocation4 + $0x11] ss:$2 sm:$0xff] }
0x2c56   :  { %v4272_v51 = vpop.permute.xlu1 %4271 }
0x2c57   :  { %v4283_v59 = vsel %vm104_vm0, %v4259_v33, %v4272_v51 }
0x2c58   :  { %5902 = vmatprep.mubr.msk.f32.mxu0 %vm4302_vm4, %v4283_v59 }
0x2c59   :  { %5903 = vmatmul.mubr.msk.f32.vlgmr.msra.gmra.mrb[36].mxu0 %vm4302_vm4, %v4284_v49 }
0x2c5a   :  { %v4276_v21 = vpop.permute.xlu1 %4275 }
0x2c5b   :  { %v4285_v31 = vsel %vm104_vm0, %v4261_v11, %v4276_v21 }
0x2c5c   :  { %5905 = vmatprep.mubr.msk.f32.mxu0 %vm4302_vm4, %v4285_v31 }
0x2c5e   :  { %v4278_v60 = vpop.permute.xlu0 %4277 }
0x2c5f   :  { %v4286_v62 = vsel %vm104_vm0, %v4262_v42, %v4278_v60 }
0x2c60   :  { %5906 = vmatmul.mubr.msk.f32.gmra.mrb[38].mxu0 %vm4302_vm4, %v4286_v62 }
0x2c61   :  { %v6233_v25 = vpop.permute.xlu1 %6232  ;;  %5933 = vmatprep.mubr.msk.f32.mxu0 %vm6573_vm1, %v7855_v48 }
0x2c62   :  { %v6235_v47 = vunpack.i.h.bf16 %v6233_v25  ;;  %v6234_v27 = vunpack.i.l.bf16 %v6233_v25  ;;  %v6238_v63 = vpop.permute.xlu0 %6237 }
0x2c63   :  { %v6240_v43 = vunpack.i.h.bf16 %v6238_v63  ;;  %v6239_v52 = vunpack.i.l.bf16 %v6238_v63 }
0x2c64   :  { %v4525_v58 = vsel %vm104_vm0, %v4511_v50, %v6234_v27  ;;  %v4526_v55 = vsel %vm104_vm0, %v4513_v15, %v6235_v47 }
0x2c65   :  { %v7692_v4 = vpack.c.bf16 %v4526_v55, %v4525_v58  ;;  %v4863_v36 = vsel %vm104_vm0, %v4849_v23, %v6240_v43  ;;  %v4862_v24 = vsel %vm104_vm0, %v4847_v2, %v6239_v52 }
0x2c66   :  { %v7701_v44 = vpack.c.bf16 %v4863_v36, %v4862_v24 }
0x2c67   :  { %6202 = vmatpush3.bf16.xpose.msk.msra.mxu0 %vm6201_vm5, %v7692_v4 }
0x2c68   :  { %6209 = vmatprep.subr.bf16.mxu0 %v7839_v19 }
0x2c6e   :  { %5934 = vmatmul.mubr.msk.f32.vlgmr.msra.gmra.mrb[40].mxu0 %vm4302_vm4, %v4510_v26 }
0x2c6f   :  { %6212 = vmatpush3.bf16.xpose.msk.msra.mxu0 %vm6201_vm5, %v7701_v44  ;;  %5954 = vmatprep.mubr.msk.f32.mxu0 %vm6573_vm1, %v7855_v48 }
0x2c76   :  { %5955 = vmatmul.mubr.msk.f32.vlgmr.msra.gmra.mrb[42].mxu0 %vm4302_vm4, %v4510_v26 }
0x2d2c   :  { %v5904_v57 = vpop.f32.mrb[36].mxu0 }
0x2d2d   :  { %v4387_v3 = vadd.f32 %v5904_v57, %v5273_v14  ;;  %v4381_v16 = vpop.f32.mrb[37].mxu0 }
0x2d2e   :  { %v4382_v9 = vadd.f32 %v5273_v14, %v4381_v16 }
0x2d30   :  { %6433 = vtanh.f32 %v4382_v9 }
0x2d31   :  { %6435 = vtanh.f32 %v4387_v3 }
0x2d33   :  { %v5907_v37 = vpop.f32.mrb[38].mxu0 }
0x2d34   :  { %v4397_v8 = vadd.f32 %v5907_v37, %v5273_v14  ;;  %v4391_v12 = vpop.f32.mrb[39].mxu0 }
0x2d35   :  { %v4392_v45 = vadd.f32 %v5273_v14, %v4391_v12 }
0x2d37   :  { %6437 = vtanh.f32 %v4392_v45 }
0x2d38   :  { %6439 = vtanh.f32 %v4397_v8 }
0x2d3a   :  { %v6434_v13 = vpop.eup %6433 }
0x2d3b   :  { %v6436_v29 = vpop.eup %6435  ;;  %5916 = vmatprep.mubr.msk.f32.mxu1 %vm104_vm0, %v6434_v13 }
0x2d3c   :  { %5917 = vmatmul.mubr.msk.f32.vlgmr.msra.gmra.mrb[36].mxu1 %vm104_vm0, %v6436_v29 }
0x2d3d   :  { %6198 = vmatpush3.bf16.msra.mxu1 %v7692_v4 }
0x2d3e   :  { %6203 = vmatprep.subr.bf16.mxu1 %v7839_v19 }
0x2d41   :  { %v4745_v56 = vpop.f32.mrb[40].mxu0  ;;  %v6438_v35 = vpop.eup %6437 }
0x2d42   :  { %v4749_v0 = vsel %vm4589_vm6, %v4745_v56, -inf  ;;  %v5935_v61 = vpop.f32.mrb[41].mxu0  ;;  %v6440_v20 = vpop.eup %6439  ;;  %5919 = vmatprep.mubr.msk.f32.mxu1 %vm104_vm0, %v6438_v35 }
0x2d43   :  { %4750 = vmax.xlane.f32.xlu1 %v4749_v0  ;;  %5920 = vmatmul.mubr.msk.f32.gmra.mrb[38].mxu1 %vm104_vm0, %v6440_v20 }
0x2d44   :  { %5926 = vmatprep.mubr.msk.f32.mxu1 %vm6573_vm1, %v7855_v48 }
0x2d49   :  { %v5079_v18 = vpop.f32.mrb[42].mxu0 }
0x2d4a   :  { %v5083_v46 = vsel %vm4589_vm6, %v5079_v18, -inf  ;;  %v5956_v6 = vpop.f32.mrb[43].mxu0 }
0x2d4b   :  { %5084 = vmax.xlane.f32.xlu0 %v5083_v46 }
0x2dd0   :  { %v4751_v30 = vpop.xlane.xlu1 %4750 }
0x2dd1   :  { %v4752_v17 = vsub.f32 %v4745_v56, %v4751_v30 }
0x2dd3   :  { %v4753_v34 = vmul.f32 1.442695, %v4752_v17 }
0x2dd5   :  { %6441 = vpow2.f32 %v4753_v34 }
0x2dd8   :  { %v5085_v38 = vpop.xlane.xlu0 %5084 }
0x2dd9   :  { %v5086_v10 = vsub.f32 %v5079_v18, %v5085_v38 }
0x2ddb   :  { %v5087_v28 = vmul.f32 1.442695, %v5086_v10 }
0x2ddd   :  { %6443 = vpow2.f32 %v5087_v28 }
0x2ddf   :  { %v7734_v32 = vpop.eup %6441 }
0x2de0   :  { %v4755_v39 = vsel %vm4589_vm6, %v7734_v32, 0.0 }
0x2de1   :  { %4756 = vadd.xlane.f32.xlu0 %v4755_v39 }
0x2de7   :  { %v7738_v53 = vpop.eup %6443 }
0x2de8   :  { %v5089_v51 = vsel %vm4589_vm6, %v7738_v53, 0.0 }
0x2de9   :  { %5090 = vadd.xlane.f32.xlu1 %v5089_v51 }
0x2e0f   :  { %v5918_v33 = vpop.f32.mrb[36].mxu1 }
0x2e10   :  { %4507 = vst.msk [vmem:[#allocation6 + $0x8] sm:$0xff] %vm4505_vm7, %v5918_v33  ;;  %v4486_v7 = vpop.f32.mrb[37].mxu1 }
0x2e11   :  { %4506 = vst.msk [vmem:[#allocation6] sm:$0xff] %vm4505_vm7, %v4486_v7 }
0x2e16   :  { %v5921_v59 = vpop.f32.mrb[38].mxu1 }
0x2e17   :  { %4509 = vst.msk [vmem:[#allocation6 + $0x18] sm:$0xff] %vm4505_vm7, %v5921_v59  ;;  %v4496_v49 = vpop.f32.mrb[39].mxu1 }
0x2e18   :  { %4508 = vst.msk [vmem:[#allocation6 + $0x10] sm:$0xff] %vm4505_vm7, %v4496_v49  ;;  %v4865_v21 = vld [vmem:[#allocation6 + $0x1] ss:$2 sm:$0xff]  ;;  %v4527_v11 = vld [vmem:[#allocation6] ss:$2 sm:$0xff] }
0x2e19   :  { %v4868_v60 = vsel %vm4505_vm7, %v4865_v21, -inf  ;;  %v4530_v25 = vsel %vm4505_vm7, %v4527_v11, -inf }
0x2e1f   :  { %v4867_v31 = vld [vmem:[#allocation6 + $0x11] ss:$2 sm:$0xff]  ;;  %v4529_v42 = vld [vmem:[#allocation6 + $0x10] ss:$2 sm:$0xff] }
0x2e20   :  { %v4869_v62 = vsel %vm4505_vm7, %v4867_v31, -inf  ;;  %v4531_v47 = vsel %vm4505_vm7, %v4529_v42, -inf }
0x2e21   :  { %v4870_v27 = vmax.f32 %v4868_v60, %v4869_v62  ;;  %v4532_v50 = vmax.f32 %v4530_v25, %v4531_v47 }
0x2e23   :  { %v4871_v15 = vrot.slane %v4870_v27, 4  ;;  %v4533_v63 = vrot.slane %v4532_v50, 4 }
0x2e25   :  { %v4872_v58 = vmax.f32 %v4870_v27, %v4871_v15  ;;  %v4534_v55 = vmax.f32 %v4532_v50, %v4533_v63 }
0x2e27   :  { %v4873_v43 = vrot.slane %v4872_v58, 2  ;;  %v4535_v52 = vrot.slane %v4534_v55, 2 }
0x2e29   :  { %v4874_v2 = vmax.f32 %v4872_v58, %v4873_v43  ;;  %v4536_v23 = vmax.f32 %v4534_v55, %v4535_v52 }
0x2e2b   :  { %v4875_v36 = vrot.slane %v4874_v2, 1  ;;  %v4537_v24 = vrot.slane %v4536_v23, 1 }
0x2e2d   :  { %v4876_v26 = vmax.f32 %v4874_v2, %v4875_v36  ;;  %v4538_v40 = vmax.f32 %v4536_v23, %v4537_v24 }
0x2e2f   :  { %v4877_v41 = vsub.f32 %v4865_v21, %v4876_v26  ;;  %v4878_v54 = vsub.f32 %v4867_v31, %v4876_v26  ;;  %v4539_v22 = vsub.f32 %v4527_v11, %v4538_v40  ;;  %v4540_v1 = vsub.f32 %v4529_v42, %v4538_v40 }
0x2e31   :  { %v4879_v5 = vmul.f32 1.442695, %v4877_v41  ;;  %v4881_v14 = vmul.f32 1.442695, %v4878_v54  ;;  %v4541_v57 = vmul.f32 1.442695, %v4539_v22 }
0x2e32   :  { %v4543_v3 = vmul.f32 1.442695, %v4540_v1 }
0x2e33   :  { %6445 = vpow2.f32 %v4879_v5 }
0x2e34   :  { %6447 = vpow2.f32 %v4881_v14 }
0x2e35   :  { %6449 = vpow2.f32 %v4541_v57 }
0x2e36   :  { %6451 = vpow2.f32 %v4543_v3 }
0x2e3d   :  { %v6446_v16 = vpop.eup %6445 }
0x2e3e   :  { %v6448_v9 = vpop.eup %6447  ;;  %v4883_v37 = vsel %vm4505_vm7, %v6446_v16, 0.0 }
0x2e3f   :  { %v6450_v8 = vpop.eup %6449  ;;  %v4884_v12 = vsel %vm4505_vm7, %v6448_v9, 0.0 }
0x2e40   :  { %v6452_v45 = vpop.eup %6451  ;;  %v4885_v13 = vadd.f32 %v4884_v12, %v4883_v37  ;;  %v4545_v29 = vsel %vm4505_vm7, %v6450_v8, 0.0 }
0x2e41   :  { %v4546_v56 = vsel %vm4505_vm7, %v6452_v45, 0.0 }
0x2e42   :  { %v4886_v35 = vrot.slane %v4885_v13, 4  ;;  %v4547_v0 = vadd.f32 %v4546_v56, %v4545_v29 }
0x2e44   :  { %v4887_v61 = vadd.f32 %v4886_v35, %v4885_v13  ;;  %v4548_v20 = vrot.slane %v4547_v0, 4 }
0x2e46   :  { %v4888_v18 = vrot.slane %v4887_v61, 2  ;;  %v4549_v46 = vadd.f32 %v4548_v20, %v4547_v0 }
0x2e48   :  { %v4889_v6 = vadd.f32 %v4888_v18, %v4887_v61  ;;  %v4550_v30 = vrot.slane %v4549_v46, 2 }
0x2e4a   :  { %v4890_v17 = vrot.slane %v4889_v6, 1  ;;  %v4551_v34 = vadd.f32 %v4550_v30, %v4549_v46 }
0x2e4c   :  { %v4891_v38 = vadd.f32 %v4890_v17, %v4889_v6  ;;  %v4552_v10 = vrot.slane %v4551_v34, 1 }
0x2e4e   :  { %6453 = vrcp.f32 %v4891_v38  ;;  %v4553_v28 = vadd.f32 %v4552_v10, %v4551_v34 }
0x2e50   :  { %6455 = vrcp.f32 %v4553_v28 }
0x2e58   :  { %v6454_v39 = vpop.eup %6453 }
0x2e59   :  { %v4893_v51 = vmul.f32 %v6454_v39, %v6446_v16  ;;  %v4894_v59 = vmul.f32 %v6454_v39, %v6448_v9 }
0x2e5a   :  { %v6456_v33 = vpop.eup %6455 }
0x2e5b   :  { %4895 = vxpose.xlu1.b32.start [1/2] (short) (narrow) %v4893_v51, 8  ;;  %v4555_v7 = vmul.f32 %v6456_v33, %v6450_v8  ;;  %v4556_v49 = vmul.f32 %v6456_v33, %v6452_v45 }
0x2e5d   :  { %4557 = vxpose.xlu0.b32.start [1/2] (short) (narrow) %v4555_v7, 8 }
0x2e5f   :  { %4896 = vxpose.xlu1.b32.end [2/2] (short) (narrow) %v4894_v59, 8 }
0x2e61   :  { %4558 = vxpose.xlu0.b32.end [2/2] (short) (narrow) %v4556_v49, 8 }
0x2e6e   :  { %v4757_v21 = vpop.xlane.xlu0 %4756 }
0x2e6f   :  { %6457 = vrcp.f32 %v4757_v21 }
0x2e76   :  { %v5091_v11 = vpop.xlane.xlu1 %5090 }
0x2e77   :  { %6459 = vrcp.f32 %v5091_v11 }
0x2e79   :  { %v6458_v31 = vpop.eup %6457 }
0x2e7a   :  { %v4759_v60 = vmul.f32 %v6458_v31, %v7734_v32 }
0x2e81   :  { %v6460_v25 = vpop.eup %6459 }
0x2edb   :  { %v4911_v62 = vpop.trf.xlu1 }
0x2edd   :  { %v4573_v42 = vpop.trf.xlu0 }
0x2ede   :  { %5927 = vmatmul.mubr.msk.f32.vlgmr.msra.gmra.mrb[40].mxu1 %vm4589_vm6, %v4573_v42 }
0x2edf   :  { %6205 = vmatpush3.bf16.msra.mxu1 %v7692_v4  ;;  %5940 = vmatprep.mubr.msk.f32.mxu1 %vm6573_vm1, %v7855_v48  ;;  %v5093_v4 = vmul.f32 %v6460_v25, %v7738_v53 }
0x2ee0   :  { %6206 = vmatprep.subr.bf16.mxu1 %v7839_v19 }
0x2ee2   :  { %5941 = vmatmul.mubr.msk.f32.vlgmr.msra.gmra.mrb[42].mxu1 %vm4589_vm6, %v4759_v60 }
0x2ee3   :  { %6208 = vmatpush3.bf16.msra.mxu1 %v7701_v44  ;;  %5947 = vmatprep.mubr.msk.f32.mxu1 %vm6573_vm1, %v7855_v48 }
0x2ee4   :  { %6213 = vmatprep.subr.bf16.mxu1 %v7839_v19 }
0x2ee6   :  { %5948 = vmatmul.mubr.msk.f32.vlgmr.msra.gmra.mrb[44].mxu1 %vm4589_vm6, %v4911_v62 }
0x2ee7   :  { %6215 = vmatpush3.bf16.msra.mxu1 %v7701_v44  ;;  %5961 = vmatprep.mubr.msk.f32.mxu1 %vm6573_vm1, %v7855_v48 }
0x2eea   :  { %5962 = vmatmul.mubr.msk.f32.vlgmr.msra.gmra.mrb[46].mxu1 %vm4589_vm6, %v5093_v4 }
0x2fb1   :  { %v4659_v32 = vpop.f32.mrb[40].mxu1 }
0x2fb2   :  { %v5928_v47 = vpop.f32.mrb[41].mxu1  ;;  %v4663_v63 = vmul.f32 %v4659_v32, %v4659_v32 }
0x2fb4   :  { %v4664_v44 = vsel %vm4302_vm4, %v4663_v63, 0.0 }
0x2fb5   :  { %v4829_v27 = vpop.f32.mrb[42].mxu1 }
0x2fb6   :  { %v4833_v50 = vmul.f32 %v4829_v27, %v4829_v27  ;;  %v5942_v15 = vpop.f32.mrb[43].mxu1 }
0x2fb8   :  { %v4834_v19 = vsel %vm4302_vm4, %v4833_v50, 0.0 }
0x2fb9   :  { %4835 = vadd.xlane.f32.xlu0 %v4834_v19  ;;  %v4996_v58 = vpop.f32.mrb[44].mxu1 }
0x2fba   :  { %v5949_v55 = vpop.f32.mrb[45].mxu1  ;;  %v5000_v53 = vmul.f32 %v4996_v58, %v4996_v58 }
0x2fbc   :  { %v5001_v23 = vsel %vm4302_vm4, %v5000_v53, 0.0 }
0x2fbd   :  { %4665 = vadd.xlane.f32.xlu0 %v4664_v44  ;;  %v5163_v43 = vpop.f32.mrb[46].mxu1 }
0x2fbe   :  { %v5167_v48 = vmul.f32 %v5163_v43, %v5163_v43  ;;  %v5963_v52 = vpop.f32.mrb[47].mxu1 }
0x2fc0   :  { %v5168_v2 = vsel %vm4302_vm4, %v5167_v48, 0.0 }
0x2fc1   :  { %5169 = vadd.xlane.f32.xlu1 %v5168_v2 }
0x2fc5   :  { %5002 = vadd.xlane.f32.xlu1 %v5001_v23 }
0x3046   :  { %v4836_v36 = vpop.xlane.xlu0 %4835 }
0x3047   :  { %v4837_v24 = vmax.f32 %v4836_v36, 1e-24 }
0x3049   :  { %6461 = vrsqrt.f32 %v4837_v24 }
0x304a   :  { %v4666_v5 = vpop.xlane.xlu0 %4665 }
0x304b   :  { %v4667_v14 = vmax.f32 %v4666_v5, 1e-24 }
0x304e   :  { %v5170_v26 = vpop.xlane.xlu1 %5169 }
0x304f   :  { %v5171_v40 = vmax.f32 %v5170_v26, 1e-24 }
0x3051   :  { %6463 = vrsqrt.f32 %v5171_v40 }
0x3052   :  { %6465 = vrsqrt.f32 %v4667_v14  ;;  %v5003_v57 = vpop.xlane.xlu1 %5002 }
0x3053   :  { %v6462_v41 = vpop.eup %6461  ;;  %v5004_v3 = vmax.f32 %v5003_v57, 1e-24 }
0x3054   :  { %v4839_v54 = vmul.f32 %v6462_v41, %v4829_v27 }
0x3055   :  { %6467 = vrsqrt.f32 %v5004_v3 }
0x3056   :  { %4841 = vrot.lane.b32.xlu0 %v4839_v54, %s6576_s3 }
0x305b   :  { %v6464_v22 = vpop.eup %6463 }
0x305c   :  { %v5173_v1 = vmul.f32 %v6464_v22, %v5163_v43  ;;  %v6466_v16 = vpop.eup %6465 }
0x305d   :  { %v4669_v9 = vmul.f32 %v6466_v16, %v4659_v32 }
0x305e   :  { %5175 = vrot.lane.b32.xlu1 %v5173_v1, %s6576_s3  ;;  %s6539_s3 = scalar_lea.vmem %s5187_s12, 256 }
0x305f   :  { %v6468_v12 = vpop.eup %6467  ;;  %p6540_p10 = scmp.ne.s32.totalorder %s5187_s12, %s6539_s3  ;;  %p6545_p12 = scmp.lt.s32.totalorder %s6539_s3, %s6539_s3 }
0x3060   :  { %v5006_v45 = vmul.f32 %v6468_v12, %v4996_v58 }
0x3061   :  { %p6546_p13 = por %p6545_p12, %p6544_p11 }
0x3063   :  { %p6547_p0 = pnand %p6546_p13, %p6540_p10 }
0x30c8   :  { %v4842_v37 = vpop.permute.xlu0 %4841 }
0x30c9   :  { %v4844_v8 = vsel %vm4302_vm4, %v4669_v9, %v4842_v37 }
0x30ca   :  { %4845 = vst [vmem:[#allocation13] sm:$0xff] %v4844_v8 }
0x30d0   :  { %v5176_v13 = vpop.permute.xlu1 %5175 }
0x30d1   :  { %v5178_v29 = vsel %vm4302_vm4, %v5006_v45, %v5176_v13 }
0x30d2   :  { %5180 = vst [vmem:[#allocation13 + $0x8] sm:$0xff] %v5178_v29 }
0x30d3   :  { %6550 = shalt.err (!%p6547_p0)
}
0x30d4   :  { %s6551_s6 = scalar_lea.hbm %s7808_s14, 256 }
0x30d5   :  { %p6552_p1 = scmp.ne.s32.totalorder %s7808_s14, %s6551_s6  ;;  %p6555_p2 = scmp.lt.u32.totalorder %s6551_s6, %s7808_s14 }
0x30d7   :  { %p6557_p3 = pnand %p6555_p2, %p6552_p1 }
0x30d9   :  { %6560 = shalt.err (!%p6557_p3)
}
0x30da   :  { %5192 = dma.vmem_to_hbm [thread:$0]  %s5187_s12, 256, %s7808_s14, [#allocation9], %s6569_s25, %s6569_s25, %s6570_s26  }
0x30db   :  { %6565 = dma.done.wait [#allocation9], 256  }
0x30dc   :  { %6566 = vsyncadd [#allocation9], 4294967040 }
0x30dd   :  { %5196 = vsyncpa [#allocation8], 1 }
0x30de   :  { %5197 = vsyncpa [#allocation11], 1 }
0x30df   :  { %5198 = vsyncpa [#allocation9], 1 }

</bundles_post_ra>
